<compile_context>
chip_gen: v5e
topology: v5e:2x2
jax: 0.10.0
libtpu: 0.0.40
codegen_flags: <defaults>
</compile_context>

<pallas_src>
import functools

import jax
import jax.numpy as jnp
from jax import lax
from jax.experimental import pallas as pl
from jax.experimental.pallas import tpu as pltpu

BN_EPS = 1e-5          # torch.nn.BatchNorm1d default
LRELU_SLOPE = 0.01     # torch.nn.LeakyReLU default negative_slope


def conv_cfg(window_size, latent_size):
    ws = window_size
    # (C_in, C_out, kernel, stride, pad)
    return [
        (ws,       ws * 2,      7, 1, 0),
        (ws * 2,   ws * 4,      4, 2, 1),
        (ws * 4,   ws * 8,      4, 2, 1),
        (ws * 8,   ws * 16,     4, 2, 1),
        (ws * 16,  latent_size, 10, 1, 0),
    ]


def _out_len(l, k, s, p):
    return (l + 2 * p - k) // s + 1


def _round_up(x, m):
    return (x + m - 1) // m * m


# ----------------------------- Pallas kernel ------------------------------- #

def _bn_lrelu(y, gamma, beta):
    # Train-mode BatchNorm1d over rows (N*L) + LeakyyReLU folded to one scale+shift.
    # Single fused pass: sum and sum-of-squares over the same y read; rsqrt on EUP.
    inv_r = 1.0 / y.shape[0]
    mean = jnp.sum(y, axis=0, keepdims=True) * inv_r
    ex2 = jnp.sum(y * y, axis=0, keepdims=True) * inv_r
    var = jnp.maximum(ex2 - mean * mean, 0.0)          # single-pass variance, clamped
    scale = gamma * lax.rsqrt(var + BN_EPS)
    shift = beta - mean * scale
    y = y * scale + shift
    return jnp.where(y >= 0, y, LRELU_SLOPE * y)


def _gather_patch(src_ref, *, n, lp, l_out, k, stride):
    # im2col patch (n*l_out, k*C_in) built from strided sublane slices of a
    # zero-padded activation buffer: no MXU, no transposes, no gather matrices.
    batch_blocks = []
    for b in range(n):
        taps = []
        for t in range(k):
            start = b * lp + t
            idx = pl.ds(start, l_out) if stride == 1 else pl.ds(start, l_out, stride=stride)
            taps.append(src_ref[idx, :])
        batch_blocks.append(taps[0] if k == 1 else jnp.concatenate(taps, axis=-1))
    return batch_blocks[0] if n == 1 else jnp.concatenate(batch_blocks, axis=0)


def _make_kernel(n, cfgs, lens, w_offsets):
    latent = cfgs[4][1]

    def kernel(x_ref, w_ref, p_ref, o_ref, b1, b2, b3, b4):
        bufs = (b1, b2, b3, b4)

        # Zero the scratch buffers whose consumer layer has zero padding so the
        # boundary taps read exact zeros (interior rows are overwritten below).
        for li in range(4):
            if cfgs[li + 1][4] > 0:
                bufs[li][...] = jnp.zeros_like(bufs[li])

        src_ref = x_ref
        lp = lens[0]                 # per-batch row count in src_ref (incl. pad rows)
        z = None
        for li, (ci, co, k, s, p) in enumerate(cfgs):
            l_out = lens[li + 1]
            patch = _gather_patch(src_ref, n=n, lp=lp, l_out=l_out, k=k, stride=s)
            w = w_ref[w_offsets[li]:w_offsets[li] + k * ci, :co]      # bf16 (k*ci, co)
            y = jnp.dot(patch.astype(jnp.bfloat16), w,
                        preferred_element_type=jnp.float32)          # f32 accumulation

            if li < 4:
                # conv bias folded away: it cancels exactly under train-mode BN mean
                # subtraction.  TODO(synk): eval-mode (running-stats) BN would need it back.
                h = _bn_lrelu(y, p_ref[2 * li:2 * li + 1, :co],
                              p_ref[2 * li + 1:2 * li + 2, :co])
                pad_next = cfgs[li + 1][4]
                lp = l_out + 2 * pad_next
                buf = bufs[li]
                for b in range(n):
                    r0 = b * lp + pad_next
                    buf[r0:r0 + l_out, :] = h[b * l_out:(b + 1) * l_out, :]
                src_ref = buf
            else:
                z = y + p_ref[8:9, :co]                               # conv5 bias; (n, latent)

        # Linear(latent -> 1) + Sigmoid head on VPU/XLU/EUP (1-lane output).
        wl = p_ref[9:10, :latent]
        bl = p_ref[10:11, 0:1]
        logits = jnp.sum(z * wl, axis=-1, keepdims=True) + bl
        o_ref[...] = 1.0 / (1.0 + jnp.exp(-logits))

    return kernel


# ------------------------------- JAX glue ---------------------------------- #

def discriminator_forward(params, x, *, window_size, latent_size):
    cfgs = conv_cfg(window_size, latent_size)
    n, c_in, l_in = x.shape
    assert c_in == window_size
    # TODO(synk): torch .squeeze() would also drop the batch dim when N == 1; this
    # implementation assumes N >= 2 so only the length-1 dim is squeezed.
    assert n >= 2, "N must be >= 2 so .squeeze() only drops the length dim"

    lens = [l_in]
    for ci, co, k, s, p in cfgs:
        lens.append(_out_len(lens[-1], k, s, p))
    assert lens[-1] == 1, (
        f"encoder output length must be 1 for .squeeze(); got {lens[-1]} (use L=86 for ws=4)")

    # ---- activations as (N*L, C_in) rows: the only XLA-side layout op ----
    x_rows = jnp.transpose(x, (0, 2, 1)).reshape(n * l_in, c_in)

    # ---- pack all conv weights into ONE bf16 array (16-row aligned offsets) ----
    max_cout = max(co for _, co, _, _, _ in cfgs)
    w_offsets, row = [], 0
    for ci, co, k, s, p in cfgs:
        w_offsets.append(row)
        row += _round_up(k * ci, 16)
    wbuf = jnp.zeros((row, max_cout), jnp.bfloat16)
    for li, (ci, co, k, s, p) in enumerate(cfgs):
        # W_stack[t*ci + c, o] = w[o, c, t]  (matches tap-major patch layout)
        wstack = jnp.transpose(params["conv_w"][li], (2, 1, 0)).reshape(k * ci, co)
        wbuf = wbuf.at[w_offsets[li]:w_offsets[li] + k * ci, :co].set(
            wstack.astype(jnp.bfloat16))

    # ---- pack the 11 tiny parameter vectors into ONE (16, 128) f32 array ----
    pw = max(128, _round_up(max(max_cout, latent_size), 128))
    vecs = []
    for li in range(4):
        vecs += [params["bn_gamma"][li], params["bn_beta"][li]]
    vecs += [params["conv_b"][4], params["lin_w"].reshape(-1), params["lin_b"].reshape(-1)]
    pbuf = jnp.zeros((16, pw), jnp.float32)
    for r, v in enumerate(vecs):
        pbuf = pbuf.at[r, :v.shape[0]].set(v.astype(jnp.float32))

    # ---- VMEM scratch: zero-padded inter-layer activation buffers ----
    scratch = []
    for li in range(4):
        co = cfgs[li][1]
        lp = lens[li + 1] + 2 * cfgs[li + 1][4]
        scratch.append(pltpu.VMEM((n * lp, co), jnp.float32))

    # accurate cost hint (conv matmuls only) so XLA schedules around the tiny call
    flops = 2 * n * latent_size
    for li, (ci, co, k, s, p) in enumerate(cfgs):
        flops += 2 * (n * lens[li + 1]) * (k * ci) * co
    transcendentals = sum(cfgs[li][1] for li in range(4)) + n
    bytes_accessed = x_rows.size * 4 + wbuf.size * 2 + pbuf.size * 4 + n * 4

    kernel = _make_kernel(n, cfgs, lens, w_offsets)
    return pl.pallas_call(
        kernel,
        out_shape=jax.ShapeDtypeStruct((n, 1), jnp.float32),
        in_specs=[pl.BlockSpec(memory_space=pltpu.MemorySpace.VMEM)] * 3,
        out_specs=pl.BlockSpec(memory_space=pltpu.MemorySpace.VMEM),
        scratch_shapes=scratch,
        cost_estimate=pl.CostEstimate(flops=int(flops),
                                      transcendentals=int(transcendentals),
                                      bytes_accessed=int(bytes_accessed)),
    )(x_rows, wbuf, pbuf)


# --------------------------- reference & params ----------------------------- #

def reference_forward(params, x, window_size, latent_size):
    # Pure-JAX reference of the PyTorch forward (train-mode BatchNorm).
    cfgs = conv_cfg(window_size, latent_size)
    h = x
    for i, (ci, co, k, s, p) in enumerate(cfgs):
        w = params["conv_w"][i]
        b = params["conv_b"][i]
        h = lax.conv_general_dilated(h, w, window_strides=(s,), padding=[(p, p)],
                                     dimension_numbers=("NCH", "OIH", "NCH"))
        h = h + b[None, :, None]
        if i < 4:
            mean = jnp.mean(h, axis=(0, 2), keepdims=True)
            var = jnp.mean((h - mean) ** 2, axis=(0, 2), keepdims=True)
            h = (h - mean) / jnp.sqrt(var + BN_EPS)
            h = h * params["bn_gamma"][i][None, :, None] + params["bn_beta"][i][None, :, None]
            h = jnp.where(h >= 0, h, LRELU_SLOPE * h)
    z = h.squeeze(-1)                                             # (N, latent)
    logits = z @ params["lin_w"].T + params["lin_b"][None, :]
    return jax.nn.sigmoid(logits)


def init_params(key, window_size, latent_size):
    params = {"conv_w": [], "conv_b": [], "bn_gamma": [], "bn_beta": []}
    for i, (ci, co, k, _, _) in enumerate(conv_cfg(window_size, latent_size)):
        key, kw, kb = jax.random.split(key, 3)
        bound = 1.0 / float(jnp.sqrt(ci * k))
        params["conv_w"].append(jax.random.uniform(kw, (co, ci, k), jnp.float32, -bound, bound))
        params["conv_b"].append(jax.random.uniform(kb, (co,), jnp.float32, -bound, bound))
        if i < 4:
            key, kg, kbt = jax.random.split(key, 3)
            params["bn_gamma"].append(1.0 + 0.1 * jax.random.normal(kg, (co,), jnp.float32))
            params["bn_beta"].append(0.1 * jax.random.normal(kbt, (co,), jnp.float32))
    key, kw, kb = jax.random.split(key, 3)
    bound = 1.0 / float(jnp.sqrt(latent_size))
    params["lin_w"] = jax.random.uniform(kw, (1, latent_size), jnp.float32, -bound, bound)
    params["lin_b"] = jax.random.uniform(kb, (1,), jnp.float32, -bound, bound)
    return params


if __name__ == "__main__":
    window_size, latent_size = 4, 16
    N, L = 2, 86   # L = 86 so the encoder output length is exactly 1 (required by squeeze())

    key = jax.random.PRNGKey(0)
    kp, kx = jax.random.split(key)
    params = init_params(kp, window_size, latent_size)
    x = jax.random.normal(kx, (N, window_size, L), jnp.float32)

    fwd = jax.jit(functools.partial(discriminator_forward,
                                    window_size=window_size, latent_size=latent_size))
    out = jax.block_until_ready(fwd(params, x))
    assert out.shape == (N, 1), out.shape

    ref = reference_forward(params, x, window_size, latent_size)
    assert jnp.allclose(out, ref, atol=5e-2), (out, ref)

    print("KERNEL_OK")
</pallas_src>

<mosaic_0001>
module attributes {stable_mosaic.version = 11 : i64} {
  func.func @kernel(%arg0: memref<172x4xf32, #tpu.memory_space<vmem>>, %arg1: memref<896x64xbf16, #tpu.memory_space<vmem>>, %arg2: memref<16x128xf32, #tpu.memory_space<vmem>>, %arg3: memref<2x1xf32, #tpu.memory_space<vmem>>, %arg4: memref<164x8xf32, #tpu.memory_space<vmem>>, %arg5: memref<84x16xf32, #tpu.memory_space<vmem>>, %arg6: memref<44x32xf32, #tpu.memory_space<vmem>>, %arg7: memref<20x64xf32, #tpu.memory_space<vmem>>) attributes {dimension_semantics = [], scalar_prefetch = 0 : i64, scratch_operands = 4 : i64, tpu.core_type = #tpu.core_type<tc>} {
    %cst = arith.constant 0.000000e+00 : f32
    %0 = vector.broadcast %cst : f32 to vector<164x8xf32>
    %c0 = arith.constant 0 : index
    %c0_0 = arith.constant 0 : index
    %1 = vector.load %arg4[%c0, %c0_0] : memref<164x8xf32, #tpu.memory_space<vmem>>, vector<164x8xf32>
    tpu.vector_store %arg4[%c0, %c0_0], %0 {strides = array<i32>} : memref<164x8xf32, #tpu.memory_space<vmem>>, vector<164x8xf32>,
    %cst_1 = arith.constant 0.000000e+00 : f32
    %2 = vector.broadcast %cst_1 : f32 to vector<84x16xf32>
    %c0_2 = arith.constant 0 : index
    %c0_3 = arith.constant 0 : index
    %3 = vector.load %arg5[%c0_2, %c0_3] : memref<84x16xf32, #tpu.memory_space<vmem>>, vector<84x16xf32>
    tpu.vector_store %arg5[%c0_2, %c0_3], %2 {strides = array<i32>} : memref<84x16xf32, #tpu.memory_space<vmem>>, vector<84x16xf32>,
    %cst_4 = arith.constant 0.000000e+00 : f32
    %4 = vector.broadcast %cst_4 : f32 to vector<44x32xf32>
    %c0_5 = arith.constant 0 : index
    %c0_6 = arith.constant 0 : index
    %5 = vector.load %arg6[%c0_5, %c0_6] : memref<44x32xf32, #tpu.memory_space<vmem>>, vector<44x32xf32>
    tpu.vector_store %arg6[%c0_5, %c0_6], %4 {strides = array<i32>} : memref<44x32xf32, #tpu.memory_space<vmem>>, vector<44x32xf32>,
    %c0_7 = arith.constant 0 : index
    %c0_8 = arith.constant 0 : index
    %6 = vector.load %arg0[%c0_7, %c0_8] : memref<172x4xf32, #tpu.memory_space<vmem>>, vector<80x4xf32>
    %c1 = arith.constant 1 : index
    %c0_9 = arith.constant 0 : index
    %7 = vector.load %arg0[%c1, %c0_9] : memref<172x4xf32, #tpu.memory_space<vmem>>, vector<80x4xf32>
    %c2 = arith.constant 2 : index
    %c0_10 = arith.constant 0 : index
    %8 = vector.load %arg0[%c2, %c0_10] : memref<172x4xf32, #tpu.memory_space<vmem>>, vector<80x4xf32>
    %c3 = arith.constant 3 : index
    %c0_11 = arith.constant 0 : index
    %9 = vector.load %arg0[%c3, %c0_11] : memref<172x4xf32, #tpu.memory_space<vmem>>, vector<80x4xf32>
    %c4 = arith.constant 4 : index
    %c0_12 = arith.constant 0 : index
    %10 = vector.load %arg0[%c4, %c0_12] : memref<172x4xf32, #tpu.memory_space<vmem>>, vector<80x4xf32>
    %c5 = arith.constant 5 : index
    %c0_13 = arith.constant 0 : index
    %11 = vector.load %arg0[%c5, %c0_13] : memref<172x4xf32, #tpu.memory_space<vmem>>, vector<80x4xf32>
    %c6 = arith.constant 6 : index
    %c0_14 = arith.constant 0 : index
    %12 = vector.load %arg0[%c6, %c0_14] : memref<172x4xf32, #tpu.memory_space<vmem>>, vector<80x4xf32>
    %13 = tpu.concatenate %6, %7, %8, %9, %10, %11, %12 in 1 : vector<80x4xf32>, vector<80x4xf32>, vector<80x4xf32>, vector<80x4xf32>, vector<80x4xf32>, vector<80x4xf32>, vector<80x4xf32> -> vector<80x28xf32>
    %c86 = arith.constant 86 : index
    %c0_15 = arith.constant 0 : index
    %14 = vector.load %arg0[%c86, %c0_15] : memref<172x4xf32, #tpu.memory_space<vmem>>, vector<80x4xf32>
    %c87 = arith.constant 87 : index
    %c0_16 = arith.constant 0 : index
    %15 = vector.load %arg0[%c87, %c0_16] : memref<172x4xf32, #tpu.memory_space<vmem>>, vector<80x4xf32>
    %c88 = arith.constant 88 : index
    %c0_17 = arith.constant 0 : index
    %16 = vector.load %arg0[%c88, %c0_17] : memref<172x4xf32, #tpu.memory_space<vmem>>, vector<80x4xf32>
    %c89 = arith.constant 89 : index
    %c0_18 = arith.constant 0 : index
    %17 = vector.load %arg0[%c89, %c0_18] : memref<172x4xf32, #tpu.memory_space<vmem>>, vector<80x4xf32>
    %c90 = arith.constant 90 : index
    %c0_19 = arith.constant 0 : index
    %18 = vector.load %arg0[%c90, %c0_19] : memref<172x4xf32, #tpu.memory_space<vmem>>, vector<80x4xf32>
    %c91 = arith.constant 91 : index
    %c0_20 = arith.constant 0 : index
    %19 = vector.load %arg0[%c91, %c0_20] : memref<172x4xf32, #tpu.memory_space<vmem>>, vector<80x4xf32>
    %c92 = arith.constant 92 : index
    %c0_21 = arith.constant 0 : index
    %20 = vector.load %arg0[%c92, %c0_21] : memref<172x4xf32, #tpu.memory_space<vmem>>, vector<80x4xf32>
    %21 = tpu.concatenate %14, %15, %16, %17, %18, %19, %20 in 1 : vector<80x4xf32>, vector<80x4xf32>, vector<80x4xf32>, vector<80x4xf32>, vector<80x4xf32>, vector<80x4xf32>, vector<80x4xf32> -> vector<80x28xf32>
    %22 = tpu.concatenate %13, %21 in 0 : vector<80x28xf32>, vector<80x28xf32> -> vector<160x28xf32>
    %c0_22 = arith.constant 0 : index
    %c0_23 = arith.constant 0 : index
    %23 = vector.load %arg1[%c0_22, %c0_23] : memref<896x64xbf16, #tpu.memory_space<vmem>>, vector<28x8xbf16>
    %24 = arith.truncf %22 : vector<160x28xf32> to vector<160x28xbf16>
    %cst_24 = arith.constant dense<0.000000e+00> : vector<160x8xf32>
    %25 = tpu.matmul %24, %23, %cst_24 {dimension_numbers = #tpu.dot_dimension_numbers<[1], [0], [0], [1], [0, 0, 1, 1], [], []>} : vector<160x28xbf16>, vector<28x8xbf16>, vector<160x8xf32> -> vector<160x8xf32>
    %c0_25 = arith.constant 0 : index
    %c0_26 = arith.constant 0 : index
    %26 = vector.load %arg2[%c0_25, %c0_26] : memref<16x128xf32, #tpu.memory_space<vmem>>, vector<1x8xf32>
    %c1_27 = arith.constant 1 : index
    %c0_28 = arith.constant 0 : index
    %27 = vector.load %arg2[%c1_27, %c0_28] : memref<16x128xf32, #tpu.memory_space<vmem>>, vector<1x8xf32>
    %cst_29 = arith.constant dense<0.000000e+00> : vector<8xf32>
    %28 = vector.multi_reduction <add>, %25, %cst_29 [0] : vector<160x8xf32> to vector<8xf32>
    %29 = vector.shape_cast %28 : vector<8xf32> to vector<1x8xf32>
    %cst_30 = arith.constant 6.250000e-03 : f32
    %30 = vector.broadcast %cst_30 : f32 to vector<1x8xf32>
    %31 = arith.mulf %29, %30 : vector<1x8xf32>
    %32 = arith.mulf %25, %25 : vector<160x8xf32>
    %cst_31 = arith.constant dense<0.000000e+00> : vector<8xf32>
    %33 = vector.multi_reduction <add>, %32, %cst_31 [0] : vector<160x8xf32> to vector<8xf32>
    %34 = vector.shape_cast %33 : vector<8xf32> to vector<1x8xf32>
    %cst_32 = arith.constant 6.250000e-03 : f32
    %35 = vector.broadcast %cst_32 : f32 to vector<1x8xf32>
    %36 = arith.mulf %34, %35 : vector<1x8xf32>
    %37 = arith.mulf %31, %31 : vector<1x8xf32>
    %38 = arith.subf %36, %37 : vector<1x8xf32>
    %cst_33 = arith.constant 0.000000e+00 : f32
    %39 = vector.broadcast %cst_33 : f32 to vector<1x8xf32>
    %40 = arith.maximumf %38, %39 : vector<1x8xf32>
    %cst_34 = arith.constant 9.99999974E-6 : f32
    %41 = vector.broadcast %cst_34 : f32 to vector<1x8xf32>
    %42 = arith.addf %40, %41 : vector<1x8xf32>
    %43 = math.rsqrt %42 : vector<1x8xf32>
    %44 = arith.mulf %26, %43 : vector<1x8xf32>
    %45 = arith.mulf %31, %44 : vector<1x8xf32>
    %46 = arith.subf %27, %45 : vector<1x8xf32>
    %47 = vector.broadcast %44 : vector<1x8xf32> to vector<160x8xf32>
    %48 = arith.mulf %25, %47 : vector<160x8xf32>
    %49 = vector.broadcast %46 : vector<1x8xf32> to vector<160x8xf32>
    %50 = arith.addf %48, %49 : vector<160x8xf32>
    %cst_35 = arith.constant 0.000000e+00 : f32
    %51 = vector.broadcast %cst_35 : f32 to vector<160x8xf32>
    %52 = arith.cmpf oge, %50, %51 : vector<160x8xf32>
    %cst_36 = arith.constant 0.00999999977 : f32
    %53 = vector.broadcast %cst_36 : f32 to vector<160x8xf32>
    %54 = arith.mulf %53, %50 : vector<160x8xf32>
    %55 = arith.select %52, %50, %54 : vector<160x8xi1>, vector<160x8xf32>
    %56 = vector.extract_strided_slice %55 {offsets = [0, 0], sizes = [80, 8], strides = [1, 1]} : vector<160x8xf32> to vector<80x8xf32>
    %c1_37 = arith.constant 1 : index
    %c0_38 = arith.constant 0 : index
    %57 = vector.load %arg4[%c1_37, %c0_38] : memref<164x8xf32, #tpu.memory_space<vmem>>, vector<80x8xf32>
    tpu.vector_store %arg4[%c1_37, %c0_38], %56 {strides = array<i32>} : memref<164x8xf32, #tpu.memory_space<vmem>>, vector<80x8xf32>,
    %58 = vector.extract_strided_slice %55 {offsets = [80, 0], sizes = [80, 8], strides = [1, 1]} : vector<160x8xf32> to vector<80x8xf32>
    %c83 = arith.constant 83 : index
    %c0_39 = arith.constant 0 : index
    %59 = vector.load %arg4[%c83, %c0_39] : memref<164x8xf32, #tpu.memory_space<vmem>>, vector<80x8xf32>
    tpu.vector_store %arg4[%c83, %c0_39], %58 {strides = array<i32>} : memref<164x8xf32, #tpu.memory_space<vmem>>, vector<80x8xf32>,
    %c0_40 = arith.constant 0 : index
    %c0_41 = arith.constant 0 : index
    %60 = tpu.strided_load %arg4[%c0_40, %c0_41] {strides = array<i32: 2, 1>} : memref<164x8xf32, #tpu.memory_space<vmem>>, vector<40x8xf32>
    %c1_42 = arith.constant 1 : index
    %c0_43 = arith.constant 0 : index
    %61 = tpu.strided_load %arg4[%c1_42, %c0_43] {strides = array<i32: 2, 1>} : memref<164x8xf32, #tpu.memory_space<vmem>>, vector<40x8xf32>
    %c2_44 = arith.constant 2 : index
    %c0_45 = arith.constant 0 : index
    %62 = tpu.strided_load %arg4[%c2_44, %c0_45] {strides = array<i32: 2, 1>} : memref<164x8xf32, #tpu.memory_space<vmem>>, vector<40x8xf32>
    %c3_46 = arith.constant 3 : index
    %c0_47 = arith.constant 0 : index
    %63 = tpu.strided_load %arg4[%c3_46, %c0_47] {strides = array<i32: 2, 1>} : memref<164x8xf32, #tpu.memory_space<vmem>>, vector<40x8xf32>
    %64 = tpu.concatenate %60, %61, %62, %63 in 1 : vector<40x8xf32>, vector<40x8xf32>, vector<40x8xf32>, vector<40x8xf32> -> vector<40x32xf32>
    %c82 = arith.constant 82 : index
    %c0_48 = arith.constant 0 : index
    %65 = tpu.strided_load %arg4[%c82, %c0_48] {strides = array<i32: 2, 1>} : memref<164x8xf32, #tpu.memory_space<vmem>>, vector<40x8xf32>
    %c83_49 = arith.constant 83 : index
    %c0_50 = arith.constant 0 : index
    %66 = tpu.strided_load %arg4[%c83_49, %c0_50] {strides = array<i32: 2, 1>} : memref<164x8xf32, #tpu.memory_space<vmem>>, vector<40x8xf32>
    %c84 = arith.constant 84 : index
    %c0_51 = arith.constant 0 : index
    %67 = tpu.strided_load %arg4[%c84, %c0_51] {strides = array<i32: 2, 1>} : memref<164x8xf32, #tpu.memory_space<vmem>>, vector<40x8xf32>
    %c85 = arith.constant 85 : index
    %c0_52 = arith.constant 0 : index
    %68 = tpu.strided_load %arg4[%c85, %c0_52] {strides = array<i32: 2, 1>} : memref<164x8xf32, #tpu.memory_space<vmem>>, vector<40x8xf32>
    %69 = tpu.concatenate %65, %66, %67, %68 in 1 : vector<40x8xf32>, vector<40x8xf32>, vector<40x8xf32>, vector<40x8xf32> -> vector<40x32xf32>
    %70 = tpu.concatenate %64, %69 in 0 : vector<40x32xf32>, vector<40x32xf32> -> vector<80x32xf32>
    %c32 = arith.constant 32 : index
    %c0_53 = arith.constant 0 : index
    %71 = vector.load %arg1[%c32, %c0_53] : memref<896x64xbf16, #tpu.memory_space<vmem>>, vector<32x16xbf16>
    %72 = arith.truncf %70 : vector<80x32xf32> to vector<80x32xbf16>
    %cst_54 = arith.constant dense<0.000000e+00> : vector<80x16xf32>
    %73 = tpu.matmul %72, %71, %cst_54 {dimension_numbers = #tpu.dot_dimension_numbers<[1], [0], [0], [1], [0, 0, 1, 1], [], []>} : vector<80x32xbf16>, vector<32x16xbf16>, vector<80x16xf32> -> vector<80x16xf32>
    %c2_55 = arith.constant 2 : index
    %c0_56 = arith.constant 0 : index
    %74 = vector.load %arg2[%c2_55, %c0_56] : memref<16x128xf32, #tpu.memory_space<vmem>>, vector<1x16xf32>
    %c3_57 = arith.constant 3 : index
    %c0_58 = arith.constant 0 : index
    %75 = vector.load %arg2[%c3_57, %c0_58] : memref<16x128xf32, #tpu.memory_space<vmem>>, vector<1x16xf32>
    %cst_59 = arith.constant dense<0.000000e+00> : vector<16xf32>
    %76 = vector.multi_reduction <add>, %73, %cst_59 [0] : vector<80x16xf32> to vector<16xf32>
    %77 = vector.shape_cast %76 : vector<16xf32> to vector<1x16xf32>
    %cst_60 = arith.constant 1.250000e-02 : f32
    %78 = vector.broadcast %cst_60 : f32 to vector<1x16xf32>
    %79 = arith.mulf %77, %78 : vector<1x16xf32>
    %80 = arith.mulf %73, %73 : vector<80x16xf32>
    %cst_61 = arith.constant dense<0.000000e+00> : vector<16xf32>
    %81 = vector.multi_reduction <add>, %80, %cst_61 [0] : vector<80x16xf32> to vector<16xf32>
    %82 = vector.shape_cast %81 : vector<16xf32> to vector<1x16xf32>
    %cst_62 = arith.constant 1.250000e-02 : f32
    %83 = vector.broadcast %cst_62 : f32 to vector<1x16xf32>
    %84 = arith.mulf %82, %83 : vector<1x16xf32>
    %85 = arith.mulf %79, %79 : vector<1x16xf32>
    %86 = arith.subf %84, %85 : vector<1x16xf32>
    %cst_63 = arith.constant 0.000000e+00 : f32
    %87 = vector.broadcast %cst_63 : f32 to vector<1x16xf32>
    %88 = arith.maximumf %86, %87 : vector<1x16xf32>
    %cst_64 = arith.constant 9.99999974E-6 : f32
    %89 = vector.broadcast %cst_64 : f32 to vector<1x16xf32>
    %90 = arith.addf %88, %89 : vector<1x16xf32>
    %91 = math.rsqrt %90 : vector<1x16xf32>
    %92 = arith.mulf %74, %91 : vector<1x16xf32>
    %93 = arith.mulf %79, %92 : vector<1x16xf32>
    %94 = arith.subf %75, %93 : vector<1x16xf32>
    %95 = vector.broadcast %92 : vector<1x16xf32> to vector<80x16xf32>
    %96 = arith.mulf %73, %95 : vector<80x16xf32>
    %97 = vector.broadcast %94 : vector<1x16xf32> to vector<80x16xf32>
    %98 = arith.addf %96, %97 : vector<80x16xf32>
    %cst_65 = arith.constant 0.000000e+00 : f32
    %99 = vector.broadcast %cst_65 : f32 to vector<80x16xf32>
    %100 = arith.cmpf oge, %98, %99 : vector<80x16xf32>
    %cst_66 = arith.constant 0.00999999977 : f32
    %101 = vector.broadcast %cst_66 : f32 to vector<80x16xf32>
    %102 = arith.mulf %101, %98 : vector<80x16xf32>
    %103 = arith.select %100, %98, %102 : vector<80x16xi1>, vector<80x16xf32>
    %104 = vector.extract_strided_slice %103 {offsets = [0, 0], sizes = [40, 16], strides = [1, 1]} : vector<80x16xf32> to vector<40x16xf32>
    %c1_67 = arith.constant 1 : index
    %c0_68 = arith.constant 0 : index
    %105 = vector.load %arg5[%c1_67, %c0_68] : memref<84x16xf32, #tpu.memory_space<vmem>>, vector<40x16xf32>
    tpu.vector_store %arg5[%c1_67, %c0_68], %104 {strides = array<i32>} : memref<84x16xf32, #tpu.memory_space<vmem>>, vector<40x16xf32>,
    %106 = vector.extract_strided_slice %103 {offsets = [40, 0], sizes = [40, 16], strides = [1, 1]} : vector<80x16xf32> to vector<40x16xf32>
    %c43 = arith.constant 43 : index
    %c0_69 = arith.constant 0 : index
    %107 = vector.load %arg5[%c43, %c0_69] : memref<84x16xf32, #tpu.memory_space<vmem>>, vector<40x16xf32>
    tpu.vector_store %arg5[%c43, %c0_69], %106 {strides = array<i32>} : memref<84x16xf32, #tpu.memory_space<vmem>>, vector<40x16xf32>,
    %c0_70 = arith.constant 0 : index
    %c0_71 = arith.constant 0 : index
    %108 = tpu.strided_load %arg5[%c0_70, %c0_71] {strides = array<i32: 2, 1>} : memref<84x16xf32, #tpu.memory_space<vmem>>, vector<20x16xf32>
    %c1_72 = arith.constant 1 : index
    %c0_73 = arith.constant 0 : index
    %109 = tpu.strided_load %arg5[%c1_72, %c0_73] {strides = array<i32: 2, 1>} : memref<84x16xf32, #tpu.memory_space<vmem>>, vector<20x16xf32>
    %c2_74 = arith.constant 2 : index
    %c0_75 = arith.constant 0 : index
    %110 = tpu.strided_load %arg5[%c2_74, %c0_75] {strides = array<i32: 2, 1>} : memref<84x16xf32, #tpu.memory_space<vmem>>, vector<20x16xf32>
    %c3_76 = arith.constant 3 : index
    %c0_77 = arith.constant 0 : index
    %111 = tpu.strided_load %arg5[%c3_76, %c0_77] {strides = array<i32: 2, 1>} : memref<84x16xf32, #tpu.memory_space<vmem>>, vector<20x16xf32>
    %112 = tpu.concatenate %108, %109, %110, %111 in 1 : vector<20x16xf32>, vector<20x16xf32>, vector<20x16xf32>, vector<20x16xf32> -> vector<20x64xf32>
    %c42 = arith.constant 42 : index
    %c0_78 = arith.constant 0 : index
    %113 = tpu.strided_load %arg5[%c42, %c0_78] {strides = array<i32: 2, 1>} : memref<84x16xf32, #tpu.memory_space<vmem>>, vector<20x16xf32>
    %c43_79 = arith.constant 43 : index
    %c0_80 = arith.constant 0 : index
    %114 = tpu.strided_load %arg5[%c43_79, %c0_80] {strides = array<i32: 2, 1>} : memref<84x16xf32, #tpu.memory_space<vmem>>, vector<20x16xf32>
    %c44 = arith.constant 44 : index
    %c0_81 = arith.constant 0 : index
    %115 = tpu.strided_load %arg5[%c44, %c0_81] {strides = array<i32: 2, 1>} : memref<84x16xf32, #tpu.memory_space<vmem>>, vector<20x16xf32>
    %c45 = arith.constant 45 : index
    %c0_82 = arith.constant 0 : index
    %116 = tpu.strided_load %arg5[%c45, %c0_82] {strides = array<i32: 2, 1>} : memref<84x16xf32, #tpu.memory_space<vmem>>, vector<20x16xf32>
    %117 = tpu.concatenate %113, %114, %115, %116 in 1 : vector<20x16xf32>, vector<20x16xf32>, vector<20x16xf32>, vector<20x16xf32> -> vector<20x64xf32>
    %118 = tpu.concatenate %112, %117 in 0 : vector<20x64xf32>, vector<20x64xf32> -> vector<40x64xf32>
    %c64 = arith.constant 64 : index
    %c0_83 = arith.constant 0 : index
    %119 = vector.load %arg1[%c64, %c0_83] : memref<896x64xbf16, #tpu.memory_space<vmem>>, vector<64x32xbf16>
    %120 = arith.truncf %118 : vector<40x64xf32> to vector<40x64xbf16>
    %cst_84 = arith.constant dense<0.000000e+00> : vector<40x32xf32>
    %121 = tpu.matmul %120, %119, %cst_84 {dimension_numbers = #tpu.dot_dimension_numbers<[1], [0], [0], [1], [0, 0, 1, 1], [], []>} : vector<40x64xbf16>, vector<64x32xbf16>, vector<40x32xf32> -> vector<40x32xf32>
    %c4_85 = arith.constant 4 : index
    %c0_86 = arith.constant 0 : index
    %122 = vector.load %arg2[%c4_85, %c0_86] : memref<16x128xf32, #tpu.memory_space<vmem>>, vector<1x32xf32>
    %c5_87 = arith.constant 5 : index
    %c0_88 = arith.constant 0 : index
    %123 = vector.load %arg2[%c5_87, %c0_88] : memref<16x128xf32, #tpu.memory_space<vmem>>, vector<1x32xf32>
    %cst_89 = arith.constant dense<0.000000e+00> : vector<32xf32>
    %124 = vector.multi_reduction <add>, %121, %cst_89 [0] : vector<40x32xf32> to vector<32xf32>
    %125 = vector.shape_cast %124 : vector<32xf32> to vector<1x32xf32>
    %cst_90 = arith.constant 2.500000e-02 : f32
    %126 = vector.broadcast %cst_90 : f32 to vector<1x32xf32>
    %127 = arith.mulf %125, %126 : vector<1x32xf32>
    %128 = arith.mulf %121, %121 : vector<40x32xf32>
    %cst_91 = arith.constant dense<0.000000e+00> : vector<32xf32>
    %129 = vector.multi_reduction <add>, %128, %cst_91 [0] : vector<40x32xf32> to vector<32xf32>
    %130 = vector.shape_cast %129 : vector<32xf32> to vector<1x32xf32>
    %cst_92 = arith.constant 2.500000e-02 : f32
    %131 = vector.broadcast %cst_92 : f32 to vector<1x32xf32>
    %132 = arith.mulf %130, %131 : vector<1x32xf32>
    %133 = arith.mulf %127, %127 : vector<1x32xf32>
    %134 = arith.subf %132, %133 : vector<1x32xf32>
    %cst_93 = arith.constant 0.000000e+00 : f32
    %135 = vector.broadcast %cst_93 : f32 to vector<1x32xf32>
    %136 = arith.maximumf %134, %135 : vector<1x32xf32>
    %cst_94 = arith.constant 9.99999974E-6 : f32
    %137 = vector.broadcast %cst_94 : f32 to vector<1x32xf32>
    %138 = arith.addf %136, %137 : vector<1x32xf32>
    %139 = math.rsqrt %138 : vector<1x32xf32>
    %140 = arith.mulf %122, %139 : vector<1x32xf32>
    %141 = arith.mulf %127, %140 : vector<1x32xf32>
    %142 = arith.subf %123, %141 : vector<1x32xf32>
    %143 = vector.broadcast %140 : vector<1x32xf32> to vector<40x32xf32>
    %144 = arith.mulf %121, %143 : vector<40x32xf32>
    %145 = vector.broadcast %142 : vector<1x32xf32> to vector<40x32xf32>
    %146 = arith.addf %144, %145 : vector<40x32xf32>
    %cst_95 = arith.constant 0.000000e+00 : f32
    %147 = vector.broadcast %cst_95 : f32 to vector<40x32xf32>
    %148 = arith.cmpf oge, %146, %147 : vector<40x32xf32>
    %cst_96 = arith.constant 0.00999999977 : f32
    %149 = vector.broadcast %cst_96 : f32 to vector<40x32xf32>
    %150 = arith.mulf %149, %146 : vector<40x32xf32>
    %151 = arith.select %148, %146, %150 : vector<40x32xi1>, vector<40x32xf32>
    %152 = vector.extract_strided_slice %151 {offsets = [0, 0], sizes = [20, 32], strides = [1, 1]} : vector<40x32xf32> to vector<20x32xf32>
    %c1_97 = arith.constant 1 : index
    %c0_98 = arith.constant 0 : index
    %153 = vector.load %arg6[%c1_97, %c0_98] : memref<44x32xf32, #tpu.memory_space<vmem>>, vector<20x32xf32>
    tpu.vector_store %arg6[%c1_97, %c0_98], %152 {strides = array<i32>} : memref<44x32xf32, #tpu.memory_space<vmem>>, vector<20x32xf32>,
    %154 = vector.extract_strided_slice %151 {offsets = [20, 0], sizes = [20, 32], strides = [1, 1]} : vector<40x32xf32> to vector<20x32xf32>
    %c23 = arith.constant 23 : index
    %c0_99 = arith.constant 0 : index
    %155 = vector.load %arg6[%c23, %c0_99] : memref<44x32xf32, #tpu.memory_space<vmem>>, vector<20x32xf32>
    tpu.vector_store %arg6[%c23, %c0_99], %154 {strides = array<i32>} : memref<44x32xf32, #tpu.memory_space<vmem>>, vector<20x32xf32>,
    %c0_100 = arith.constant 0 : index
    %c0_101 = arith.constant 0 : index
    %156 = tpu.strided_load %arg6[%c0_100, %c0_101] {strides = array<i32: 2, 1>} : memref<44x32xf32, #tpu.memory_space<vmem>>, vector<10x32xf32>
    %c1_102 = arith.constant 1 : index
    %c0_103 = arith.constant 0 : index
    %157 = tpu.strided_load %arg6[%c1_102, %c0_103] {strides = array<i32: 2, 1>} : memref<44x32xf32, #tpu.memory_space<vmem>>, vector<10x32xf32>
    %c2_104 = arith.constant 2 : index
    %c0_105 = arith.constant 0 : index
    %158 = tpu.strided_load %arg6[%c2_104, %c0_105] {strides = array<i32: 2, 1>} : memref<44x32xf32, #tpu.memory_space<vmem>>, vector<10x32xf32>
    %c3_106 = arith.constant 3 : index
    %c0_107 = arith.constant 0 : index
    %159 = tpu.strided_load %arg6[%c3_106, %c0_107] {strides = array<i32: 2, 1>} : memref<44x32xf32, #tpu.memory_space<vmem>>, vector<10x32xf32>
    %160 = tpu.concatenate %156, %157, %158, %159 in 1 : vector<10x32xf32>, vector<10x32xf32>, vector<10x32xf32>, vector<10x32xf32> -> vector<10x128xf32>
    %c22 = arith.constant 22 : index
    %c0_108 = arith.constant 0 : index
    %161 = tpu.strided_load %arg6[%c22, %c0_108] {strides = array<i32: 2, 1>} : memref<44x32xf32, #tpu.memory_space<vmem>>, vector<10x32xf32>
    %c23_109 = arith.constant 23 : index
    %c0_110 = arith.constant 0 : index
    %162 = tpu.strided_load %arg6[%c23_109, %c0_110] {strides = array<i32: 2, 1>} : memref<44x32xf32, #tpu.memory_space<vmem>>, vector<10x32xf32>
    %c24 = arith.constant 24 : index
    %c0_111 = arith.constant 0 : index
    %163 = tpu.strided_load %arg6[%c24, %c0_111] {strides = array<i32: 2, 1>} : memref<44x32xf32, #tpu.memory_space<vmem>>, vector<10x32xf32>
    %c25 = arith.constant 25 : index
    %c0_112 = arith.constant 0 : index
    %164 = tpu.strided_load %arg6[%c25, %c0_112] {strides = array<i32: 2, 1>} : memref<44x32xf32, #tpu.memory_space<vmem>>, vector<10x32xf32>
    %165 = tpu.concatenate %161, %162, %163, %164 in 1 : vector<10x32xf32>, vector<10x32xf32>, vector<10x32xf32>, vector<10x32xf32> -> vector<10x128xf32>
    %166 = tpu.concatenate %160, %165 in 0 : vector<10x128xf32>, vector<10x128xf32> -> vector<20x128xf32>
    %c128 = arith.constant 128 : index
    %c0_113 = arith.constant 0 : index
    %167 = vector.load %arg1[%c128, %c0_113] : memref<896x64xbf16, #tpu.memory_space<vmem>>, vector<128x64xbf16>
    %168 = arith.truncf %166 : vector<20x128xf32> to vector<20x128xbf16>
    %cst_114 = arith.constant dense<0.000000e+00> : vector<20x64xf32>
    %169 = tpu.matmul %168, %167, %cst_114 {dimension_numbers = #tpu.dot_dimension_numbers<[1], [0], [0], [1], [0, 0, 1, 1], [], []>} : vector<20x128xbf16>, vector<128x64xbf16>, vector<20x64xf32> -> vector<20x64xf32>
    %c6_115 = arith.constant 6 : index
    %c0_116 = arith.constant 0 : index
    %170 = vector.load %arg2[%c6_115, %c0_116] : memref<16x128xf32, #tpu.memory_space<vmem>>, vector<1x64xf32>
    %c7 = arith.constant 7 : index
    %c0_117 = arith.constant 0 : index
    %171 = vector.load %arg2[%c7, %c0_117] : memref<16x128xf32, #tpu.memory_space<vmem>>, vector<1x64xf32>
    %cst_118 = arith.constant dense<0.000000e+00> : vector<64xf32>
    %172 = vector.multi_reduction <add>, %169, %cst_118 [0] : vector<20x64xf32> to vector<64xf32>
    %173 = vector.shape_cast %172 : vector<64xf32> to vector<1x64xf32>
    %cst_119 = arith.constant 5.000000e-02 : f32
    %174 = vector.broadcast %cst_119 : f32 to vector<1x64xf32>
    %175 = arith.mulf %173, %174 : vector<1x64xf32>
    %176 = arith.mulf %169, %169 : vector<20x64xf32>
    %cst_120 = arith.constant dense<0.000000e+00> : vector<64xf32>
    %177 = vector.multi_reduction <add>, %176, %cst_120 [0] : vector<20x64xf32> to vector<64xf32>
    %178 = vector.shape_cast %177 : vector<64xf32> to vector<1x64xf32>
    %cst_121 = arith.constant 5.000000e-02 : f32
    %179 = vector.broadcast %cst_121 : f32 to vector<1x64xf32>
    %180 = arith.mulf %178, %179 : vector<1x64xf32>
    %181 = arith.mulf %175, %175 : vector<1x64xf32>
    %182 = arith.subf %180, %181 : vector<1x64xf32>
    %cst_122 = arith.constant 0.000000e+00 : f32
    %183 = vector.broadcast %cst_122 : f32 to vector<1x64xf32>
    %184 = arith.maximumf %182, %183 : vector<1x64xf32>
    %cst_123 = arith.constant 9.99999974E-6 : f32
    %185 = vector.broadcast %cst_123 : f32 to vector<1x64xf32>
    %186 = arith.addf %184, %185 : vector<1x64xf32>
    %187 = math.rsqrt %186 : vector<1x64xf32>
    %188 = arith.mulf %170, %187 : vector<1x64xf32>
    %189 = arith.mulf %175, %188 : vector<1x64xf32>
    %190 = arith.subf %171, %189 : vector<1x64xf32>
    %191 = vector.broadcast %188 : vector<1x64xf32> to vector<20x64xf32>
    %192 = arith.mulf %169, %191 : vector<20x64xf32>
    %193 = vector.broadcast %190 : vector<1x64xf32> to vector<20x64xf32>
    %194 = arith.addf %192, %193 : vector<20x64xf32>
    %cst_124 = arith.constant 0.000000e+00 : f32
    %195 = vector.broadcast %cst_124 : f32 to vector<20x64xf32>
    %196 = arith.cmpf oge, %194, %195 : vector<20x64xf32>
    %cst_125 = arith.constant 0.00999999977 : f32
    %197 = vector.broadcast %cst_125 : f32 to vector<20x64xf32>
    %198 = arith.mulf %197, %194 : vector<20x64xf32>
    %199 = arith.select %196, %194, %198 : vector<20x64xi1>, vector<20x64xf32>
    %200 = vector.extract_strided_slice %199 {offsets = [0, 0], sizes = [10, 64], strides = [1, 1]} : vector<20x64xf32> to vector<10x64xf32>
    %c0_126 = arith.constant 0 : index
    %c0_127 = arith.constant 0 : index
    %201 = vector.load %arg7[%c0_126, %c0_127] : memref<20x64xf32, #tpu.memory_space<vmem>>, vector<10x64xf32>
    tpu.vector_store %arg7[%c0_126, %c0_127], %200 {strides = array<i32>} : memref<20x64xf32, #tpu.memory_space<vmem>>, vector<10x64xf32>,
    %202 = vector.extract_strided_slice %199 {offsets = [10, 0], sizes = [10, 64], strides = [1, 1]} : vector<20x64xf32> to vector<10x64xf32>
    %c10 = arith.constant 10 : index
    %c0_128 = arith.constant 0 : index
    %203 = vector.load %arg7[%c10, %c0_128] : memref<20x64xf32, #tpu.memory_space<vmem>>, vector<10x64xf32>
    tpu.vector_store %arg7[%c10, %c0_128], %202 {strides = array<i32>} : memref<20x64xf32, #tpu.memory_space<vmem>>, vector<10x64xf32>,
    %c0_129 = arith.constant 0 : index
    %c0_130 = arith.constant 0 : index
    %204 = vector.load %arg7[%c0_129, %c0_130] : memref<20x64xf32, #tpu.memory_space<vmem>>, vector<1x64xf32>
    %c1_131 = arith.constant 1 : index
    %c0_132 = arith.constant 0 : index
    %205 = vector.load %arg7[%c1_131, %c0_132] : memref<20x64xf32, #tpu.memory_space<vmem>>, vector<1x64xf32>
    %c2_133 = arith.constant 2 : index
    %c0_134 = arith.constant 0 : index
    %206 = vector.load %arg7[%c2_133, %c0_134] : memref<20x64xf32, #tpu.memory_space<vmem>>, vector<1x64xf32>
    %c3_135 = arith.constant 3 : index
    %c0_136 = arith.constant 0 : index
    %207 = vector.load %arg7[%c3_135, %c0_136] : memref<20x64xf32, #tpu.memory_space<vmem>>, vector<1x64xf32>
    %c4_137 = arith.constant 4 : index
    %c0_138 = arith.constant 0 : index
    %208 = vector.load %arg7[%c4_137, %c0_138] : memref<20x64xf32, #tpu.memory_space<vmem>>, vector<1x64xf32>
    %c5_139 = arith.constant 5 : index
    %c0_140 = arith.constant 0 : index
    %209 = vector.load %arg7[%c5_139, %c0_140] : memref<20x64xf32, #tpu.memory_space<vmem>>, vector<1x64xf32>
    %c6_141 = arith.constant 6 : index
    %c0_142 = arith.constant 0 : index
    %210 = vector.load %arg7[%c6_141, %c0_142] : memref<20x64xf32, #tpu.memory_space<vmem>>, vector<1x64xf32>
    %c7_143 = arith.constant 7 : index
    %c0_144 = arith.constant 0 : index
    %211 = vector.load %arg7[%c7_143, %c0_144] : memref<20x64xf32, #tpu.memory_space<vmem>>, vector<1x64xf32>
    %c8 = arith.constant 8 : index
    %c0_145 = arith.constant 0 : index
    %212 = vector.load %arg7[%c8, %c0_145] : memref<20x64xf32, #tpu.memory_space<vmem>>, vector<1x64xf32>
    %c9 = arith.constant 9 : index
    %c0_146 = arith.constant 0 : index
    %213 = vector.load %arg7[%c9, %c0_146] : memref<20x64xf32, #tpu.memory_space<vmem>>, vector<1x64xf32>
    %214 = tpu.concatenate %204, %205, %206, %207, %208, %209, %210, %211, %212, %213 in 1 : vector<1x64xf32>, vector<1x64xf32>, vector<1x64xf32>, vector<1x64xf32>, vector<1x64xf32>, vector<1x64xf32>, vector<1x64xf32>, vector<1x64xf32>, vector<1x64xf32>, vector<1x64xf32> -> vector<1x640xf32>
    %c10_147 = arith.constant 10 : index
    %c0_148 = arith.constant 0 : index
    %215 = vector.load %arg7[%c10_147, %c0_148] : memref<20x64xf32, #tpu.memory_space<vmem>>, vector<1x64xf32>
    %c11 = arith.constant 11 : index
    %c0_149 = arith.constant 0 : index
    %216 = vector.load %arg7[%c11, %c0_149] : memref<20x64xf32, #tpu.memory_space<vmem>>, vector<1x64xf32>
    %c12 = arith.constant 12 : index
    %c0_150 = arith.constant 0 : index
    %217 = vector.load %arg7[%c12, %c0_150] : memref<20x64xf32, #tpu.memory_space<vmem>>, vector<1x64xf32>
    %c13 = arith.constant 13 : index
    %c0_151 = arith.constant 0 : index
    %218 = vector.load %arg7[%c13, %c0_151] : memref<20x64xf32, #tpu.memory_space<vmem>>, vector<1x64xf32>
    %c14 = arith.constant 14 : index
    %c0_152 = arith.constant 0 : index
    %219 = vector.load %arg7[%c14, %c0_152] : memref<20x64xf32, #tpu.memory_space<vmem>>, vector<1x64xf32>
    %c15 = arith.constant 15 : index
    %c0_153 = arith.constant 0 : index
    %220 = vector.load %arg7[%c15, %c0_153] : memref<20x64xf32, #tpu.memory_space<vmem>>, vector<1x64xf32>
    %c16 = arith.constant 16 : index
    %c0_154 = arith.constant 0 : index
    %221 = vector.load %arg7[%c16, %c0_154] : memref<20x64xf32, #tpu.memory_space<vmem>>, vector<1x64xf32>
    %c17 = arith.constant 17 : index
    %c0_155 = arith.constant 0 : index
    %222 = vector.load %arg7[%c17, %c0_155] : memref<20x64xf32, #tpu.memory_space<vmem>>, vector<1x64xf32>
    %c18 = arith.constant 18 : index
    %c0_156 = arith.constant 0 : index
    %223 = vector.load %arg7[%c18, %c0_156] : memref<20x64xf32, #tpu.memory_space<vmem>>, vector<1x64xf32>
    %c19 = arith.constant 19 : index
    %c0_157 = arith.constant 0 : index
    %224 = vector.load %arg7[%c19, %c0_157] : memref<20x64xf32, #tpu.memory_space<vmem>>, vector<1x64xf32>
    %225 = tpu.concatenate %215, %216, %217, %218, %219, %220, %221, %222, %223, %224 in 1 : vector<1x64xf32>, vector<1x64xf32>, vector<1x64xf32>, vector<1x64xf32>, vector<1x64xf32>, vector<1x64xf32>, vector<1x64xf32>, vector<1x64xf32>, vector<1x64xf32>, vector<1x64xf32> -> vector<1x640xf32>
    %226 = tpu.concatenate %214, %225 in 0 : vector<1x640xf32>, vector<1x640xf32> -> vector<2x640xf32>
    %c256 = arith.constant 256 : index
    %c0_158 = arith.constant 0 : index
    %227 = vector.load %arg1[%c256, %c0_158] : memref<896x64xbf16, #tpu.memory_space<vmem>>, vector<640x16xbf16>
    %228 = arith.truncf %226 : vector<2x640xf32> to vector<2x640xbf16>
    %cst_159 = arith.constant dense<0.000000e+00> : vector<2x16xf32>
    %229 = tpu.matmul %228, %227, %cst_159 {dimension_numbers = #tpu.dot_dimension_numbers<[1], [0], [0], [1], [0, 0, 1, 1], [], []>} : vector<2x640xbf16>, vector<640x16xbf16>, vector<2x16xf32> -> vector<2x16xf32>
    %c8_160 = arith.constant 8 : index
    %c0_161 = arith.constant 0 : index
    %230 = vector.load %arg2[%c8_160, %c0_161] : memref<16x128xf32, #tpu.memory_space<vmem>>, vector<1x16xf32>
    %231 = vector.broadcast %230 : vector<1x16xf32> to vector<2x16xf32>
    %232 = arith.addf %229, %231 : vector<2x16xf32>
    %c9_162 = arith.constant 9 : index
    %c0_163 = arith.constant 0 : index
    %233 = vector.load %arg2[%c9_162, %c0_163] : memref<16x128xf32, #tpu.memory_space<vmem>>, vector<1x16xf32>
    %c10_164 = arith.constant 10 : index
    %c0_165 = arith.constant 0 : index
    %234 = vector.load %arg2[%c10_164, %c0_165] : memref<16x128xf32, #tpu.memory_space<vmem>>, vector<1x1xf32>
    %235 = vector.broadcast %233 : vector<1x16xf32> to vector<2x16xf32>
    %236 = arith.mulf %232, %235 : vector<2x16xf32>
    %cst_166 = arith.constant dense<0.000000e+00> : vector<2xf32>
    %237 = vector.multi_reduction <add>, %236, %cst_166 [1] : vector<2x16xf32> to vector<2xf32>
    %238 = vector.shape_cast %237 : vector<2xf32> to vector<2x1xf32>
    %239 = vector.broadcast %234 : vector<1x1xf32> to vector<2x1xf32>
    %240 = arith.addf %238, %239 : vector<2x1xf32>
    %cst_167 = arith.constant 0.000000e+00 : f32
    %241 = vector.broadcast %cst_167 : f32 to vector<2x1xf32>
    %242 = arith.subf %241, %240 : vector<2x1xf32>
    %243 = math.exp %242 : vector<2x1xf32>
    %cst_168 = arith.constant 1.000000e+00 : f32
    %244 = vector.broadcast %cst_168 : f32 to vector<2x1xf32>
    %245 = arith.addf %244, %243 : vector<2x1xf32>
    %cst_169 = arith.constant 1.000000e+00 : f32
    %246 = vector.broadcast %cst_169 : f32 to vector<2x1xf32>
    %247 = arith.divf %246, %245 : vector<2x1xf32>
    %c0_170 = arith.constant 0 : index
    %c0_171 = arith.constant 0 : index
    %248 = vector.load %arg3[%c0_170, %c0_171] : memref<2x1xf32, #tpu.memory_space<vmem>>, vector<2x1xf32>
    tpu.vector_store %arg3[%c0_170, %c0_171], %247 {strides = array<i32>} : memref<2x1xf32, #tpu.memory_space<vmem>>, vector<2x1xf32>,
    return
  }
}

</mosaic_0001>

<bundles_post_ra>
// kernel: discriminator_forward.1
= control target key start
LH: loop header
LB: loop body
LE: loop exit
PB: predicated region body
PF: predicated region fallthrough
CT: control target
= control target key end

     0   :  { %s3470_s20 = smov 4   ;;  %s3471_s21 = smov 12   ;;  %vm859_vm0 = vcmask 1045504   ;;  %vm369_vm1 = vcmask 31744   ;;  %vm15_vm2 = vcmask 64512   ;;  %vm38_vm3 = vcmask 130048   ;;  %s4890_s0 = inlined_call_operand.vmem [shape: f32[172,4], index: 0, kind: input, shape index: {}]   ;;  %s4891_s1 = inlined_call_operand.vmem [shape: bf16[896,64], index: 1, kind: input, shape index: {}]   ;;  %s4892_s2 = inlined_call_operand.vmem [shape: f32[16,128], index: 2, kind: input, shape index: {}]   ;;  %s4893_s3 = inlined_call_operand.vmem [shape: f32[2,1], index: 3, kind: output, shape index: {}]  }
   0x1   :  { %v69_v0 = vld [vmem:[%s4890_s0 + $0x1] sm:$0xff]  ;;  %v70_v1 = vld [vmem:[%s4890_s0 + $0x9] sm:$0xff]  ;;  %s3472_s7 = smov 20   ;;  %s3473_s12 = smov 8   ;;  %v71_v17 = vld [vmem:[%s4890_s0 + $0x11] sm:$0xff]  ;;  %vm390_vm4 = vcmask 97280  }
   0x2   :  { %v89_v2 = vld [vmem:[%s4890_s0 + $0x3] sm:$0xff]  ;;  %v3010_v3 = vpack.i.bf16 %v70_v1, %v69_v0  ;;  %v90_v4 = vld [vmem:[%s4890_s0 + $0xb] sm:$0xff]  ;;  %s3474_s13 = smov 16   ;;  %v72_v18 = vld [vmem:[%s4890_s0 + $0x19] sm:$0xff]  ;;  %s3475_s24 = smov 24   ;;  %vm411_vm5 = vcmask 162816  }
   0x3   :  { %v3020_v5 = vpack.i.bf16 %v90_v4, %v89_v2  ;;  %v79_v6 = vld [vmem:[%s4890_s0 + $0x2] sm:$0xff]  ;;  %v80_v7 = vld [vmem:[%s4890_s0 + $0xa] sm:$0xff]  ;;  %v81_v20 = vld [vmem:[%s4890_s0 + $0x12] sm:$0xff]  ;;  %v3040_v22 = vpack.i.bf16 %v72_v18, %v71_v17  ;;  %vm422_vm6 = vcmask 195584   ;;  %vm828_vm7 = vcmask 228352   ;;  %s3477_s30 = smov 32  }
   0x4   :  { %3011 = vrot.lane.b32.xlu0 %v3010_v3, %s3470_s20  ;;  %v99_v8 = vld [vmem:[%s4890_s0 + $0x4] sm:$0xff]  ;;  %v100_v9 = vld [vmem:[%s4890_s0 + $0xc] sm:$0xff]  ;;  %v3015_v13 = vpack.i.bf16 %v80_v7, %v79_v6  ;;  %v82_v21 = vld [vmem:[%s4890_s0 + $0x1a] sm:$0xff]  ;;  %vm36_vm8 = vcmask 60416   ;;  %s3478_s4 = smov 48   ;;  %s3479_s16 = smov 96  }
   0x5   :  { %3021 = vrot.lane.b32.xlu1 %v3020_v5, %s3471_s21  ;;  %v109_v10 = vld [vmem:[%s4890_s0 + $0x5] sm:$0xff]  ;;  %v110_v11 = vld [vmem:[%s4890_s0 + $0xd] sm:$0xff]  ;;  %v3025_v14 = vpack.i.bf16 %v100_v9, %v99_v8  ;;  %v3045_v23 = vpack.i.bf16 %v82_v21, %v81_v20  ;;  %v92_v25 = vld [vmem:[%s4890_s0 + $0x1b] sm:$0xff]  ;;  %s3480_s17 = smov 64  }
   0x6   :  { %v3030_v12 = vpack.i.bf16 %v110_v11, %v109_v10  ;;  %v119_v15 = vld [vmem:[%s4890_s0 + $0x6] sm:$0xff]  ;;  %v120_v16 = vld [vmem:[%s4890_s0 + $0xe] sm:$0xff]  ;;  %v102_v27 = vld [vmem:[%s4890_s0 + $0x1c] sm:$0xff] }
   0x7   :  { %v3035_v19 = vpack.i.bf16 %v120_v16, %v119_v15  ;;  %v91_v24 = vld [vmem:[%s4890_s0 + $0x13] sm:$0xff]  ;;  %v112_v30 = vld [vmem:[%s4890_s0 + $0x1d] sm:$0xff]  ;;  %v74_v36 = vld [vmem:[%s4890_s0 + $0x29] sm:$0xff] }
   0x8   :  { %3031 = vrot.lane.b32.xlu2 %v3030_v12, %s3472_s7  ;;  %v101_v26 = vld [vmem:[%s4890_s0 + $0x14] sm:$0xff]  ;;  %v3050_v28 = vpack.i.bf16 %v92_v25, %v91_v24  ;;  %v122_v34 = vld [vmem:[%s4890_s0 + $0x1e] sm:$0xff]  ;;  %v84_v39 = vld [vmem:[%s4890_s0 + $0x2a] sm:$0xff] }
   0x9   :  { %v111_v29 = vld [vmem:[%s4890_s0 + $0x15] sm:$0xff]  ;;  %v3055_v31 = vpack.i.bf16 %v102_v27, %v101_v26  ;;  %v73_v35 = vld [vmem:[%s4890_s0 + $0x21] sm:$0xff]  ;;  %v94_v43 = vld [vmem:[%s4890_s0 + $0x2b] sm:$0xff] }
   0xa   :  { %v3060_v32 = vpack.i.bf16 %v112_v30, %v111_v29  ;;  %v121_v33 = vld [vmem:[%s4890_s0 + $0x16] sm:$0xff]  ;;  %v83_v38 = vld [vmem:[%s4890_s0 + $0x22] sm:$0xff]  ;;  %v3070_v40 = vpack.i.bf16 %v74_v36, %v73_v35  ;;  %v104_v45 = vld [vmem:[%s4890_s0 + $0x2c] sm:$0xff] }
   0xb   :  { %v3065_v37 = vpack.i.bf16 %v122_v34, %v121_v33  ;;  %v3075_v41 = vpack.i.bf16 %v84_v39, %v83_v38  ;;  %v93_v42 = vld [vmem:[%s4890_s0 + $0x23] sm:$0xff]  ;;  %v114_v48 = vld [vmem:[%s4890_s0 + $0x2d] sm:$0xff]  ;;  %v76_v54 = vld [vmem:[%s4890_s0 + $0x39] sm:$0xff] }
   0xc   :  { %3016 = vrot.lane.b32.xlu0 %v3015_v13, %s3473_s12  ;;  %v103_v44 = vld [vmem:[%s4890_s0 + $0x24] sm:$0xff]  ;;  %v3080_v46 = vpack.i.bf16 %v94_v43, %v93_v42  ;;  %v124_v52 = vld [vmem:[%s4890_s0 + $0x2e] sm:$0xff]  ;;  %v86_v57 = vld [vmem:[%s4890_s0 + $0x3a] sm:$0xff] }
   0xd   :  { %3026 = vrot.lane.b32.xlu1 %v3025_v14, %s3474_s13  ;;  %v113_v47 = vld [vmem:[%s4890_s0 + $0x25] sm:$0xff]  ;;  %v3085_v49 = vpack.i.bf16 %v104_v45, %v103_v44  ;;  %v75_v53 = vld [vmem:[%s4890_s0 + $0x31] sm:$0xff]  ;;  %v96_v61 = vld [vmem:[%s4890_s0 + $0x3b] sm:$0xff] }
   0xe   :  { %v3090_v50 = vpack.i.bf16 %v114_v48, %v113_v47  ;;  %v123_v51 = vld [vmem:[%s4890_s0 + $0x26] sm:$0xff]  ;;  %v85_v56 = vld [vmem:[%s4890_s0 + $0x32] sm:$0xff]  ;;  %v3100_v58 = vpack.i.bf16 %v76_v54, %v75_v53  ;;  %v106_v63 = vld [vmem:[%s4890_s0 + $0x3c] sm:$0xff] }
   0xf   :  { %v3095_v55 = vpack.i.bf16 %v124_v52, %v123_v51  ;;  %v3105_v59 = vpack.i.bf16 %v86_v57, %v85_v56  ;;  %v95_v60 = vld [vmem:[%s4890_s0 + $0x33] sm:$0xff]  ;;  %v116_v2 = vld [vmem:[%s4890_s0 + $0x3d] sm:$0xff]  ;;  %v78_v8 = vld [vmem:[%s4890_s0 + $0x49] sm:$0xff] }
  0x10   :  { %3036 = vrot.lane.b32.xlu2 %v3035_v19, %s3475_s24  ;;  %v105_v62 = vld [vmem:[%s4890_s0 + $0x34] sm:$0xff]  ;;  %v3110_v0 = vpack.i.bf16 %v96_v61, %v95_v60  ;;  %v126_v6 = vld [vmem:[%s4890_s0 + $0x3e] sm:$0xff]  ;;  %v88_v11 = vld [vmem:[%s4890_s0 + $0x4a] sm:$0xff] }
  0x11   :  { %v115_v1 = vld [vmem:[%s4890_s0 + $0x35] sm:$0xff]  ;;  %v3115_v3 = vpack.i.bf16 %v106_v63, %v105_v62  ;;  %v77_v7 = vld [vmem:[%s4890_s0 + $0x41] sm:$0xff]  ;;  %v98_v15 = vld [vmem:[%s4890_s0 + $0x4b] sm:$0xff] }
  0x12   :  { %v3120_v4 = vpack.i.bf16 %v116_v2, %v115_v1  ;;  %v125_v5 = vld [vmem:[%s4890_s0 + $0x36] sm:$0xff]  ;;  %v87_v10 = vld [vmem:[%s4890_s0 + $0x42] sm:$0xff]  ;;  %v3130_v12 = vpack.i.bf16 %v78_v8, %v77_v7  ;;  %v108_v17 = vld [vmem:[%s4890_s0 + $0x4c] sm:$0xff] }
  0x13   :  { %v3125_v9 = vpack.i.bf16 %v126_v6, %v125_v5  ;;  %v3135_v13 = vpack.i.bf16 %v88_v11, %v87_v10  ;;  %v97_v14 = vld [vmem:[%s4890_s0 + $0x43] sm:$0xff]  ;;  %v118_v20 = vld [vmem:[%s4890_s0 + $0x4d] sm:$0xff]  ;;  %v443_v25 = vld [vmem:[%s4890_s0 + $0x57] sm:$0xff] }
  0x14   :  { %3041 = vrot.lane.b32.xlu0 %v3040_v22, %s3470_s20  ;;  %v107_v16 = vld [vmem:[%s4890_s0 + $0x44] sm:$0xff]  ;;  %v3140_v18 = vpack.i.bf16 %v98_v15, %v97_v14  ;;  %v128_v24 = vld [vmem:[%s4890_s0 + $0x4e] sm:$0xff]  ;;  %v473_v34 = vld [vmem:[%s4890_s0 + $0x5a] sm:$0xff] }
  0x15   :  { %3046 = vrot.lane.b32.xlu1 %v3045_v23, %s3473_s12  ;;  %v117_v19 = vld [vmem:[%s4890_s0 + $0x45] sm:$0xff]  ;;  %v3145_v21 = vpack.i.bf16 %v108_v17, %v107_v16  ;;  %v446_v44 = vld [vmem:[%s4890_s0 + $0x6f] sm:$0xff] }
  0x16   :  { %v3150_v22 = vpack.i.bf16 %v118_v20, %v117_v19  ;;  %v127_v23 = vld [vmem:[%s4890_s0 + $0x46] sm:$0xff]  ;;  %v486_v62 = vld [vmem:[%s4890_s0 + $0x73] sm:$0xff] }
  0x17   :  { %v444_v26 = vld [vmem:[%s4890_s0 + $0x5f] sm:$0xff]  ;;  %v3155_v27 = vpack.i.bf16 %v128_v24, %v127_v23  ;;  %v445_v43 = vld [vmem:[%s4890_s0 + $0x67] sm:$0xff]  ;;  %v496_v2 = vld [vmem:[%s4890_s0 + $0x74] sm:$0xff] }
  0x18   :  { %3051 = vrot.lane.b32.xlu2 %v3050_v28, %s3471_s21  ;;  %v453_v28 = vld [vmem:[%s4890_s0 + $0x58] sm:$0xff]  ;;  %v454_v29 = vld [vmem:[%s4890_s0 + $0x60] sm:$0xff]  ;;  %v3160_v30 = vpack.i.bf16 %v444_v26, %v443_v25  ;;  %v2942_v47 = vld [vmem:[%s4891_s1 + $0x8] sm:$0x30]  ;;  %v3190_v51 = vpack.i.bf16 %v446_v44, %v445_v43 }
  0x19   :  { %v464_v33 = vld [vmem:[%s4890_s0 + $0x61] sm:$0xff]  ;;  %v465_v54 = vld [vmem:[%s4890_s0 + $0x69] sm:$0xff]  ;;  %v480_v15 = vld [vmem:[%s4890_s0 + $0x92] sm:$0xff] }
  0x1a   :  { %v474_v35 = vld [vmem:[%s4890_s0 + $0x62] sm:$0xff]  ;;  %v485_v61 = vld [vmem:[%s4890_s0 + $0x6b] sm:$0xff]  ;;  %v490_v19 = vld [vmem:[%s4890_s0 + $0x93] sm:$0xff] }
  0x1b   :  { %v484_v38 = vld [vmem:[%s4890_s0 + $0x63] sm:$0xff]  ;;  %v3175_v39 = vpack.i.bf16 %v474_v35, %v473_v34  ;;  %v495_v1 = vld [vmem:[%s4890_s0 + $0x6c] sm:$0xff]  ;;  %v447_v23 = vld [vmem:[%s4890_s0 + $0x77] sm:$0xff] }
  0x1c   :  { %3056 = vrot.lane.b32.xlu0 %v3055_v31, %s3474_s13  ;;  %v3165_v31 = vpack.i.bf16 %v454_v29, %v453_v28  ;;  %v494_v42 = vld [vmem:[%s4890_s0 + $0x64] sm:$0xff]  ;;  %v450_v5 = vld [vmem:[%s4890_s0 + $0x8f] sm:$0xff]  ;;  %v3215_v6 = vpack.i.bf16 %v496_v2, %v495_v1 }
  0x1d   :  { %3061 = vrot.lane.b32.xlu1 %v3060_v32, %s3472_s7  ;;  %v463_v32 = vld [vmem:[%s4890_s0 + $0x59] sm:$0xff]  ;;  %v455_v48 = vld [vmem:[%s4890_s0 + $0x68] sm:$0xff]  ;;  %v460_v8 = vld [vmem:[%s4890_s0 + $0x90] sm:$0xff] }
  0x1e   :  { %v3170_v36 = vpack.i.bf16 %v464_v33, %v463_v32  ;;  %v2941_v57 = vld [vmem:[%s4891_s1] sm:$0xff]  ;;  %v459_v7 = vld [vmem:[%s4890_s0 + $0x88] sm:$0xff]  ;;  %v500_v25 = vld [vmem:[%s4890_s0 + $0x94] sm:$0xff] }
  0x1f   :  { %v3225_v10 = vpack.i.bf16 %v460_v8, %v459_v7  ;;  %v469_v11 = vld [vmem:[%s4890_s0 + $0x89] sm:$0xff]  ;;  %v448_v26 = vld [vmem:[%s4890_s0 + $0x7f] sm:$0xff] }
  0x20   :  { %3066 = vrot.lane.b32.xlu2 %v3065_v37, %s3475_s24  ;;  %v483_v37 = vld [vmem:[%s4890_s0 + $0x5b] sm:$0xff]  ;;  %v479_v14 = vld [vmem:[%s4890_s0 + $0x8a] sm:$0xff] }
  0x21   :  { %v499_v24 = vld [vmem:[%s4890_s0 + $0x8c] sm:$0xff]  ;;  %v458_v28 = vld [vmem:[%s4890_s0 + $0x80] sm:$0xff] }
  0x22   :  { %v59_v32 = vld [vmem:[%s4890_s0] sm:$0xff]  ;;  %v60_v33 = vld [vmem:[%s4890_s0 + $0x8] sm:$0xff]  ;;  %v3245_v34 = vpack.i.bf16 %v500_v25, %v499_v24 }
  0x23   :  { %v478_v1 = vld [vmem:[%s4890_s0 + $0x82] sm:$0xff] }
  0x24   :  { %3071 = vrot.lane.b32.xlu0 %v3070_v40, %s3470_s20  ;;  %v3180_v40 = vpack.i.bf16 %v484_v38, %v483_v37 }
  0x25   :  { %3076 = vrot.lane.b32.xlu1 %v3075_v41, %s3473_s12  ;;  %v493_v41 = vld [vmem:[%s4890_s0 + $0x5c] sm:$0xff] }
  0x26   :  { %v3185_v45 = vpack.i.bf16 %v494_v42, %v493_v41 }
  0x28   :  { %3081 = vrot.lane.b32.xlu2 %v3080_v46, %s3471_s21  ;;  %v2705_v46 = vld [vmem:[%s4891_s1 + $0x8] sm:$0xf] }
  0x2c   :  { %3086 = vrot.lane.b32.xlu0 %v3085_v49, %s3474_s13  ;;  %v456_v49 = vld [vmem:[%s4890_s0 + $0x70] sm:$0xff] }
  0x2d   :  { %3091 = vrot.lane.b32.xlu1 %v3090_v50, %s3472_s7  ;;  %v2706_v50 = vor.u32 %v2942_v47, %v2705_v46  ;;  %v3195_v53 = vpack.i.bf16 %v456_v49, %v455_v48 }
  0x2f   :  { %v861_v52 = vsel %vm859_vm0, %v2706_v50, 0 }
  0x30   :  { %3096 = vrot.lane.b32.xlu2 %v3095_v55, %s3475_s24  ;;  %869 = vmatpush.bf16.msra.mxu0 %v861_v52  ;;  %v466_v55 = vld [vmem:[%s4890_s0 + $0x71] sm:$0xff] }
  0x31   :  { %2997 = vmatpush.bf16.msra.mxu1 %v861_v52  ;;  %v3200_v60 = vpack.i.bf16 %v466_v55, %v465_v54  ;;  %v468_v54 = vld [vmem:[%s4890_s0 + $0x81] sm:$0xff] }
  0x34   :  { %3101 = vrot.lane.b32.xlu0 %v3100_v58, %s3470_s20  ;;  %v475_v58 = vld [vmem:[%s4890_s0 + $0x6a] sm:$0xff]  ;;  %870 = vmatpush.bf16.msra.mxu0 %v2941_v57 }
  0x35   :  { %3106 = vrot.lane.b32.xlu1 %v3105_v59, %s3473_s12  ;;  %v476_v59 = vld [vmem:[%s4890_s0 + $0x72] sm:$0xff]  ;;  %2998 = vmatpush.bf16.msra.mxu1 %v2941_v57 }
  0x36   :  { %v3205_v63 = vpack.i.bf16 %v476_v59, %v475_v58 }
  0x38   :  { %3111 = vrot.lane.b32.xlu2 %v3110_v0, %s3471_s21  ;;  %v3210_v0 = vpack.i.bf16 %v486_v62, %v485_v61 }
  0x3c   :  { %3116 = vrot.lane.b32.xlu0 %v3115_v3, %s3474_s13 }
  0x3d   :  { %3121 = vrot.lane.b32.xlu1 %v3120_v4, %s3472_s7  ;;  %v449_v4 = vld [vmem:[%s4890_s0 + $0x87] sm:$0xff] }
  0x40   :  { %3126 = vrot.lane.b32.xlu2 %v3125_v9, %s3475_s24  ;;  %v3220_v9 = vpack.i.bf16 %v450_v5, %v449_v4  ;;  %v487_v5 = vld [vmem:[%s4890_s0 + $0x7b] sm:$0xff] }
  0x44   :  { %3131 = vrot.lane.b32.xlu0 %v3130_v12, %s3470_s20  ;;  %v470_v12 = vld [vmem:[%s4890_s0 + $0x91] sm:$0xff] }
  0x45   :  { %3136 = vrot.lane.b32.xlu1 %v3135_v13, %s3473_s12  ;;  %v3230_v16 = vpack.i.bf16 %v470_v12, %v469_v11 }
  0x48   :  { %3141 = vrot.lane.b32.xlu2 %v3140_v18, %s3471_s21  ;;  %v489_v18 = vld [vmem:[%s4890_s0 + $0x8b] sm:$0xff] }
  0x4c   :  { %3146 = vrot.lane.b32.xlu0 %v3145_v21, %s3474_s13  ;;  %v3235_v21 = vpack.i.bf16 %v480_v15, %v479_v14 }
  0x4d   :  { %3151 = vrot.lane.b32.xlu1 %v3150_v22, %s3472_s7  ;;  %v3240_v22 = vpack.i.bf16 %v490_v19, %v489_v18  ;;  %v497_v19 = vld [vmem:[%s4890_s0 + $0x7c] sm:$0xff] }
  0x50   :  { %3156 = vrot.lane.b32.xlu2 %v3155_v27, %s3475_s24  ;;  %v457_v27 = vld [vmem:[%s4890_s0 + $0x78] sm:$0xff] }
  0x51   :  { %v3255_v37 = vpack.i.bf16 %v458_v28, %v457_v27 }
  0x54   :  { %3161 = vrot.lane.b32.xlu0 %v3160_v30, %s3470_s20 }
  0x55   :  { %3166 = vrot.lane.b32.xlu1 %v3165_v31, %s3473_s12 }
  0x58   :  { %3171 = vrot.lane.b32.xlu2 %v3170_v36, %s3471_s21  ;;  %v3250_v36 = vpack.i.bf16 %v448_v26, %v447_v23 }
  0x5c   :  { %3176 = vrot.lane.b32.xlu0 %v3175_v39, %s3474_s13 }
  0x5d   :  { %3181 = vrot.lane.b32.xlu1 %v3180_v40, %s3472_s7 }
  0x60   :  { %3186 = vrot.lane.b32.xlu2 %v3185_v45, %s3475_s24 }
  0x62   :  { %v3777_v56 = vpop.permute.xlu2 %3031 }
  0x63   :  { %v3034_v47 = vunpack.i.h.bf16 %v3777_v56  ;;  %v3033_v50 = vunpack.i.l.bf16 %v3777_v56 }
  0x64   :  { %3191 = vrot.lane.b32.xlu0 %v3190_v51, %s3470_s20 }
  0x65   :  { %3196 = vrot.lane.b32.xlu1 %v3195_v53, %s3473_s12  ;;  %v467_v53 = vld [vmem:[%s4890_s0 + $0x79] sm:$0xff] }
  0x66   :  { %v3260_v2 = vpack.i.bf16 %v468_v54, %v467_v53 }
  0x68   :  { %3201 = vrot.lane.b32.xlu2 %v3200_v60, %s3471_s21 }
  0x6a   :  { %v3803_v3 = vpop.permute.xlu2 %3036 }
  0x6b   :  { %v3039_v58 = vunpack.i.h.bf16 %v3803_v3  ;;  %v3038_v56 = vunpack.i.l.bf16 %v3803_v3 }
  0x6c   :  { %3206 = vrot.lane.b32.xlu0 %v3205_v63, %s3474_s13 }
  0x6d   :  { %3211 = vrot.lane.b32.xlu1 %v3210_v0, %s3472_s7  ;;  %v477_v0 = vld [vmem:[%s4890_s0 + $0x7a] sm:$0xff] }
  0x6e   :  { %v3265_v12 = vpack.i.bf16 %v478_v1, %v477_v0 }
  0x70   :  { %3216 = vrot.lane.b32.xlu2 %v3215_v6, %s3475_s24  ;;  %v488_v6 = vld [vmem:[%s4890_s0 + $0x83] sm:$0xff] }
  0x72   :  { %v3826_v13 = vpop.permute.xlu2 %3051 }
  0x73   :  { %v3054_v24 = vunpack.i.h.bf16 %v3826_v13  ;;  %v3053_v25 = vunpack.i.l.bf16 %v3826_v13 }
  0x74   :  { %3221 = vrot.lane.b32.xlu0 %v3220_v9, %s3470_s20  ;;  %v61_v9 = vld [vmem:[%s4890_s0 + $0x10] sm:$0xff] }
  0x75   :  { %3226 = vrot.lane.b32.xlu1 %v3225_v10, %s3473_s12  ;;  %v62_v10 = vld [vmem:[%s4890_s0 + $0x18] sm:$0xff] }
  0x76   :  { %v3012_v17 = vpop.permute.xlu0 %3011 }
  0x77   :  { %v3022_v20 = vpop.permute.xlu1 %3021  ;;  %v3014_v30 = vunpack.i.h.bf16 %v3012_v17  ;;  %v3013_v31 = vunpack.i.l.bf16 %v3012_v17 }
  0x78   :  { %3231 = vrot.lane.b32.xlu2 %v3230_v16, %s3471_s21  ;;  %v3024_v38 = vunpack.i.h.bf16 %v3022_v20  ;;  %v3023_v39 = vunpack.i.l.bf16 %v3022_v20  ;;  %v3270_v16 = vpack.i.bf16 %v488_v6, %v487_v5  ;;  %v498_v20 = vld [vmem:[%s4890_s0 + $0x84] sm:$0xff]  ;;  %v501_v6 = vld [vmem:[%s4890_s0 + $0x9c] sm:$0xff] }
  0x79   :  { %v370_v43 = vsel %vm369_vm1, %v59_v32, %v3013_v31  ;;  %v371_v44 = vsel %vm369_vm1, %v60_v33, %v3014_v30  ;;  %v3275_v28 = vpack.i.bf16 %v498_v20, %v497_v19  ;;  %v461_v32 = vld [vmem:[%s4890_s0 + $0x98] sm:$0xff]  ;;  %v462_v33 = vld [vmem:[%s4890_s0 + $0xa0] sm:$0xff] }
  0x7a   :  { %v3861_v29 = vpop.permute.xlu2 %3066 }
  0x7c   :  { %3236 = vrot.lane.b32.xlu0 %v3235_v21, %s3474_s13  ;;  %v451_v21 = vld [vmem:[%s4890_s0 + $0x97] sm:$0xff] }
  0x7d   :  { %3241 = vrot.lane.b32.xlu1 %v3240_v22, %s3472_s7  ;;  %v452_v22 = vld [vmem:[%s4890_s0 + $0x9f] sm:$0xff] }
  0x7e   :  { %v3017_v35 = vpop.permute.xlu0 %3016  ;;  %v3280_v31 = vpack.i.bf16 %v452_v22, %v451_v21 }
  0x7f   :  { %v3019_v40 = vunpack.i.h.bf16 %v3017_v35  ;;  %v3018_v41 = vunpack.i.l.bf16 %v3017_v35  ;;  %v3027_v42 = vpop.permute.xlu1 %3026 }
  0x80   :  { %v3029_v45 = vunpack.i.h.bf16 %v3027_v42  ;;  %v3028_v46 = vunpack.i.l.bf16 %v3027_v42  ;;  %3246 = vrot.lane.b32.xlu2 %v3245_v34, %s3475_s24 }
  0x81   :  { %v380_v48 = vsel %vm15_vm2, %v370_v43, %v3018_v41  ;;  %v381_v49 = vsel %vm15_vm2, %v371_v44, %v3019_v40  ;;  %v3285_v44 = vpack.i.bf16 %v462_v33, %v461_v32 }
  0x82   :  { %v391_v51 = vsel %vm390_vm4, %v380_v48, %v3023_v39  ;;  %v392_v52 = vsel %vm390_vm4, %v381_v49, %v3024_v38  ;;  %v3890_v59 = vpop.permute.xlu2 %3081 }
  0x83   :  { %v401_v55 = vsel %vm38_vm3, %v391_v51, %v3028_v46  ;;  %v402_v57 = vsel %vm38_vm3, %v392_v52, %v3029_v45  ;;  %v481_v51 = vld [vmem:[%s4890_s0 + $0x9a] sm:$0xff]  ;;  %v482_v52 = vld [vmem:[%s4890_s0 + $0xa2] sm:$0xff] }
  0x84   :  { %3251 = vrot.lane.b32.xlu0 %v3250_v36, %s3470_s20  ;;  %v412_v60 = vsel %vm411_vm5, %v401_v55, %v3033_v50  ;;  %v413_v61 = vsel %vm411_vm5, %v402_v57, %v3034_v47  ;;  %v3069_v36 = vunpack.i.h.bf16 %v3861_v29  ;;  %v472_v47 = vld [vmem:[%s4890_s0 + $0xa1] sm:$0xff]  ;;  %v3295_v0 = vpack.i.bf16 %v482_v52, %v481_v51 }
  0x85   :  { %3256 = vrot.lane.b32.xlu1 %v3255_v37, %s3473_s12  ;;  %v423_v62 = vsel %vm422_vm6, %v412_v60, %v3038_v56  ;;  %v424_v63 = vsel %vm422_vm6, %v413_v61, %v3039_v58  ;;  %v3068_v37 = vunpack.i.l.bf16 %v3861_v29  ;;  %v471_v29 = vld [vmem:[%s4890_s0 + $0x99] sm:$0xff]  ;;  %v492_v58 = vld [vmem:[%s4890_s0 + $0xa3] sm:$0xff] }
  0x86   :  { %v3042_v3 = vpop.permute.xlu0 %3041  ;;  %v807_v4 = vpack.c.bf16 %v424_v63, %v423_v62  ;;  %v3290_v53 = vpack.i.bf16 %v472_v47, %v471_v29  ;;  %v491_v57 = vld [vmem:[%s4890_s0 + $0x9b] sm:$0xff]  ;;  %v64_v62 = vld [vmem:[%s4890_s0 + $0x28] sm:$0xff] }
  0x87   :  { %v3044_v7 = vunpack.i.h.bf16 %v3042_v3  ;;  %v3043_v8 = vunpack.i.l.bf16 %v3042_v3  ;;  %v3047_v11 = vpop.permute.xlu1 %3046  ;;  %v63_v61 = vld [vmem:[%s4890_s0 + $0x20] sm:$0xff]  ;;  %v3300_v3 = vpack.i.bf16 %v492_v58, %v491_v57 }
  0x88   :  { %2707 = vmatmul.msk.bf16.vlgmr.msra.gmra.mxu0 %vm828_vm7, %v807_v4  ;;  %v3049_v14 = vunpack.i.h.bf16 %v3047_v11  ;;  %v3048_v15 = vunpack.i.l.bf16 %v3047_v11  ;;  %3261 = vrot.lane.b32.xlu2 %v3260_v2, %s3471_s21 }
  0x89   :  { %v372_v17 = vsel %vm369_vm1, %v61_v9, %v3043_v8  ;;  %v373_v18 = vsel %vm369_vm1, %v62_v10, %v3044_v7  ;;  %v502_v7 = vld [vmem:[%s4890_s0 + $0xa4] sm:$0xff]  ;;  %v3084_v9 = vunpack.i.h.bf16 %v3890_v59  ;;  %v3083_v10 = vunpack.i.l.bf16 %v3890_v59 }
  0x8a   :  { %v3932_v23 = vpop.permute.xlu2 %3096  ;;  %v382_v26 = vsel %vm15_vm2, %v372_v17, %v3048_v15  ;;  %v383_v27 = vsel %vm15_vm2, %v373_v18, %v3049_v14  ;;  %v3305_v14 = vpack.i.bf16 %v502_v7, %v501_v6 }
  0x8b   :  { %v393_v38 = vsel %vm390_vm4, %v382_v26, %v3053_v25  ;;  %v394_v39 = vsel %vm390_vm4, %v383_v27, %v3054_v24  ;;  %v3099_v19 = vunpack.i.h.bf16 %v3932_v23  ;;  %v3098_v20 = vunpack.i.l.bf16 %v3932_v23 }
  0x8c   :  { %3266 = vrot.lane.b32.xlu0 %v3265_v12, %s3474_s13 }
  0x8d   :  { %3271 = vrot.lane.b32.xlu1 %v3270_v16, %s3472_s7 }
  0x8e   :  { %v3057_v30 = vpop.permute.xlu0 %3056 }
  0x8f   :  { %v3059_v13 = vunpack.i.h.bf16 %v3057_v30  ;;  %v3058_v34 = vunpack.i.l.bf16 %v3057_v30  ;;  %v3062_v35 = vpop.permute.xlu1 %3061 }
  0x90   :  { %v3064_v40 = vunpack.i.h.bf16 %v3062_v35  ;;  %v3063_v41 = vunpack.i.l.bf16 %v3062_v35  ;;  %3276 = vrot.lane.b32.xlu2 %v3275_v28, %s3475_s24  ;;  %v65_v35 = vld [vmem:[%s4890_s0 + $0x30] sm:$0xff] }
  0x91   :  { %v403_v42 = vsel %vm38_vm3, %v393_v38, %v3058_v34  ;;  %v404_v43 = vsel %vm38_vm3, %v394_v39, %v3059_v13 }
  0x92   :  { %v414_v45 = vsel %vm411_vm5, %v403_v42, %v3063_v41  ;;  %v415_v46 = vsel %vm411_vm5, %v404_v43, %v3064_v40  ;;  %v3963_v50 = vpop.permute.xlu2 %3111 }
  0x93   :  { %v425_v48 = vsel %vm422_vm6, %v414_v45, %v3068_v37  ;;  %v426_v49 = vsel %vm422_vm6, %v415_v46, %v3069_v36  ;;  %v66_v36 = vld [vmem:[%s4890_s0 + $0x38] sm:$0xff]  ;;  %v3114_v43 = vunpack.i.h.bf16 %v3963_v50 }
  0x94   :  { %3281 = vrot.lane.b32.xlu0 %v3280_v31, %s3470_s20  ;;  %v808_v55 = vpack.c.bf16 %v426_v49, %v425_v48 }
  0x95   :  { %3286 = vrot.lane.b32.xlu1 %v3285_v44, %s3473_s12  ;;  %v3113_v44 = vunpack.i.l.bf16 %v3963_v50 }
  0x96   :  { %v3072_v54 = vpop.permute.xlu0 %3071 }
  0x97   :  { %v3074_v56 = vunpack.i.h.bf16 %v3072_v54  ;;  %v3073_v60 = vunpack.i.l.bf16 %v3072_v54  ;;  %v3077_v63 = vpop.permute.xlu1 %3076 }
  0x98   :  { %2708 = vmatmul.msk.bf16.gmra.mxu0 %vm828_vm7, %v808_v55  ;;  %v3079_v1 = vunpack.i.h.bf16 %v3077_v63  ;;  %v3078_v2 = vunpack.i.l.bf16 %v3077_v63  ;;  %3291 = vrot.lane.b32.xlu2 %v3290_v53, %s3471_s21 }
  0x99   :  { %v374_v4 = vsel %vm369_vm1, %v63_v61, %v3073_v60  ;;  %v375_v5 = vsel %vm369_vm1, %v64_v62, %v3074_v56 }
  0x9a   :  { %v3127_v8 = vpop.permute.xlu2 %3126  ;;  %v384_v11 = vsel %vm15_vm2, %v374_v4, %v3078_v2  ;;  %v385_v12 = vsel %vm15_vm2, %v375_v5, %v3079_v1  ;;  %v67_v4 = vld [vmem:[%s4890_s0 + $0x40] sm:$0xff]  ;;  %v68_v5 = vld [vmem:[%s4890_s0 + $0x48] sm:$0xff] }
  0x9b   :  { %v395_v21 = vsel %vm390_vm4, %v384_v11, %v3083_v10  ;;  %v396_v59 = vsel %vm390_vm4, %v385_v12, %v3084_v9  ;;  %v3129_v51 = vunpack.i.h.bf16 %v3127_v8  ;;  %v3128_v52 = vunpack.i.l.bf16 %v3127_v8 }
  0x9c   :  { %3296 = vrot.lane.b32.xlu0 %v3295_v0, %s3474_s13 }
  0x9d   :  { %3301 = vrot.lane.b32.xlu1 %v3300_v3, %s3472_s7 }
  0x9e   :  { %v3087_v15 = vpop.permute.xlu0 %3086 }
  0x9f   :  { %v3089_v16 = vunpack.i.h.bf16 %v3087_v15  ;;  %v3088_v17 = vunpack.i.l.bf16 %v3087_v15  ;;  %v3092_v18 = vpop.permute.xlu1 %3091 }
  0xa0   :  { %v3094_v22 = vunpack.i.h.bf16 %v3092_v18  ;;  %v3093_v24 = vunpack.i.l.bf16 %v3092_v18  ;;  %3306 = vrot.lane.b32.xlu2 %v3305_v14, %s3475_s24 }
  0xa1   :  { %v405_v25 = vsel %vm38_vm3, %v395_v21, %v3088_v17  ;;  %v406_v26 = vsel %vm38_vm3, %v396_v59, %v3089_v16 }
  0xa2   :  { %v416_v27 = vsel %vm411_vm5, %v405_v25, %v3093_v24  ;;  %v417_v28 = vsel %vm411_vm5, %v406_v26, %v3094_v22  ;;  %v3142_v31 = vpop.permute.xlu2 %3141 }
  0xa3   :  { %v427_v30 = vsel %vm422_vm6, %v416_v27, %v3098_v20  ;;  %v428_v23 = vsel %vm422_vm6, %v417_v28, %v3099_v19  ;;  %v3144_v11 = vunpack.i.h.bf16 %v3142_v31  ;;  %v3143_v12 = vunpack.i.l.bf16 %v3142_v31 }
  0xa4   :  { %v809_v33 = vpack.c.bf16 %v428_v23, %v427_v30 }
  0xa6   :  { %v3102_v32 = vpop.permute.xlu0 %3101 }
  0xa7   :  { %v3104_v13 = vunpack.i.h.bf16 %v3102_v32  ;;  %v3103_v34 = vunpack.i.l.bf16 %v3102_v32  ;;  %v3107_v37 = vpop.permute.xlu1 %3106 }
  0xa8   :  { %2709 = vmatmul.msk.bf16.gmra.mxu0 %vm828_vm7, %v809_v33  ;;  %v3109_v38 = vunpack.i.h.bf16 %v3107_v37  ;;  %v3108_v39 = vunpack.i.l.bf16 %v3107_v37 }
  0xa9   :  { %v376_v40 = vsel %vm369_vm1, %v65_v35, %v3103_v34  ;;  %v377_v41 = vsel %vm369_vm1, %v66_v36, %v3104_v13  ;;  %v433_v35 = vld [vmem:[%s4890_s0 + $0x56] sm:$0xff]  ;;  %v434_v36 = vld [vmem:[%s4890_s0 + $0x5e] sm:$0xff] }
  0xaa   :  { %v3157_v42 = vpop.permute.xlu2 %3156  ;;  %v386_v45 = vsel %vm15_vm2, %v376_v40, %v3108_v39  ;;  %v387_v46 = vsel %vm15_vm2, %v377_v41, %v3109_v38 }
  0xab   :  { %v397_v53 = vsel %vm390_vm4, %v386_v45, %v3113_v44  ;;  %v398_v54 = vsel %vm390_vm4, %v387_v46, %v3114_v43  ;;  %v3159_v21 = vunpack.i.h.bf16 %v3157_v42  ;;  %v3158_v59 = vunpack.i.l.bf16 %v3157_v42 }
  0xae   :  { %v3117_v29 = vpop.permute.xlu0 %3116 }
  0xaf   :  { %v3119_v47 = vunpack.i.h.bf16 %v3117_v29  ;;  %v3118_v48 = vunpack.i.l.bf16 %v3117_v29  ;;  %v3122_v49 = vpop.permute.xlu1 %3121 }
  0xb0   :  { %v3124_v55 = vunpack.i.h.bf16 %v3122_v49  ;;  %v3123_v57 = vunpack.i.l.bf16 %v3122_v49 }
  0xb1   :  { %v407_v58 = vsel %vm38_vm3, %v397_v53, %v3118_v48  ;;  %v408_v50 = vsel %vm38_vm3, %v398_v54, %v3119_v47 }
  0xb2   :  { %v418_v56 = vsel %vm411_vm5, %v407_v58, %v3123_v57  ;;  %v419_v60 = vsel %vm411_vm5, %v408_v50, %v3124_v55  ;;  %v3172_v63 = vpop.permute.xlu2 %3171 }
  0xb3   :  { %v429_v61 = vsel %vm422_vm6, %v418_v56, %v3128_v52  ;;  %v430_v62 = vsel %vm422_vm6, %v419_v60, %v3129_v51  ;;  %v3174_v44 = vunpack.i.h.bf16 %v3172_v63  ;;  %v3173_v45 = vunpack.i.l.bf16 %v3172_v63 }
  0xb4   :  { %v810_v1 = vpack.c.bf16 %v430_v62, %v429_v61 }
  0xb6   :  { %v3132_v0 = vpop.permute.xlu0 %3131 }
  0xb7   :  { %v3134_v2 = vunpack.i.h.bf16 %v3132_v0  ;;  %v3133_v3 = vunpack.i.l.bf16 %v3132_v0  ;;  %v3137_v6 = vpop.permute.xlu1 %3136 }
  0xb8   :  { %2710 = vmatmul.msk.bf16.gmra.mxu0 %vm828_vm7, %v810_v1  ;;  %v3139_v7 = vunpack.i.h.bf16 %v3137_v6  ;;  %v3138_v8 = vunpack.i.l.bf16 %v3137_v6 }
  0xb9   :  { %v378_v9 = vsel %vm369_vm1, %v67_v4, %v3133_v3  ;;  %v379_v10 = vsel %vm369_vm1, %v68_v5, %v3134_v2  ;;  %v435_v3 = vld [vmem:[%s4890_s0 + $0x66] sm:$0xff]  ;;  %v436_v4 = vld [vmem:[%s4890_s0 + $0x6e] sm:$0xff] }
  0xba   :  { %v3187_v14 = vpop.permute.xlu2 %3186  ;;  %v388_v15 = vsel %vm15_vm2, %v378_v9, %v3138_v8  ;;  %v389_v16 = vsel %vm15_vm2, %v379_v10, %v3139_v7 }
  0xbb   :  { %v399_v22 = vsel %vm390_vm4, %v388_v15, %v3143_v12  ;;  %v400_v24 = vsel %vm390_vm4, %v389_v16, %v3144_v11  ;;  %v3189_v52 = vunpack.i.h.bf16 %v3187_v14  ;;  %v3188_v53 = vunpack.i.l.bf16 %v3187_v14 }
  0xbe   :  { %v3147_v17 = vpop.permute.xlu0 %3146 }
  0xbf   :  { %v3149_v18 = vunpack.i.h.bf16 %v3147_v17  ;;  %v3148_v19 = vunpack.i.l.bf16 %v3147_v17  ;;  %v3152_v20 = vpop.permute.xlu1 %3151 }
  0xc0   :  { %v3154_v25 = vunpack.i.h.bf16 %v3152_v20  ;;  %v3153_v26 = vunpack.i.l.bf16 %v3152_v20 }
  0xc1   :  { %v409_v27 = vsel %vm38_vm3, %v399_v22, %v3148_v19  ;;  %v410_v28 = vsel %vm38_vm3, %v400_v24, %v3149_v18 }
  0xc2   :  { %v420_v30 = vsel %vm411_vm5, %v409_v27, %v3153_v26  ;;  %v421_v23 = vsel %vm411_vm5, %v410_v28, %v3154_v25  ;;  %v3202_v34 = vpop.permute.xlu2 %3201 }
  0xc3   :  { %v431_v31 = vsel %vm422_vm6, %v420_v30, %v3158_v59  ;;  %v432_v32 = vsel %vm422_vm6, %v421_v23, %v3159_v21  ;;  %v3204_v14 = vunpack.i.h.bf16 %v3202_v34  ;;  %v3203_v15 = vunpack.i.l.bf16 %v3202_v34 }
  0xc4   :  { %v811_v13 = vpack.c.bf16 %v432_v32, %v431_v31 }
  0xc6   :  { %v3162_v33 = vpop.permute.xlu0 %3161 }
  0xc7   :  { %v3164_v37 = vunpack.i.h.bf16 %v3162_v33  ;;  %v3163_v38 = vunpack.i.l.bf16 %v3162_v33  ;;  %v3167_v39 = vpop.permute.xlu1 %3166 }
  0xc8   :  { %2711 = vmatmul.msk.bf16.gmra.mxu0 %vm828_vm7, %v811_v13  ;;  %v3169_v40 = vunpack.i.h.bf16 %v3167_v39  ;;  %v3168_v41 = vunpack.i.l.bf16 %v3167_v39 }
  0xc9   :  { %v744_v42 = vsel %vm369_vm1, %v434_v36, %v3164_v37  ;;  %v743_v43 = vsel %vm369_vm1, %v433_v35, %v3163_v38  ;;  %v439_v36 = vld [vmem:[%s4890_s0 + $0x86] sm:$0xff]  ;;  %v440_v37 = vld [vmem:[%s4890_s0 + $0x8e] sm:$0xff] }
  0xca   :  { %v753_v46 = vsel %vm15_vm2, %v743_v43, %v3168_v41  ;;  %v754_v29 = vsel %vm15_vm2, %v744_v42, %v3169_v40  ;;  %v3217_v50 = vpop.permute.xlu2 %3216 }
  0xcb   :  { %v763_v54 = vsel %vm390_vm4, %v753_v46, %v3173_v45  ;;  %v764_v55 = vsel %vm390_vm4, %v754_v29, %v3174_v44  ;;  %v3219_v59 = vunpack.i.h.bf16 %v3217_v50  ;;  %v3218_v22 = vunpack.i.l.bf16 %v3217_v50 }
  0xce   :  { %v3177_v47 = vpop.permute.xlu0 %3176 }
  0xcf   :  { %v3179_v48 = vunpack.i.h.bf16 %v3177_v47  ;;  %v3178_v49 = vunpack.i.l.bf16 %v3177_v47  ;;  %v3182_v51 = vpop.permute.xlu1 %3181 }
  0xd0   :  { %v3184_v57 = vunpack.i.h.bf16 %v3182_v51  ;;  %v3183_v58 = vunpack.i.l.bf16 %v3182_v51 }
  0xd1   :  { %v773_v56 = vsel %vm38_vm3, %v763_v54, %v3178_v49  ;;  %v774_v60 = vsel %vm38_vm3, %v764_v55, %v3179_v48 }
  0xd2   :  { %v783_v61 = vsel %vm411_vm5, %v773_v56, %v3183_v58  ;;  %v784_v62 = vsel %vm411_vm5, %v774_v60, %v3184_v57  ;;  %v3232_v12 = vpop.permute.xlu2 %3231 }
  0xd3   :  { %v793_v63 = vsel %vm422_vm6, %v783_v61, %v3188_v53  ;;  %v794_v0 = vsel %vm422_vm6, %v784_v62, %v3189_v52  ;;  %v3234_v45 = vunpack.i.h.bf16 %v3232_v12  ;;  %v3233_v46 = vunpack.i.l.bf16 %v3232_v12 }
  0xd4   :  { %v812_v2 = vpack.c.bf16 %v794_v0, %v793_v63 }
  0xd6   :  { %v3192_v1 = vpop.permute.xlu0 %3191 }
  0xd7   :  { %v3194_v5 = vunpack.i.h.bf16 %v3192_v1  ;;  %v3193_v6 = vunpack.i.l.bf16 %v3192_v1  ;;  %v3197_v7 = vpop.permute.xlu1 %3196 }
  0xd8   :  { %2712 = vmatmul.msk.bf16.gmra.mxu0 %vm828_vm7, %v812_v2  ;;  %v3199_v8 = vunpack.i.h.bf16 %v3197_v7  ;;  %v3198_v9 = vunpack.i.l.bf16 %v3197_v7 }
  0xd9   :  { %v746_v10 = vsel %vm369_vm1, %v436_v4, %v3194_v5  ;;  %v745_v11 = vsel %vm369_vm1, %v435_v3, %v3193_v6  ;;  %v437_v4 = vld [vmem:[%s4890_s0 + $0x76] sm:$0xff]  ;;  %v438_v5 = vld [vmem:[%s4890_s0 + $0x7e] sm:$0xff] }
  0xda   :  { %v755_v16 = vsel %vm15_vm2, %v745_v11, %v3198_v9  ;;  %v756_v17 = vsel %vm15_vm2, %v746_v10, %v3199_v8  ;;  %v3247_v13 = vpop.permute.xlu2 %3246 }
  0xdb   :  { %v765_v24 = vsel %vm390_vm4, %v755_v16, %v3203_v15  ;;  %v766_v25 = vsel %vm390_vm4, %v756_v17, %v3204_v14  ;;  %v3249_v54 = vunpack.i.h.bf16 %v3247_v13  ;;  %v3248_v55 = vunpack.i.l.bf16 %v3247_v13 }
  0xde   :  { %v3207_v18 = vpop.permute.xlu0 %3206 }
  0xdf   :  { %v3209_v19 = vunpack.i.h.bf16 %v3207_v18  ;;  %v3208_v20 = vunpack.i.l.bf16 %v3207_v18  ;;  %v3212_v21 = vpop.permute.xlu1 %3211 }
  0xe0   :  { %v3214_v26 = vunpack.i.h.bf16 %v3212_v21  ;;  %v3213_v27 = vunpack.i.l.bf16 %v3212_v21 }
  0xe1   :  { %v775_v28 = vsel %vm38_vm3, %v765_v24, %v3208_v20  ;;  %v776_v30 = vsel %vm38_vm3, %v766_v25, %v3209_v19 }
  0xe2   :  { %v785_v23 = vsel %vm411_vm5, %v775_v28, %v3213_v27  ;;  %v786_v31 = vsel %vm411_vm5, %v776_v30, %v3214_v26  ;;  %v3262_v49 = vpop.permute.xlu2 %3261 }
  0xe3   :  { %v795_v32 = vsel %vm422_vm6, %v785_v23, %v3218_v22  ;;  %v796_v33 = vsel %vm422_vm6, %v786_v31, %v3219_v59  ;;  %v3264_v15 = vunpack.i.h.bf16 %v3262_v49  ;;  %v3263_v16 = vunpack.i.l.bf16 %v3262_v49 }
  0xe4   :  { %v813_v35 = vpack.c.bf16 %v796_v33, %v795_v32 }
  0xe6   :  { %v3222_v34 = vpop.permute.xlu0 %3221 }
  0xe7   :  { %v3224_v38 = vunpack.i.h.bf16 %v3222_v34  ;;  %v3223_v39 = vunpack.i.l.bf16 %v3222_v34  ;;  %v3227_v40 = vpop.permute.xlu1 %3226 }
  0xe8   :  { %2713 = vmatmul.msk.bf16.gmra.mxu0 %vm828_vm7, %v813_v35  ;;  %v3229_v41 = vunpack.i.h.bf16 %v3227_v40  ;;  %v3228_v42 = vunpack.i.l.bf16 %v3227_v40 }
  0xe9   :  { %v750_v43 = vsel %vm369_vm1, %v440_v37, %v3224_v38  ;;  %v749_v44 = vsel %vm369_vm1, %v439_v36, %v3223_v39  ;;  %v441_v38 = vld [vmem:[%s4890_s0 + $0x96] sm:$0xff]  ;;  %v442_v39 = vld [vmem:[%s4890_s0 + $0x9e] sm:$0xff] }
  0xea   :  { %v759_v29 = vsel %vm15_vm2, %v749_v44, %v3228_v42  ;;  %v760_v47 = vsel %vm15_vm2, %v750_v43, %v3229_v41  ;;  %v3277_v9 = vpop.permute.xlu2 %3276 }
  0xeb   :  { %v769_v57 = vsel %vm390_vm4, %v759_v29, %v3233_v46  ;;  %v770_v58 = vsel %vm390_vm4, %v760_v47, %v3234_v45  ;;  %v3279_v22 = vunpack.i.h.bf16 %v3277_v9  ;;  %v3278_v24 = vunpack.i.l.bf16 %v3277_v9 }
  0xee   :  { %v3237_v48 = vpop.permute.xlu0 %3236 }
  0xef   :  { %v3239_v51 = vunpack.i.h.bf16 %v3237_v48  ;;  %v3238_v52 = vunpack.i.l.bf16 %v3237_v48  ;;  %v3242_v53 = vpop.permute.xlu1 %3241 }
  0xf0   :  { %v3244_v50 = vunpack.i.h.bf16 %v3242_v53  ;;  %v3243_v56 = vunpack.i.l.bf16 %v3242_v53 }
  0xf1   :  { %v779_v60 = vsel %vm38_vm3, %v769_v57, %v3238_v52  ;;  %v780_v61 = vsel %vm38_vm3, %v770_v58, %v3239_v51 }
  0xf2   :  { %v789_v62 = vsel %vm411_vm5, %v779_v60, %v3243_v56  ;;  %v790_v63 = vsel %vm411_vm5, %v780_v61, %v3244_v50  ;;  %v3292_v33 = vpop.permute.xlu2 %3291 }
  0xf3   :  { %v799_v0 = vsel %vm422_vm6, %v789_v62, %v3248_v55  ;;  %v800_v1 = vsel %vm422_vm6, %v790_v63, %v3249_v54  ;;  %v3294_v29 = vunpack.i.h.bf16 %v3292_v33  ;;  %v3293_v47 = vunpack.i.l.bf16 %v3292_v33 }
  0xf4   :  { %v815_v2 = vpack.c.bf16 %v800_v1, %v799_v0 }
  0xf6   :  { %v3252_v3 = vpop.permute.xlu0 %3251  ;;  %2715 = vmatmul.msk.bf16.vlgmr.msra.gmra.mxu1 %vm828_vm7, %v815_v2 }
  0xf7   :  { %v3254_v6 = vunpack.i.h.bf16 %v3252_v3  ;;  %v3253_v7 = vunpack.i.l.bf16 %v3252_v3  ;;  %v3257_v8 = vpop.permute.xlu1 %3256 }
  0xf8   :  { %v3259_v10 = vunpack.i.h.bf16 %v3257_v8  ;;  %v3258_v11 = vunpack.i.l.bf16 %v3257_v8 }
  0xf9   :  { %v748_v12 = vsel %vm369_vm1, %v438_v5, %v3254_v6  ;;  %v747_v14 = vsel %vm369_vm1, %v437_v4, %v3253_v7 }
  0xfa   :  { %v757_v17 = vsel %vm15_vm2, %v747_v14, %v3258_v11  ;;  %v758_v18 = vsel %vm15_vm2, %v748_v12, %v3259_v10  ;;  %v3307_v48 = vpop.permute.xlu2 %3306 }
  0xfb   :  { %v767_v25 = vsel %vm390_vm4, %v757_v17, %v3263_v16  ;;  %v768_v26 = vsel %vm390_vm4, %v758_v18, %v3264_v15  ;;  %v3309_v58 = vunpack.i.h.bf16 %v3307_v48  ;;  %v3308_v50 = vunpack.i.l.bf16 %v3307_v48 }
  0xfe   :  { %v3267_v19 = vpop.permute.xlu0 %3266 }
  0xff   :  { %v3269_v20 = vunpack.i.h.bf16 %v3267_v19  ;;  %v3268_v21 = vunpack.i.l.bf16 %v3267_v19  ;;  %v3272_v59 = vpop.permute.xlu1 %3271 }
 0x100   :  { %v3274_v27 = vunpack.i.h.bf16 %v3272_v59  ;;  %v3273_v28 = vunpack.i.l.bf16 %v3272_v59 }
 0x101   :  { %v777_v30 = vsel %vm38_vm3, %v767_v25, %v3268_v21  ;;  %v778_v23 = vsel %vm38_vm3, %v768_v26, %v3269_v20 }
 0x102   :  { %v787_v31 = vsel %vm411_vm5, %v777_v30, %v3273_v28  ;;  %v788_v32 = vsel %vm411_vm5, %v778_v23, %v3274_v27 }
 0x103   :  { %v797_v13 = vsel %vm422_vm6, %v787_v31, %v3278_v24  ;;  %v798_v34 = vsel %vm422_vm6, %v788_v32, %v3279_v22 }
 0x104   :  { %v814_v35 = vpack.c.bf16 %v798_v34, %v797_v13 }
 0x105   :  { %v4128_v36 = vpop.f32.mrf.mxu0 }
 0x106   :  { %v3282_v37 = vpop.permute.xlu0 %3281  ;;  %2714 = vmatmul.msk.bf16.gmra.mxu0 %vm828_vm7, %v814_v35  ;;  %v970_v19 = vmul.f32 %v4128_v36, %v4128_v36  ;;  %v924_v59 = vsel %vm15_vm2, %v4128_v36, 0.0  ;;  %v3476_v35 = vmov 0.0  }
 0x107   :  { %v3284_v40 = vunpack.i.h.bf16 %v3282_v37  ;;  %v3283_v41 = vunpack.i.l.bf16 %v3282_v37  ;;  %v3287_v42 = vpop.permute.xlu1 %3286  ;;  %33 = vst.msk [vmem:[#allocation2 + $0x88] sm:$0xff] %vm15_vm2, %v3476_v35 }
 0x108   :  { %v3289_v43 = vunpack.i.h.bf16 %v3287_v42  ;;  %v3288_v44 = vunpack.i.l.bf16 %v3287_v42  ;;  %v990_v27 = vsel %vm15_vm2, %v970_v19, 0.0  ;;  %34 = vst.msk [vmem:[#allocation2 + $0x90] sm:$0xff] %vm15_vm2, %v3476_v35 }
 0x109   :  { %v752_v45 = vsel %vm369_vm1, %v442_v39, %v3284_v40  ;;  %v751_v46 = vsel %vm369_vm1, %v441_v38, %v3283_v41  ;;  %35 = vst.msk [vmem:[#allocation2 + $0x98] sm:$0xff] %vm15_vm2, %v3476_v35 }
 0x10a   :  { %v761_v49 = vsel %vm15_vm2, %v751_v46, %v3288_v44  ;;  %v762_v51 = vsel %vm15_vm2, %v752_v45, %v3289_v43  ;;  %37 = vst.msk [vmem:[#allocation2 + $0xa0] sm:$0xf] %vm36_vm8, %v3476_v35 }
 0x10b   :  { %v771_v56 = vsel %vm390_vm4, %v761_v49, %v3293_v47  ;;  %v772_v60 = vsel %vm390_vm4, %v762_v51, %v3294_v29  ;;  %16 = vst.msk [vmem:[#allocation2] sm:$0xff] %vm15_vm2, %v3476_v35 }
 0x10c   :  { %17 = vst.msk [vmem:[#allocation2 + $0x8] sm:$0xff] %vm15_vm2, %v3476_v35 }
 0x10d   :  { %v4141_v52 = vpop.f32.mrf.mxu0  ;;  %18 = vst.msk [vmem:[#allocation2 + $0x10] sm:$0xff] %vm15_vm2, %v3476_v35 }
 0x10e   :  { %v3297_v53 = vpop.permute.xlu0 %3296  ;;  %v971_v17 = vmul.f32 %v4141_v52, %v4141_v52  ;;  %v925_v20 = vsel %vm15_vm2, %v4141_v52, 0.0  ;;  %19 = vst.msk [vmem:[#allocation2 + $0x18] sm:$0xff] %vm15_vm2, %v3476_v35 }
 0x10f   :  { %v3299_v54 = vunpack.i.h.bf16 %v3297_v53  ;;  %v3298_v55 = vunpack.i.l.bf16 %v3297_v53  ;;  %v3302_v57 = vpop.permute.xlu1 %3301  ;;  %v926_v26 = vadd.f32 %v925_v20, %v924_v59  ;;  %20 = vst.msk [vmem:[#allocation2 + $0x20] sm:$0xff] %vm15_vm2, %v3476_v35 }
 0x110   :  { %v3304_v61 = vunpack.i.h.bf16 %v3302_v57  ;;  %v3303_v62 = vunpack.i.l.bf16 %v3302_v57  ;;  %v991_v22 = vsel %vm15_vm2, %v971_v17, 0.0  ;;  %21 = vst.msk [vmem:[#allocation2 + $0x28] sm:$0xff] %vm15_vm2, %v3476_v35 }
 0x111   :  { %v781_v63 = vsel %vm38_vm3, %v771_v56, %v3298_v55  ;;  %v782_v0 = vsel %vm38_vm3, %v772_v60, %v3299_v54  ;;  %v992_v31 = vadd.f32 %v991_v22, %v990_v27  ;;  %22 = vst.msk [vmem:[#allocation2 + $0x30] sm:$0xff] %vm15_vm2, %v3476_v35 }
 0x112   :  { %v791_v1 = vsel %vm411_vm5, %v781_v63, %v3303_v62  ;;  %v792_v2 = vsel %vm411_vm5, %v782_v0, %v3304_v61  ;;  %23 = vst.msk [vmem:[#allocation2 + $0x38] sm:$0xff] %vm15_vm2, %v3476_v35 }
 0x113   :  { %v801_v3 = vsel %vm422_vm6, %v791_v1, %v3308_v50  ;;  %v802_v4 = vsel %vm422_vm6, %v792_v2, %v3309_v58  ;;  %24 = vst.msk [vmem:[#allocation2 + $0x40] sm:$0xff] %vm15_vm2, %v3476_v35 }
 0x114   :  { %v816_v5 = vpack.c.bf16 %v802_v4, %v801_v3  ;;  %25 = vst.msk [vmem:[#allocation2 + $0x48] sm:$0xff] %vm15_vm2, %v3476_v35 }
 0x115   :  { %v4151_v6 = vpop.f32.mrf.mxu0  ;;  %26 = vst.msk [vmem:[#allocation2 + $0x50] sm:$0xff] %vm15_vm2, %v3476_v35 }
 0x116   :  { %2716 = vmatmul.msk.bf16.gmra.mxu1 %vm828_vm7, %v816_v5  ;;  %v972_v21 = vmul.f32 %v4151_v6, %v4151_v6  ;;  %v927_v24 = vsel %vm15_vm2, %v4151_v6, 0.0  ;;  %27 = vst.msk [vmem:[#allocation2 + $0x58] sm:$0xff] %vm15_vm2, %v3476_v35 }
 0x117   :  { %v928_v32 = vadd.f32 %v927_v24, %v926_v26  ;;  %28 = vst.msk [vmem:[#allocation2 + $0x60] sm:$0xff] %vm15_vm2, %v3476_v35 }
 0x118   :  { %v993_v28 = vsel %vm15_vm2, %v972_v21, 0.0  ;;  %29 = vst.msk [vmem:[#allocation2 + $0x68] sm:$0xff] %vm15_vm2, %v3476_v35 }
 0x119   :  { %v994_v37 = vadd.f32 %v993_v28, %v992_v31  ;;  %30 = vst.msk [vmem:[#allocation2 + $0x70] sm:$0xff] %vm15_vm2, %v3476_v35 }
 0x11a   :  { %31 = vst.msk [vmem:[#allocation2 + $0x78] sm:$0xff] %vm15_vm2, %v3476_v35 }
 0x11b   :  { %32 = vst.msk [vmem:[#allocation2 + $0x80] sm:$0xff] %vm15_vm2, %v3476_v35 }
 0x11c   :  { %39 = vst.msk [vmem:[#allocation3] sm:$0xff] %vm38_vm3, %v3476_v35 }
 0x11d   :  { %v4154_v7 = vpop.f32.mrf.mxu0  ;;  %40 = vst.msk [vmem:[#allocation3 + $0x8] sm:$0xff] %vm38_vm3, %v3476_v35 }
 0x11e   :  { %v973_v25 = vmul.f32 %v4154_v7, %v4154_v7  ;;  %v929_v30 = vsel %vm15_vm2, %v4154_v7, 0.0  ;;  %41 = vst.msk [vmem:[#allocation3 + $0x10] sm:$0xff] %vm38_vm3, %v3476_v35 }
 0x11f   :  { %v930_v38 = vadd.f32 %v929_v30, %v928_v32  ;;  %42 = vst.msk [vmem:[#allocation3 + $0x18] sm:$0xff] %vm38_vm3, %v3476_v35 }
 0x120   :  { %v995_v33 = vsel %vm15_vm2, %v973_v25, 0.0  ;;  %43 = vst.msk [vmem:[#allocation3 + $0x20] sm:$0xff] %vm38_vm3, %v3476_v35 }
 0x121   :  { %v996_v42 = vadd.f32 %v995_v33, %v994_v37  ;;  %44 = vst.msk [vmem:[#allocation3 + $0x28] sm:$0xff] %vm38_vm3, %v3476_v35 }
 0x122   :  { %45 = vst.msk [vmem:[#allocation3 + $0x30] sm:$0xff] %vm38_vm3, %v3476_v35 }
 0x123   :  { %46 = vst.msk [vmem:[#allocation3 + $0x38] sm:$0xff] %vm38_vm3, %v3476_v35 }
 0x124   :  { %47 = vst.msk [vmem:[#allocation3 + $0x40] sm:$0xff] %vm38_vm3, %v3476_v35 }
 0x125   :  { %v4156_v8 = vpop.f32.mrf.mxu0  ;;  %48 = vst.msk [vmem:[#allocation3 + $0x48] sm:$0xff] %vm38_vm3, %v3476_v35 }
 0x126   :  { %v974_v23 = vmul.f32 %v4156_v8, %v4156_v8  ;;  %v931_v13 = vsel %vm15_vm2, %v4156_v8, 0.0 }
 0x127   :  { %v932_v43 = vadd.f32 %v931_v13, %v930_v38 }
 0x128   :  { %v997_v39 = vsel %vm15_vm2, %v974_v23, 0.0 }
 0x129   :  { %v998_v47 = vadd.f32 %v997_v39, %v996_v42 }
 0x12d   :  { %v4158_v9 = vpop.f32.mrf.mxu0 }
 0x12e   :  { %v975_v34 = vmul.f32 %v4158_v9, %v4158_v9  ;;  %v933_v40 = vsel %vm15_vm2, %v4158_v9, 0.0 }
 0x12f   :  { %v934_v48 = vadd.f32 %v933_v40, %v932_v43 }
 0x130   :  { %v999_v45 = vsel %vm15_vm2, %v975_v34, 0.0 }
 0x131   :  { %v1000_v54 = vadd.f32 %v999_v45, %v998_v47 }
 0x135   :  { %v4160_v10 = vpop.f32.mrf.mxu0 }
 0x136   :  { %v976_v41 = vmul.f32 %v4160_v10, %v4160_v10  ;;  %v935_v46 = vsel %vm15_vm2, %v4160_v10, 0.0 }
 0x137   :  { %v936_v55 = vadd.f32 %v935_v46, %v934_v48 }
 0x138   :  { %v1001_v49 = vsel %vm15_vm2, %v976_v41, 0.0 }
 0x139   :  { %v1002_v56 = vadd.f32 %v1001_v49, %v1000_v54 }
 0x13d   :  { %v4162_v11 = vpop.f32.mrf.mxu0 }
 0x13e   :  { %v977_v29 = vmul.f32 %v4162_v11, %v4162_v11  ;;  %v937_v51 = vsel %vm15_vm2, %v4162_v11, 0.0 }
 0x13f   :  { %v938_v60 = vadd.f32 %v937_v51, %v936_v55 }
 0x140   :  { %v1003_v57 = vsel %vm15_vm2, %v977_v29, 0.0 }
 0x141   :  { %v1004_v1 = vadd.f32 %v1003_v57, %v1002_v56 }
 0x145   :  { %v4164_v12 = vpop.f32.mrf.mxu0 }
 0x146   :  { %v978_v53 = vmul.f32 %v4164_v12, %v4164_v12  ;;  %v939_v58 = vsel %vm15_vm2, %v4164_v12, 0.0 }
 0x147   :  { %v940_v2 = vadd.f32 %v939_v58, %v938_v60 }
 0x148   :  { %v1005_v62 = vsel %vm15_vm2, %v978_v53, 0.0 }
 0x149   :  { %v1006_v19 = vadd.f32 %v1005_v62, %v1004_v1 }
 0x14d   :  { %v4166_v14 = vpop.f32.mrf.mxu0 }
 0x14e   :  { %v979_v50 = vmul.f32 %v4166_v14, %v4166_v14  ;;  %v941_v63 = vsel %vm15_vm2, %v4166_v14, 0.0 }
 0x14f   :  { %v942_v20 = vadd.f32 %v941_v63, %v940_v2 }
 0x150   :  { %v1007_v4 = vsel %vm15_vm2, %v979_v50, 0.0 }
 0x151   :  { %v1008_v24 = vadd.f32 %v1007_v4, %v1006_v19 }
 0x155   :  { %v4168_v15 = vpop.f32.mrf.mxu0 }
 0x156   :  { %v980_v0 = vmul.f32 %v4168_v15, %v4168_v15  ;;  %v943_v5 = vsel %vm15_vm2, %v4168_v15, 0.0 }
 0x157   :  { %v944_v25 = vadd.f32 %v943_v5, %v942_v20 }
 0x158   :  { %v1009_v21 = vsel %vm15_vm2, %v980_v0, 0.0 }
 0x159   :  { %v1010_v30 = vadd.f32 %v1009_v21, %v1008_v24 }
 0x15d   :  { %v4170_v16 = vpop.f32.mrf.mxu0 }
 0x15e   :  { %v981_v17 = vmul.f32 %v4170_v16, %v4170_v16  ;;  %v945_v59 = vsel %vm15_vm2, %v4170_v16, 0.0 }
 0x15f   :  { %v946_v23 = vadd.f32 %v945_v59, %v944_v25 }
 0x160   :  { %v1011_v26 = vsel %vm15_vm2, %v981_v17, 0.0 }
 0x161   :  { %v1012_v13 = vadd.f32 %v1011_v26, %v1010_v30 }
 0x165   :  { %v4174_v18 = vpop.f32.mrf.mxu0 }
 0x166   :  { %v982_v22 = vmul.f32 %v4174_v18, %v4174_v18  ;;  %v947_v27 = vsel %vm15_vm2, %v4174_v18, 0.0 }
 0x167   :  { %v948_v34 = vadd.f32 %v947_v27, %v946_v23 }
 0x168   :  { %v1013_v31 = vsel %vm15_vm2, %v982_v22, 0.0 }
 0x169   :  { %v1014_v42 = vadd.f32 %v1013_v31, %v1012_v13 }
 0x16d   :  { %v4211_v44 = vpop.f32.mrf.mxu0 }
 0x16e   :  { %v983_v28 = vmul.f32 %v4211_v44, %v4211_v44  ;;  %v949_v32 = vsel %vm15_vm2, %v4211_v44, 0.0 }
 0x16f   :  { %v950_v43 = vadd.f32 %v949_v32, %v948_v34 }
 0x170   :  { %v1015_v39 = vsel %vm15_vm2, %v983_v28, 0.0 }
 0x171   :  { %v1016_v29 = vadd.f32 %v1015_v39, %v1014_v42 }
 0x173   :  { %v4239_v61 = vpop.f32.mrf.mxu1 }
 0x174   :  { %v986_v53 = vmul.f32 %v4239_v61, %v4239_v61  ;;  %v955_v57 = vsel %vm15_vm2, %v4239_v61, 0.0 }
 0x176   :  { %v1021_v50 = vsel %vm15_vm2, %v986_v53, 0.0 }
 0x17b   :  { %v4288_v37 = vpop.f32.mrf.mxu1 }
 0x17c   :  { %v987_v56 = vmul.f32 %v4288_v37, %v4288_v37  ;;  %v957_v63 = vsel %vm15_vm2, %v4288_v37, 0.0 }
 0x17e   :  { %v1023_v2 = vsel %vm15_vm2, %v987_v56, 0.0  ;;  %v923_v56 = vld [vmem:[%s4892_s2 + $0x1] sm:$0x1] }
 0x183   :  { %v4250_v3 = vpop.f32.mrf.mxu0 }
 0x184   :  { %v984_v33 = vmul.f32 %v4250_v3, %v4250_v3  ;;  %v951_v40 = vsel %vm15_vm2, %v4250_v3, 0.0 }
 0x185   :  { %v952_v47 = vadd.f32 %v951_v40, %v950_v43 }
 0x186   :  { %v1017_v45 = vsel %vm15_vm2, %v984_v33, 0.0 }
 0x187   :  { %v1018_v49 = vadd.f32 %v1017_v45, %v1016_v29 }
 0x18b   :  { %v4290_v38 = vpop.f32.mrf.mxu0 }
 0x18c   :  { %v985_v41 = vmul.f32 %v4290_v38, %v4290_v38  ;;  %v953_v46 = vsel %vm15_vm2, %v4290_v38, 0.0 }
 0x18d   :  { %v954_v51 = vadd.f32 %v953_v46, %v952_v47 }
 0x18e   :  { %v1019_v48 = vsel %vm15_vm2, %v985_v41, 0.0 }
 0x18f   :  { %v1020_v54 = vadd.f32 %v1019_v48, %v1018_v49  ;;  %v956_v58 = vadd.f32 %v955_v57, %v954_v51 }
 0x191   :  { %v1022_v62 = vadd.f32 %v1021_v50, %v1020_v54  ;;  %v958_v1 = vadd.f32 %v957_v63, %v956_v58  ;;  %v922_v54 = vld [vmem:[%s4892_s2] sm:$0x1] }
 0x193   :  { %v917_v55 = vpop.f32.mrf.mxu1  ;;  %v1024_v17 = vadd.f32 %v1023_v2, %v1022_v62 }
 0x194   :  { %v988_v60 = vmul.f32 %v917_v55, %v917_v55  ;;  %v959_v0 = vsel %vm15_vm2, %v917_v55, 0.0 }
 0x195   :  { %v960_v5 = vadd.f32 %v959_v0, %v958_v1 }
 0x196   :  { %v1025_v4 = vsel %vm15_vm2, %v988_v60, 0.0 }
 0x197   :  { %v1026_v59 = vadd.f32 %v1025_v4, %v1024_v17 }
 0x19b   :  { %v919_v19 = vpop.f32.mrf.mxu1 }
 0x19c   :  { %v961_v20 = vsel %vm15_vm2, %v919_v19, 0.0  ;;  %v989_v21 = vmul.f32 %v919_v19, %v919_v19 }
 0x19d   :  { %v962_v22 = vadd.f32 %v961_v20, %v960_v5 }
 0x19e   :  { %v1027_v24 = vsel %vm15_vm2, %v989_v21, 0.0 }
 0x19f   :  { %v963_v25 = vrot.slane %v962_v22, 4  ;;  %v1028_v26 = vadd.f32 %v1027_v24, %v1026_v59 }
 0x1a1   :  { %v964_v27 = vadd.f32 %v963_v25, %v962_v22  ;;  %v1029_v28 = vrot.slane %v1028_v26, 4 }
 0x1a3   :  { %v965_v30 = vrot.slane %v964_v27, 2  ;;  %v1030_v23 = vadd.f32 %v1029_v28, %v1028_v26 }
 0x1a5   :  { %v966_v31 = vadd.f32 %v965_v30, %v964_v27  ;;  %v1031_v32 = vrot.slane %v1030_v23, 2 }
 0x1a7   :  { %v967_v33 = vrot.slane %v966_v31, 1  ;;  %v1032_v13 = vadd.f32 %v1031_v32, %v1030_v23 }
 0x1a9   :  { %v968_v34 = vadd.f32 %v967_v33, %v966_v31  ;;  %v1033_v39 = vrot.slane %v1032_v13, 1 }
 0x1ab   :  { %v969_v40 = vmul.f32 0.00625, %v968_v34  ;;  %v1034_v41 = vadd.f32 %v1033_v39, %v1032_v13 }
 0x1ad   :  { %v1035_v42 = vmul.f32 0.00625, %v1034_v41  ;;  %v1036_v43 = vmul.f32 %v969_v40, %v969_v40 }
 0x1af   :  { %v1037_v45 = vsub.f32 %v1035_v42, %v1036_v43 }
 0x1b1   :  { %v1038_v46 = vmax.f32 %v1037_v45, 0.0 }
 0x1b3   :  { %v1039_v29 = vadd.f32 1e-05, %v1038_v46 }
 0x1b5   :  { %3458 = vrsqrt.f32 %v1039_v29  ;;  %vm1046_vm10 = vweird.f32 %v1039_v29 }
 0x1bb   :  { %v3459_v47 = vpop.eup %3458 }
 0x1bc   :  { %v1041_v48 = vmul.f32 %v3459_v47, %v1039_v29  ;;  %vm1047_vm9 = vweird.f32 %v3459_v47 }
 0x1bd   :  { %vm1048_vm11 = vmor %vm1046_vm10, %vm1047_vm9 }
 0x1be   :  { %v1042_v49 = vmul.f32 %v3459_v47, %v1041_v48 }
 0x1c0   :  { %v1043_v51 = vmul.f32 0.5, %v1042_v49 }
 0x1c2   :  { %v1044_v53 = vsub.f32 1.5, %v1043_v51 }
 0x1c4   :  { %v1045_v57 = vmul.f32 %v3459_v47, %v1044_v53 }
 0x1c6   :  { %v1049_v58 = vsel %vm1048_vm11, %v3459_v47, %v1045_v57 }
 0x1c7   :  { %v1050_v50 = vmul.f32 %v1049_v58, %v922_v54 }
 0x1c9   :  { %v1051_v60 = vmul.f32 %v1050_v50, %v969_v40  ;;  %v4345_v62 = vperm.slane %v1050_v50, 0 }
 0x1cb   :  { %v1052_v63 = vsub.f32 %v923_v56, %v1051_v60  ;;  %v1071_v0 = vmul.f32 %v4345_v62, %v4288_v37  ;;  %v1072_v1 = vmul.f32 %v4345_v62, %v917_v55  ;;  %v1073_v2 = vmul.f32 %v4345_v62, %v919_v19 }
 0x1cc   :  { %v1054_v4 = vmul.f32 %v4345_v62, %v4128_v36  ;;  %v1055_v5 = vmul.f32 %v4345_v62, %v4141_v52  ;;  %v1056_v17 = vmul.f32 %v4345_v62, %v4151_v6  ;;  %v1057_v20 = vmul.f32 %v4345_v62, %v4154_v7 }
 0x1cd   :  { %v4359_v21 = vperm.slane %v1052_v63, 0  ;;  %v1058_v37 = vmul.f32 %v4345_v62, %v4156_v8  ;;  %v1059_v55 = vmul.f32 %v4345_v62, %v4158_v9  ;;  %v1060_v36 = vmul.f32 %v4345_v62, %v4160_v10 }
 0x1ce   :  { %v1061_v52 = vmul.f32 %v4345_v62, %v4162_v11  ;;  %v1062_v6 = vmul.f32 %v4345_v62, %v4164_v12  ;;  %v1063_v7 = vmul.f32 %v4345_v62, %v4166_v14  ;;  %v1064_v19 = vmul.f32 %v4345_v62, %v4168_v15 }
 0x1cf   :  { %v1092_v8 = vadd.f32 %v4359_v21, %v1071_v0  ;;  %v1093_v59 = vadd.f32 %v4359_v21, %v1072_v1  ;;  %v1094_v9 = vadd.f32 %v4359_v21, %v1073_v2  ;;  %v1075_v10 = vadd.f32 %v4359_v21, %v1054_v4 }
 0x1d0   :  { %v1076_v22 = vadd.f32 %v4359_v21, %v1055_v5  ;;  %v1077_v11 = vadd.f32 %v4359_v21, %v1056_v17  ;;  %v1078_v12 = vadd.f32 %v4359_v21, %v1057_v20  ;;  %v1079_v24 = vadd.f32 %v4359_v21, %v1058_v37 }
 0x1d1   :  { %vm1112_vm12 = vcmp.ge.f32.partialorder %v1092_v8, 0.0  ;;  %vm1113_vm13 = vcmp.ge.f32.partialorder %v1093_v59, 0.0  ;;  %vm1114_vm14 = vcmp.ge.f32.partialorder %v1094_v9, 0.0  ;;  %v1132_v14 = vmul.f32 0.01, %v1092_v8 }
 0x1d2   :  { %v1133_v15 = vmul.f32 0.01, %v1093_v59  ;;  %v1134_v25 = vmul.f32 0.01, %v1094_v9  ;;  %vm1095_vm15 = vcmp.ge.f32.partialorder %v1075_v10, 0.0  ;;  %vm1096_vm0 = vcmp.ge.f32.partialorder %v1076_v22, 0.0 }
 0x1d3   :  { %v1152_v26 = vsel %vm1112_vm12, %v1092_v8, %v1132_v14  ;;  %vm1097_vm1 = vcmp.ge.f32.partialorder %v1077_v11, 0.0  ;;  %vm1098_vm4 = vcmp.ge.f32.partialorder %v1078_v12, 0.0  ;;  %vm1099_vm5 = vcmp.ge.f32.partialorder %v1079_v24, 0.0 }
 0x1d4   :  { %v1153_v27 = vsel %vm1113_vm13, %v1093_v59, %v1133_v15  ;;  %v1154_v28 = vsel %vm1114_vm14, %v1094_v9, %v1134_v25  ;;  %1172 = vst.msk [vmem:[#allocation2 + $0x8b] sm:$0xff] %vm15_vm2, %v1152_v26  ;;  %v1115_v30 = vmul.f32 0.01, %v1075_v10  ;;  %v1116_v23 = vmul.f32 0.01, %v1076_v22  ;;  %v2944_v26 = vld [vmem:[%s4891_s1 + $0x18] sm:$0xff] }
 0x1d5   :  { %1173 = vst.msk [vmem:[#allocation2 + $0x93] sm:$0xff] %vm15_vm2, %v1153_v27  ;;  %v1117_v31 = vmul.f32 0.01, %v1077_v11  ;;  %v1118_v32 = vmul.f32 0.01, %v1078_v12  ;;  %v1080_v33 = vadd.f32 %v4359_v21, %v1059_v55  ;;  %v1081_v13 = vadd.f32 %v4359_v21, %v1060_v36  ;;  %1446 = vmatpush.bf16.msrb.mxu1 %v2944_v26 }
 0x1d6   :  { %1174 = vst.msk [vmem:[#allocation2 + $0x9b] sm:$0xff] %vm15_vm2, %v1154_v28  ;;  %v1119_v34 = vmul.f32 0.01, %v1079_v24  ;;  %v1135_v39 = vsel %vm1095_vm15, %v1075_v10, %v1115_v30  ;;  %v1136_v40 = vsel %vm1096_vm0, %v1076_v22, %v1116_v23  ;;  %v1082_v41 = vadd.f32 %v4359_v21, %v1061_v52 }
 0x1d7   :  { %v1137_v42 = vsel %vm1097_vm1, %v1077_v11, %v1117_v31  ;;  %v1138_v43 = vsel %vm1098_vm4, %v1078_v12, %v1118_v32  ;;  %1155 = vst.msk [vmem:[#allocation2 + $0x1] sm:$0xff] %vm15_vm2, %v1135_v39  ;;  %v1083_v45 = vadd.f32 %v4359_v21, %v1062_v6  ;;  %vm1100_vm7 = vcmp.ge.f32.partialorder %v1080_v33, 0.0 }
 0x1d8   :  { %v1139_v46 = vsel %vm1099_vm5, %v1079_v24, %v1119_v34  ;;  %1156 = vst.msk [vmem:[#allocation2 + $0x9] sm:$0xff] %vm15_vm2, %v1136_v40  ;;  %vm1101_vm8 = vcmp.ge.f32.partialorder %v1081_v13, 0.0  ;;  %vm1102_vm9 = vcmp.ge.f32.partialorder %v1082_v41, 0.0  ;;  %v1120_v29 = vmul.f32 0.01, %v1080_v33 }
 0x1d9   :  { %1157 = vst.msk [vmem:[#allocation2 + $0x11] sm:$0xff] %vm15_vm2, %v1137_v42  ;;  %vm1103_vm10 = vcmp.ge.f32.partialorder %v1083_v45, 0.0  ;;  %v1121_v47 = vmul.f32 0.01, %v1081_v13  ;;  %v1122_v48 = vmul.f32 0.01, %v1082_v41  ;;  %v1065_v49 = vmul.f32 %v4345_v62, %v4170_v16 }
 0x1da   :  { %1158 = vst.msk [vmem:[#allocation2 + $0x19] sm:$0xff] %vm15_vm2, %v1138_v43  ;;  %v1123_v51 = vmul.f32 0.01, %v1083_v45  ;;  %v1140_v53 = vsel %vm1100_vm7, %v1080_v33, %v1120_v29  ;;  %v1066_v54 = vmul.f32 %v4345_v62, %v4174_v18  ;;  %v1084_v57 = vadd.f32 %v4359_v21, %v1063_v7 }
 0x1db   :  { %1159 = vst.msk [vmem:[#allocation2 + $0x21] sm:$0xff] %vm15_vm2, %v1139_v46  ;;  %v1141_v58 = vsel %vm1101_vm8, %v1081_v13, %v1121_v47  ;;  %v1142_v50 = vsel %vm1102_vm9, %v1082_v41, %v1122_v48  ;;  %v1085_v56 = vadd.f32 %v4359_v21, %v1064_v19  ;;  %v1086_v60 = vadd.f32 %v4359_v21, %v1065_v49 }
 0x1dc   :  { %v1143_v63 = vsel %vm1103_vm10, %v1083_v45, %v1123_v51  ;;  %1160 = vst.msk [vmem:[#allocation2 + $0x29] sm:$0xff] %vm15_vm2, %v1140_v53  ;;  %v1087_v16 = vadd.f32 %v4359_v21, %v1066_v54  ;;  %vm1104_vm11 = vcmp.ge.f32.partialorder %v1084_v57, 0.0  ;;  %v1124_v0 = vmul.f32 0.01, %v1084_v57 }
 0x1dd   :  { %1161 = vst.msk [vmem:[#allocation2 + $0x31] sm:$0xff] %vm15_vm2, %v1141_v58  ;;  %vm1105_vm12 = vcmp.ge.f32.partialorder %v1085_v56, 0.0  ;;  %vm1106_vm13 = vcmp.ge.f32.partialorder %v1086_v60, 0.0  ;;  %v1125_v18 = vmul.f32 0.01, %v1085_v56  ;;  %v1067_v1 = vmul.f32 %v4345_v62, %v4211_v44 }
 0x1de   :  { %1162 = vst.msk [vmem:[#allocation2 + $0x39] sm:$0xff] %vm15_vm2, %v1142_v50  ;;  %vm1107_vm14 = vcmp.ge.f32.partialorder %v1087_v16, 0.0  ;;  %v1126_v2 = vmul.f32 0.01, %v1086_v60  ;;  %v1127_v4 = vmul.f32 0.01, %v1087_v16  ;;  %v1144_v5 = vsel %vm1104_vm11, %v1084_v57, %v1124_v0 }
 0x1df   :  { %v1195_v17 = vld [vmem:[#allocation2 + $0x2] ss:$2 sm:$0xff]  ;;  %v1185_v20 = vld [vmem:[#allocation2 + $0x1] ss:$2 sm:$0xff]  ;;  %1163 = vst.msk [vmem:[#allocation2 + $0x41] sm:$0xff] %vm15_vm2, %v1143_v63  ;;  %v1145_v37 = vsel %vm1105_vm12, %v1085_v56, %v1125_v18  ;;  %v1068_v55 = vmul.f32 %v4345_v62, %v4250_v3  ;;  %v1069_v36 = vmul.f32 %v4345_v62, %v4290_v38  ;;  %v1070_v44 = vmul.f32 %v4345_v62, %v4239_v61 }
 0x1e0   :  { %v1205_v52 = vld [vmem:[#allocation2 + $0x3] ss:$2 sm:$0xff]  ;;  %v1146_v6 = vsel %vm1106_vm13, %v1086_v60, %v1126_v2  ;;  %v1147_v7 = vsel %vm1107_vm14, %v1087_v16, %v1127_v4  ;;  %1164 = vst.msk [vmem:[#allocation2 + $0x49] sm:$0xff] %vm15_vm2, %v1144_v5  ;;  %v1088_v19 = vadd.f32 %v4359_v21, %v1067_v1  ;;  %v1318_v63 = vld [vmem:[#allocation2 + $0x94] ss:$2 sm:$0xff]  ;;  %vm51_vm5 = vcmask 261120  }
 0x1e1   :  { %v1197_v8 = vld [vmem:[#allocation2 + $0x12] ss:$2 sm:$0xff]  ;;  %v1187_v59 = vld [vmem:[#allocation2 + $0x11] ss:$2 sm:$0xff]  ;;  %1165 = vst.msk [vmem:[#allocation2 + $0x53] sm:$0xff] %vm15_vm2, %v1145_v37  ;;  %v1089_v3 = vadd.f32 %v4359_v21, %v1068_v55  ;;  %v1090_v9 = vadd.f32 %v4359_v21, %v1069_v36  ;;  %v1091_v38 = vadd.f32 %v4359_v21, %v1070_v44 }
 0x1e2   :  { %v1207_v10 = vld [vmem:[#allocation2 + $0x13] ss:$2 sm:$0xff]  ;;  %v3315_v61 = vpack.i.bf16 %v1197_v8, %v1195_v17  ;;  %v3310_v62 = vpack.i.bf16 %v1187_v59, %v1185_v20  ;;  %1166 = vst.msk [vmem:[#allocation2 + $0x5b] sm:$0xff] %vm15_vm2, %v1146_v6  ;;  %vm1108_vm15 = vcmp.ge.f32.partialorder %v1088_v19, 0.0  ;;  %v1128_v22 = vmul.f32 0.01, %v1088_v19 }
 0x1e3   :  { %v3320_v11 = vpack.i.bf16 %v1207_v10, %v1205_v52  ;;  %1167 = vst.msk [vmem:[#allocation2 + $0x63] sm:$0xff] %vm15_vm2, %v1147_v7  ;;  %vm1109_vm0 = vcmp.ge.f32.partialorder %v1089_v3, 0.0  ;;  %vm1110_vm1 = vcmp.ge.f32.partialorder %v1090_v9, 0.0  ;;  %v1129_v12 = vmul.f32 0.01, %v1089_v3  ;;  %v2943_v20 = vld [vmem:[%s4891_s1 + $0x10] sm:$0xff] }
 0x1e4   :  { %3316 = vrot.lane.b32.xlu1 %v3315_v61, %s3474_s13  ;;  %3311 = vrot.lane.b32.xlu0 %v3310_v62, %s3473_s12  ;;  %v1148_v24 = vsel %vm1108_vm15, %v1088_v19, %v1128_v22  ;;  %vm1111_vm4 = vcmp.ge.f32.partialorder %v1091_v38, 0.0  ;;  %v1130_v21 = vmul.f32 0.01, %v1090_v9  ;;  %v1199_v14 = vld [vmem:[#allocation2 + $0x22] ss:$2 sm:$0xff]  ;;  %52 = vst.msk [vmem:[#allocation4] sm:$0xff] %vm51_vm5, %v3476_v35 }
 0x1e5   :  { %3321 = vrot.lane.b32.xlu2 %v3320_v11, %s3475_s24  ;;  %v1131_v15 = vmul.f32 0.01, %v1091_v38  ;;  %v1149_v25 = vsel %vm1109_vm0, %v1089_v3, %v1129_v12  ;;  %1168 = vst.msk [vmem:[#allocation2 + $0x6b] sm:$0xff] %vm15_vm2, %v1148_v24  ;;  %v1201_v27 = vld [vmem:[#allocation2 + $0x32] ss:$2 sm:$0xff]  ;;  %1447 = vmatpush.bf16.msrb.mxu1 %v2943_v20 }
 0x1e6   :  { %v1189_v28 = vld [vmem:[#allocation2 + $0x21] ss:$2 sm:$0xff]  ;;  %v1191_v30 = vld [vmem:[#allocation2 + $0x31] ss:$2 sm:$0xff]  ;;  %v1150_v23 = vsel %vm1110_vm1, %v1090_v9, %v1130_v21  ;;  %1169 = vst.msk [vmem:[#allocation2 + $0x73] sm:$0xff] %vm15_vm2, %v1149_v25  ;;  %v3330_v13 = vpack.i.bf16 %v1201_v27, %v1199_v14 }
 0x1e7   :  { %v1209_v31 = vld [vmem:[#allocation2 + $0x23] ss:$2 sm:$0xff]  ;;  %v1211_v32 = vld [vmem:[#allocation2 + $0x33] ss:$2 sm:$0xff]  ;;  %v1151_v33 = vsel %vm1111_vm4, %v1091_v38, %v1131_v15  ;;  %1170 = vst.msk [vmem:[#allocation2 + $0x7b] sm:$0xff] %vm15_vm2, %v1150_v23  ;;  %v3325_v34 = vpack.i.bf16 %v1191_v30, %v1189_v28 }
 0x1e8   :  { %1171 = vst.msk [vmem:[#allocation2 + $0x83] sm:$0xff] %vm15_vm2, %v1151_v33  ;;  %v3335_v39 = vpack.i.bf16 %v1211_v32, %v1209_v31  ;;  %v1203_v40 = vld [vmem:[#allocation2 + $0x42] ss:$2 sm:$0xff]  ;;  %v1193_v42 = vld [vmem:[#allocation2 + $0x41] ss:$2 sm:$0xff] }
 0x1e9   :  { %v1310_v41 = vld [vmem:[#allocation2 + $0x54] ss:$2 sm:$0xff]  ;;  %v1300_v43 = vld [vmem:[#allocation2 + $0x53] ss:$2 sm:$0xff]  ;;  %v1213_v45 = vld [vmem:[#allocation2 + $0x43] ss:$2 sm:$0xff] }
 0x1ea   :  { %v1320_v46 = vld [vmem:[#allocation2 + $0x55] ss:$2 sm:$0xff]  ;;  %v3345_v29 = vpack.i.bf16 %v1310_v41, %v1203_v40  ;;  %v3340_v47 = vpack.i.bf16 %v1300_v43, %v1193_v42  ;;  %53 = vst.msk [vmem:[#allocation4 + $0x8] sm:$0xff] %vm51_vm5, %v3476_v35  ;;  %v1177_v19 = vld [vmem:[#allocation2 + $0x10] ss:$2 sm:$0xff] }
 0x1eb   :  { %v3350_v48 = vpack.i.bf16 %v1320_v46, %v1213_v45  ;;  %v1308_v18 = vld [vmem:[#allocation2 + $0x93] ss:$2 sm:$0xff]  ;;  %54 = vst.msk [vmem:[#allocation4 + $0x10] sm:$0xff] %vm51_vm5, %v3476_v35  ;;  %v1175_v8 = vld [vmem:[#allocation2] ss:$2 sm:$0xff] }
 0x1ec   :  { %3331 = vrot.lane.b32.xlu1 %v3330_v13, %s3474_s13  ;;  %3326 = vrot.lane.b32.xlu0 %v3325_v34, %s3473_s12  ;;  %v1312_v49 = vld [vmem:[#allocation2 + $0x64] ss:$2 sm:$0xff]  ;;  %v1302_v53 = vld [vmem:[#allocation2 + $0x63] ss:$2 sm:$0xff]  ;;  %55 = vst.msk [vmem:[#allocation4 + $0x18] sm:$0xff] %vm51_vm5, %v3476_v35 }
 0x1ed   :  { %3336 = vrot.lane.b32.xlu2 %v3335_v39, %s3475_s24  ;;  %v1322_v57 = vld [vmem:[#allocation2 + $0x65] ss:$2 sm:$0xff]  ;;  %v1328_v2 = vld [vmem:[#allocation2 + $0x95] ss:$2 sm:$0xff]  ;;  %56 = vst.msk [vmem:[#allocation4 + $0x20] sm:$0xff] %vm51_vm5, %v3476_v35 }
 0x1ee   :  { %v1314_v51 = vld [vmem:[#allocation2 + $0x74] ss:$2 sm:$0xff]  ;;  %v1304_v54 = vld [vmem:[#allocation2 + $0x73] ss:$2 sm:$0xff] }
 0x1ef   :  { %v1324_v58 = vld [vmem:[#allocation2 + $0x75] ss:$2 sm:$0xff]  ;;  %v3360_v50 = vpack.i.bf16 %v1314_v51, %v1312_v49  ;;  %v3355_v56 = vpack.i.bf16 %v1304_v54, %v1302_v53  ;;  %v1316_v16 = vld [vmem:[#allocation2 + $0x84] ss:$2 sm:$0xff]  ;;  %v1326_v1 = vld [vmem:[#allocation2 + $0x85] ss:$2 sm:$0xff] }
 0x1f0   :  { %v3365_v60 = vpack.i.bf16 %v1324_v58, %v1322_v57  ;;  %v1306_v0 = vld [vmem:[#allocation2 + $0x83] ss:$2 sm:$0xff]  ;;  %v3375_v4 = vpack.i.bf16 %v1318_v63, %v1316_v16  ;;  %v3380_v17 = vpack.i.bf16 %v1328_v2, %v1326_v1  ;;  %v1179_v26 = vld [vmem:[#allocation2 + $0x20] ss:$2 sm:$0xff]  ;;  %v1181_v27 = vld [vmem:[#allocation2 + $0x30] ss:$2 sm:$0xff] }
 0x1f1   :  { %v3370_v5 = vpack.i.bf16 %v1308_v18, %v1306_v0 }
 0x1f4   :  { %3346 = vrot.lane.b32.xlu1 %v3345_v29, %s3474_s13  ;;  %3341 = vrot.lane.b32.xlu0 %v3340_v47, %s3473_s12  ;;  %v1183_v47 = vld [vmem:[#allocation2 + $0x40] ss:$2 sm:$0xff] }
 0x1f5   :  { %3351 = vrot.lane.b32.xlu2 %v3350_v48, %s3475_s24  ;;  %v1290_v48 = vld [vmem:[#allocation2 + $0x52] ss:$2 sm:$0xff] }
 0x1fc   :  { %3361 = vrot.lane.b32.xlu1 %v3360_v50, %s3474_s13  ;;  %3356 = vrot.lane.b32.xlu0 %v3355_v56, %s3473_s12 }
 0x1fd   :  { %3366 = vrot.lane.b32.xlu2 %v3365_v60, %s3475_s24 }
 0x204   :  { %3376 = vrot.lane.b32.xlu1 %v3375_v4, %s3474_s13  ;;  %3371 = vrot.lane.b32.xlu0 %v3370_v5, %s3473_s12  ;;  %v1292_v5 = vld [vmem:[#allocation2 + $0x62] ss:$2 sm:$0xff] }
 0x205   :  { %3381 = vrot.lane.b32.xlu2 %v3380_v17, %s3475_s24  ;;  %v1294_v17 = vld [vmem:[#allocation2 + $0x72] ss:$2 sm:$0xff] }
 0x23f   :  { %v3322_v37 = vpop.permute.xlu2 %3321 }
 0x240   :  { %v3324_v59 = vunpack.i.h.bf16 %v3322_v37  ;;  %v3323_v3 = vunpack.i.l.bf16 %v3322_v37 }
 0x247   :  { %v3337_v23 = vpop.permute.xlu2 %3336 }
 0x248   :  { %v3339_v33 = vunpack.i.h.bf16 %v3337_v23  ;;  %v3338_v13 = vunpack.i.l.bf16 %v3337_v23 }
 0x24f   :  { %v3352_v53 = vpop.permute.xlu2 %3351 }
 0x250   :  { %v3354_v58 = vunpack.i.h.bf16 %v3352_v53  ;;  %v3353_v50 = vunpack.i.l.bf16 %v3352_v53 }
 0x256   :  { %v3317_v55 = vpop.permute.xlu1 %3316  ;;  %v3312_v36 = vpop.permute.xlu0 %3311 }
 0x257   :  { %v3319_v44 = vunpack.i.h.bf16 %v3317_v55  ;;  %v3318_v52 = vunpack.i.l.bf16 %v3317_v55  ;;  %v3314_v6 = vunpack.i.h.bf16 %v3312_v36  ;;  %v3313_v7 = vunpack.i.l.bf16 %v3312_v36  ;;  %v3367_v55 = vpop.permute.xlu2 %3366 }
 0x259   :  { %v1275_v9 = vsel %vm15_vm2, %v1177_v19, %v3314_v6  ;;  %v1274_v38 = vsel %vm15_vm2, %v1175_v8, %v3313_v7  ;;  %v3368_v6 = vunpack.i.l.bf16 %v3367_v55 }
 0x25a   :  { %v1280_v10 = vsel %vm38_vm3, %v1275_v9, %v3319_v44  ;;  %v1279_v61 = vsel %vm38_vm3, %v1274_v38, %v3318_v52  ;;  %v3369_v52 = vunpack.i.h.bf16 %v3367_v55 }
 0x25b   :  { %v1284_v62 = vsel %vm422_vm6, %v1279_v61, %v3323_v3  ;;  %v1285_v22 = vsel %vm422_vm6, %v1280_v10, %v3324_v59 }
 0x25c   :  { %v1408_v11 = vpack.c.bf16 %v1285_v22, %v1284_v62  ;;  %v1296_v62 = vld [vmem:[#allocation2 + $0x82] ss:$2 sm:$0xff]  ;;  %v1298_v22 = vld [vmem:[#allocation2 + $0x92] ss:$2 sm:$0xff] }
 0x25e   :  { %v3327_v12 = vpop.permute.xlu0 %3326  ;;  %2725 = vmatmul.msk.bf16.vlgmr.msrb.gmra.mxu1 %vm51_vm5, %v1408_v11  ;;  %v3332_v24 = vpop.permute.xlu1 %3331 }
 0x25f   :  { %v3329_v21 = vunpack.i.h.bf16 %v3327_v12  ;;  %v3328_v14 = vunpack.i.l.bf16 %v3327_v12  ;;  %v3334_v15 = vunpack.i.h.bf16 %v3332_v24  ;;  %v3333_v25 = vunpack.i.l.bf16 %v3332_v24  ;;  %v3382_v24 = vpop.permute.xlu2 %3381 }
 0x261   :  { %v1277_v28 = vsel %vm15_vm2, %v1181_v27, %v3329_v21  ;;  %v1276_v30 = vsel %vm15_vm2, %v1179_v26, %v3328_v14 }
 0x262   :  { %v1281_v31 = vsel %vm38_vm3, %v1276_v30, %v3333_v25  ;;  %v1282_v32 = vsel %vm38_vm3, %v1277_v28, %v3334_v15  ;;  %v3384_v15 = vunpack.i.h.bf16 %v3382_v24  ;;  %v3383_v25 = vunpack.i.l.bf16 %v3382_v24 }
 0x263   :  { %v1286_v34 = vsel %vm422_vm6, %v1281_v31, %v3338_v13  ;;  %v1287_v39 = vsel %vm422_vm6, %v1282_v32, %v3339_v33 }
 0x264   :  { %v1409_v41 = vpack.c.bf16 %v1287_v39, %v1286_v34 }
 0x266   :  { %v3342_v40 = vpop.permute.xlu0 %3341  ;;  %v3347_v42 = vpop.permute.xlu1 %3346 }
 0x267   :  { %v3344_v43 = vunpack.i.h.bf16 %v3342_v40  ;;  %v3343_v45 = vunpack.i.l.bf16 %v3342_v40  ;;  %v3349_v46 = vunpack.i.h.bf16 %v3347_v42  ;;  %v3348_v29 = vunpack.i.l.bf16 %v3347_v42 }
 0x269   :  { %v1389_v49 = vsel %vm15_vm2, %v1290_v48, %v3344_v43  ;;  %v1278_v51 = vsel %vm15_vm2, %v1183_v47, %v3343_v45 }
 0x26a   :  { %v1283_v54 = vsel %vm38_vm3, %v1278_v51, %v3348_v29  ;;  %v1394_v57 = vsel %vm38_vm3, %v1389_v49, %v3349_v46 }
 0x26b   :  { %v1288_v56 = vsel %vm422_vm6, %v1283_v54, %v3353_v50  ;;  %v1399_v60 = vsel %vm422_vm6, %v1394_v57, %v3354_v58 }
 0x26c   :  { %v1410_v16 = vpack.c.bf16 %v1399_v60, %v1288_v56 }
 0x26e   :  { %2726 = vmatmul.msk.bf16.gmra.mxu1 %vm51_vm5, %v1409_v41  ;;  %v3357_v63 = vpop.permute.xlu0 %3356  ;;  %v3362_v0 = vpop.permute.xlu1 %3361 }
 0x26f   :  { %v3359_v18 = vunpack.i.h.bf16 %v3357_v63  ;;  %v3358_v1 = vunpack.i.l.bf16 %v3357_v63  ;;  %v3364_v2 = vunpack.i.h.bf16 %v3362_v0  ;;  %v3363_v4 = vunpack.i.l.bf16 %v3362_v0 }
 0x271   :  { %v1391_v20 = vsel %vm15_vm2, %v1294_v17, %v3359_v18  ;;  %v1390_v37 = vsel %vm15_vm2, %v1292_v5, %v3358_v1 }
 0x272   :  { %v1395_v36 = vsel %vm38_vm3, %v1390_v37, %v3363_v4  ;;  %v1396_v44 = vsel %vm38_vm3, %v1391_v20, %v3364_v2 }
 0x273   :  { %v1400_v7 = vsel %vm422_vm6, %v1395_v36, %v3368_v6  ;;  %v1401_v19 = vsel %vm422_vm6, %v1396_v44, %v3369_v52 }
 0x274   :  { %v1411_v59 = vpack.c.bf16 %v1401_v19, %v1400_v7 }
 0x276   :  { %v3372_v8 = vpop.permute.xlu0 %3371  ;;  %v3377_v3 = vpop.permute.xlu1 %3376 }
 0x277   :  { %v3374_v9 = vunpack.i.h.bf16 %v3372_v8  ;;  %v3373_v38 = vunpack.i.l.bf16 %v3372_v8  ;;  %v3379_v10 = vunpack.i.h.bf16 %v3377_v3  ;;  %v3378_v61 = vunpack.i.l.bf16 %v3377_v3 }
 0x279   :  { %v1393_v11 = vsel %vm15_vm2, %v1298_v22, %v3374_v9  ;;  %v1392_v12 = vsel %vm15_vm2, %v1296_v62, %v3373_v38  ;;  %vm49_vm2 = vcmask 125952  }
 0x27a   :  { %v1397_v21 = vsel %vm38_vm3, %v1392_v12, %v3378_v61  ;;  %v1398_v14 = vsel %vm38_vm3, %v1393_v11, %v3379_v10  ;;  %50 = vst.msk [vmem:[#allocation3 + $0x50] sm:$0xf] %vm49_vm2, %v3476_v35  ;;  %vm1682_vm2 = vcmask 392192  }
 0x27b   :  { %v1402_v26 = vsel %vm422_vm6, %v1397_v21, %v3383_v25  ;;  %v1403_v27 = vsel %vm422_vm6, %v1398_v14, %v3384_v15 }
 0x27c   :  { %v1412_v28 = vpack.c.bf16 %v1403_v27, %v1402_v26 }
 0x27e   :  { %2727 = vmatmul.msk.bf16.gmra.mxu1 %vm51_vm5, %v1410_v16 }
 0x28e   :  { %2728 = vmatmul.msk.bf16.gmra.mxu1 %vm51_vm5, %v1411_v59 }
 0x29e   :  { %2729 = vmatmul.msk.bf16.gmra.mxu1 %vm51_vm5, %v1412_v28 }
 0x2db   :  { %v4499_v30 = vpop.f32.mrf.mxu1 }
 0x2dc   :  { %v1502_v40 = vmul.f32 %v4499_v30, %v4499_v30  ;;  %v1476_v45 = vsel %vm38_vm3, %v4499_v30, 0.0 }
 0x2de   :  { %v1512_v49 = vsel %vm38_vm3, %v1502_v40, 0.0 }
 0x2e3   :  { %v4501_v23 = vpop.f32.mrf.mxu1 }
 0x2e4   :  { %v1503_v39 = vmul.f32 %v4501_v23, %v4501_v23  ;;  %v1477_v41 = vsel %vm38_vm3, %v4501_v23, 0.0 }
 0x2e5   :  { %v1478_v48 = vadd.f32 %v1477_v41, %v1476_v45 }
 0x2e6   :  { %v1513_v46 = vsel %vm38_vm3, %v1503_v39, 0.0 }
 0x2e7   :  { %v1514_v57 = vadd.f32 %v1513_v46, %v1512_v49 }
 0x2eb   :  { %v4503_v31 = vpop.f32.mrf.mxu1 }
 0x2ec   :  { %v1504_v42 = vmul.f32 %v4503_v31, %v4503_v31  ;;  %v1479_v29 = vsel %vm38_vm3, %v4503_v31, 0.0 }
 0x2ed   :  { %v1480_v58 = vadd.f32 %v1479_v29, %v1478_v48 }
 0x2ee   :  { %v1515_v51 = vsel %vm38_vm3, %v1504_v42, 0.0 }
 0x2ef   :  { %v1516_v63 = vadd.f32 %v1515_v51, %v1514_v57 }
 0x2f3   :  { %v4505_v32 = vpop.f32.mrf.mxu1 }
 0x2f4   :  { %v1505_v47 = vmul.f32 %v4505_v32, %v4505_v32  ;;  %v1481_v53 = vsel %vm38_vm3, %v4505_v32, 0.0 }
 0x2f5   :  { %v1482_v16 = vadd.f32 %v1481_v53, %v1480_v58 }
 0x2f6   :  { %v1517_v50 = vsel %vm38_vm3, %v1505_v47, 0.0 }
 0x2f7   :  { %v1518_v2 = vadd.f32 %v1517_v50, %v1516_v63  ;;  %v1474_v63 = vld [vmem:[%s4892_s2 + $0x2] sm:$0x1] }
 0x2fb   :  { %v4507_v33 = vpop.f32.mrf.mxu1 }
 0x2fc   :  { %v1506_v54 = vmul.f32 %v4507_v33, %v4507_v33  ;;  %v1483_v56 = vsel %vm38_vm3, %v4507_v33, 0.0 }
 0x2fd   :  { %v1484_v4 = vadd.f32 %v1483_v56, %v1482_v16 }
 0x2fe   :  { %v1519_v0 = vsel %vm38_vm3, %v1506_v54, 0.0 }
 0x2ff   :  { %v1520_v55 = vadd.f32 %v1519_v0, %v1518_v2 }
 0x303   :  { %v4510_v13 = vpop.f32.mrf.mxu1 }
 0x304   :  { %v1507_v60 = vmul.f32 %v4510_v13, %v4510_v13  ;;  %v1485_v18 = vsel %vm38_vm3, %v4510_v13, 0.0 }
 0x305   :  { %v1486_v36 = vadd.f32 %v1485_v18, %v1484_v4 }
 0x306   :  { %v1521_v17 = vsel %vm38_vm3, %v1507_v60, 0.0 }
 0x307   :  { %v1522_v7 = vadd.f32 %v1521_v17, %v1520_v55 }
 0x30b   :  { %v4512_v34 = vpop.f32.mrf.mxu1 }
 0x30c   :  { %v1508_v1 = vmul.f32 %v4512_v34, %v4512_v34  ;;  %v1487_v20 = vsel %vm38_vm3, %v4512_v34, 0.0 }
 0x30d   :  { %v1488_v19 = vadd.f32 %v1487_v20, %v1486_v36 }
 0x30e   :  { %v1523_v44 = vsel %vm38_vm3, %v1508_v1, 0.0  ;;  %v1475_v1 = vld [vmem:[%s4892_s2 + $0x3] sm:$0x1] }
 0x30f   :  { %v1524_v3 = vadd.f32 %v1523_v44, %v1522_v7 }
 0x313   :  { %v4522_v43 = vpop.f32.mrf.mxu1 }
 0x314   :  { %v1509_v37 = vmul.f32 %v4522_v43, %v4522_v43  ;;  %v1489_v52 = vsel %vm38_vm3, %v4522_v43, 0.0 }
 0x315   :  { %v1490_v9 = vadd.f32 %v1489_v52, %v1488_v19 }
 0x316   :  { %v1525_v8 = vsel %vm38_vm3, %v1509_v37, 0.0 }
 0x317   :  { %v1526_v10 = vadd.f32 %v1525_v8, %v1524_v3 }
 0x31b   :  { %v1469_v5 = vpop.f32.mrf.mxu1 }
 0x31c   :  { %v1510_v6 = vmul.f32 %v1469_v5, %v1469_v5  ;;  %v1491_v59 = vsel %vm38_vm3, %v1469_v5, 0.0 }
 0x31d   :  { %v1492_v61 = vadd.f32 %v1491_v59, %v1490_v9 }
 0x31e   :  { %v1527_v38 = vsel %vm38_vm3, %v1510_v6, 0.0 }
 0x31f   :  { %v1528_v12 = vadd.f32 %v1527_v38, %v1526_v10 }
 0x323   :  { %v1471_v62 = vpop.f32.mrf.mxu1 }
 0x324   :  { %v1493_v22 = vsel %vm38_vm3, %v1471_v62, 0.0  ;;  %v1511_v11 = vmul.f32 %v1471_v62, %v1471_v62 }
 0x325   :  { %v1494_v24 = vadd.f32 %v1493_v22, %v1492_v61 }
 0x326   :  { %v1529_v21 = vsel %vm38_vm3, %v1511_v11, 0.0 }
 0x327   :  { %v1495_v14 = vrot.slane %v1494_v24, 4  ;;  %v1530_v15 = vadd.f32 %v1529_v21, %v1528_v12 }
 0x329   :  { %v1496_v25 = vadd.f32 %v1495_v14, %v1494_v24  ;;  %v1531_v26 = vrot.slane %v1530_v15, 4 }
 0x32b   :  { %v1497_v27 = vrot.slane %v1496_v25, 2  ;;  %v1532_v28 = vadd.f32 %v1531_v26, %v1530_v15 }
 0x32d   :  { %v1498_v39 = vadd.f32 %v1497_v27, %v1496_v25  ;;  %v1533_v40 = vrot.slane %v1532_v28, 2 }
 0x32f   :  { %v1499_v41 = vrot.slane %v1498_v39, 1  ;;  %v1534_v42 = vadd.f32 %v1533_v40, %v1532_v28 }
 0x331   :  { %v1500_v45 = vadd.f32 %v1499_v41, %v1498_v39  ;;  %v1535_v46 = vrot.slane %v1534_v42, 1 }
 0x333   :  { %v1501_v29 = vmul.f32 0.0125, %v1500_v45  ;;  %v1536_v47 = vadd.f32 %v1535_v46, %v1534_v42 }
 0x335   :  { %v1537_v48 = vmul.f32 0.0125, %v1536_v47  ;;  %v1538_v49 = vmul.f32 %v1501_v29, %v1501_v29 }
 0x337   :  { %v1539_v51 = vsub.f32 %v1537_v48, %v1538_v49 }
 0x339   :  { %v1540_v53 = vmax.f32 %v1539_v51, 0.0 }
 0x33b   :  { %v1541_v54 = vadd.f32 1e-05, %v1540_v53 }
 0x33d   :  { %3460 = vrsqrt.f32 %v1541_v54  ;;  %vm1548_vm7 = vweird.f32 %v1541_v54 }
 0x343   :  { %v3461_v57 = vpop.eup %3460 }
 0x344   :  { %v1543_v58 = vmul.f32 %v3461_v57, %v1541_v54  ;;  %vm1549_vm6 = vweird.f32 %v3461_v57 }
 0x345   :  { %vm1550_vm8 = vmor %vm1548_vm7, %vm1549_vm6  ;;  %vm1803_vm6 = vcmask 523264   ;;  %vm1758_vm7 = vcmask 1043456  }
 0x346   :  { %v1544_v50 = vmul.f32 %v3461_v57, %v1543_v58 }
 0x348   :  { %v1545_v56 = vmul.f32 0.5, %v1544_v50 }
 0x34a   :  { %v1546_v60 = vsub.f32 1.5, %v1545_v56 }
 0x34c   :  { %v1547_v16 = vmul.f32 %v3461_v57, %v1546_v60 }
 0x34e   :  { %v1551_v0 = vsel %vm1550_vm8, %v3461_v57, %v1547_v16  ;;  %vm57_vm8 = vcmask 257024  }
 0x34f   :  { %v1552_v18 = vmul.f32 %v1551_v0, %v1474_v63  ;;  %58 = vst.msk [vmem:[#allocation4 + $0x28] sm:$0xf] %vm57_vm8, %v3476_v35 }
 0x351   :  { %v1553_v2 = vmul.f32 %v1552_v18, %v1501_v29  ;;  %v1555_v4 = vperm.slane %v1552_v18, 0 }
 0x353   :  { %v1554_v17 = vsub.f32 %v1475_v1, %v1553_v2  ;;  %v1563_v20 = vmul.f32 %v1555_v4, %v4522_v43  ;;  %v1564_v37 = vmul.f32 %v1555_v4, %v1469_v5  ;;  %v1565_v55 = vmul.f32 %v1555_v4, %v1471_v62 }
 0x354   :  { %v1556_v44 = vmul.f32 %v1555_v4, %v4499_v30  ;;  %v1557_v52 = vmul.f32 %v1555_v4, %v4501_v23  ;;  %v1558_v6 = vmul.f32 %v1555_v4, %v4503_v31  ;;  %v1559_v7 = vmul.f32 %v1555_v4, %v4505_v32 }
 0x355   :  { %v1566_v36 = vperm.slane %v1554_v17, 0  ;;  %v1560_v19 = vmul.f32 %v1555_v4, %v4507_v33  ;;  %v1561_v8 = vmul.f32 %v1555_v4, %v4510_v13  ;;  %v1562_v59 = vmul.f32 %v1555_v4, %v4512_v34 }
 0x357   :  { %v1574_v3 = vadd.f32 %v1566_v36, %v1563_v20  ;;  %v1575_v9 = vadd.f32 %v1566_v36, %v1564_v37  ;;  %v1576_v43 = vadd.f32 %v1566_v36, %v1565_v55  ;;  %v1567_v5 = vadd.f32 %v1566_v36, %v1556_v44  ;;  %v2948_v55 = vld [vmem:[%s4891_s1 + $0x38] sm:$0xff]  ;;  %v2946_v44 = vld [vmem:[%s4891_s1 + $0x28] sm:$0xff] }
 0x358   :  { %v1568_v38 = vadd.f32 %v1566_v36, %v1557_v52  ;;  %v1569_v10 = vadd.f32 %v1566_v36, %v1558_v6  ;;  %v1570_v61 = vadd.f32 %v1566_v36, %v1559_v7  ;;  %v1571_v30 = vadd.f32 %v1566_v36, %v1560_v19  ;;  %1817 = vmatpush.bf16.msra.mxu2 %v2948_v55  ;;  %v2945_v52 = vld [vmem:[%s4891_s1 + $0x20] sm:$0xff] }
 0x359   :  { %vm1584_vm9 = vcmp.ge.f32.partialorder %v1574_v3, 0.0  ;;  %vm1585_vm10 = vcmp.ge.f32.partialorder %v1575_v9, 0.0  ;;  %vm1586_vm11 = vcmp.ge.f32.partialorder %v1576_v43, 0.0  ;;  %v1594_v23 = vmul.f32 0.01, %v1574_v3 }
 0x35a   :  { %v1595_v31 = vmul.f32 0.01, %v1575_v9  ;;  %v1596_v32 = vmul.f32 0.01, %v1576_v43  ;;  %vm1577_vm12 = vcmp.ge.f32.partialorder %v1567_v5, 0.0  ;;  %vm1578_vm13 = vcmp.ge.f32.partialorder %v1568_v38, 0.0 }
 0x35b   :  { %v1604_v33 = vsel %vm1584_vm9, %v1574_v3, %v1594_v23  ;;  %vm1579_vm14 = vcmp.ge.f32.partialorder %v1569_v10, 0.0  ;;  %vm1580_vm15 = vcmp.ge.f32.partialorder %v1570_v61, 0.0  ;;  %vm1581_vm0 = vcmp.ge.f32.partialorder %v1571_v30, 0.0 }
 0x35c   :  { %v1605_v13 = vsel %vm1585_vm10, %v1575_v9, %v1595_v31  ;;  %v1606_v34 = vsel %vm1586_vm11, %v1576_v43, %v1596_v32  ;;  %1614 = vst.msk [vmem:[#allocation3 + $0x3b] sm:$0xff] %vm38_vm3, %v1604_v33  ;;  %v1587_v62 = vmul.f32 0.01, %v1567_v5  ;;  %v1588_v22 = vmul.f32 0.01, %v1568_v38 }
 0x35d   :  { %1615 = vst.msk [vmem:[#allocation3 + $0x43] sm:$0xff] %vm38_vm3, %v1605_v13  ;;  %v1589_v11 = vmul.f32 0.01, %v1569_v10  ;;  %v1590_v12 = vmul.f32 0.01, %v1570_v61  ;;  %v1572_v24 = vadd.f32 %v1566_v36, %v1561_v8  ;;  %v1573_v21 = vadd.f32 %v1566_v36, %v1562_v59  ;;  %v2947_v36 = vld [vmem:[%s4891_s1 + $0x30] sm:$0xff] }
 0x35e   :  { %1616 = vst.msk [vmem:[#allocation3 + $0x4b] sm:$0xff] %vm38_vm3, %v1606_v34  ;;  %v1591_v14 = vmul.f32 0.01, %v1571_v30  ;;  %v1597_v15 = vsel %vm1577_vm12, %v1567_v5, %v1587_v62  ;;  %v1598_v25 = vsel %vm1578_vm13, %v1568_v38, %v1588_v22  ;;  %1818 = vmatpush.bf16.msra.mxu2 %v2947_v36 }
 0x35f   :  { %v1599_v26 = vsel %vm1579_vm14, %v1569_v10, %v1589_v11  ;;  %v1600_v27 = vsel %vm1580_vm15, %v1570_v61, %v1590_v12  ;;  %1607 = vst.msk [vmem:[#allocation3 + $0x1] sm:$0xff] %vm38_vm3, %v1597_v15  ;;  %vm1582_vm1 = vcmp.ge.f32.partialorder %v1572_v24, 0.0  ;;  %vm1583_vm4 = vcmp.ge.f32.partialorder %v1573_v21, 0.0 }
 0x360   :  { %v1601_v28 = vsel %vm1581_vm0, %v1571_v30, %v1591_v14  ;;  %1608 = vst.msk [vmem:[#allocation3 + $0x9] sm:$0xff] %vm38_vm3, %v1598_v25  ;;  %v1592_v39 = vmul.f32 0.01, %v1572_v24  ;;  %v1593_v40 = vmul.f32 0.01, %v1573_v21  ;;  %vm1922_vm0 = vcmask 261124  }
 0x361   :  { %1609 = vst.msk [vmem:[#allocation3 + $0x11] sm:$0xff] %vm38_vm3, %v1599_v26 }
 0x362   :  { %1610 = vst.msk [vmem:[#allocation3 + $0x19] sm:$0xff] %vm38_vm3, %v1600_v27  ;;  %v1602_v41 = vsel %vm1582_vm1, %v1572_v24, %v1592_v39  ;;  %v1603_v42 = vsel %vm1583_vm4, %v1573_v21, %v1593_v40  ;;  %1819 = vmatpush.bf16.msra.mxu2 %v2946_v44  ;;  %vm1969_vm1 = vcmask 785408   ;;  %vm2020_vm4 = vcmask 1041408  }
 0x363   :  { %1611 = vst.msk [vmem:[#allocation3 + $0x21] sm:$0xff] %vm38_vm3, %v1601_v28 }
 0x364   :  { %1612 = vst.msk [vmem:[#allocation3 + $0x2b] sm:$0xff] %vm38_vm3, %v1602_v41  ;;  %v1701_v57 = vld [vmem:[#allocation3 + $0x3c] ss:$2 sm:$0xff]  ;;  %v1695_v56 = vld [vmem:[#allocation3 + $0x3b] ss:$2 sm:$0xff] }
 0x365   :  { %1613 = vst.msk [vmem:[#allocation3 + $0x33] sm:$0xff] %vm38_vm3, %v1603_v42  ;;  %v1707_v18 = vld [vmem:[#allocation3 + $0x3d] ss:$2 sm:$0xff]  ;;  %v1703_v17 = vld [vmem:[#allocation3 + $0x4c] ss:$2 sm:$0xf] }
 0x366   :  { %v1697_v20 = vld [vmem:[#allocation3 + $0x4b] ss:$2 sm:$0xf]  ;;  %1820 = vmatpush.bf16.msra.mxu2 %v2945_v52 }
 0x367   :  { %v1629_v45 = vld [vmem:[#allocation3 + $0x2] ss:$2 sm:$0xff]  ;;  %v1623_v46 = vld [vmem:[#allocation3 + $0x1] ss:$2 sm:$0xff] }
 0x368   :  { %v1635_v29 = vld [vmem:[#allocation3 + $0x3] ss:$2 sm:$0xff]  ;;  %v1617_v5 = vld [vmem:[#allocation3] ss:$2 sm:$0xff] }
 0x369   :  { %v1631_v47 = vld [vmem:[#allocation3 + $0x12] ss:$2 sm:$0xff]  ;;  %v1625_v48 = vld [vmem:[#allocation3 + $0x11] ss:$2 sm:$0xff] }
 0x36a   :  { %v1637_v49 = vld [vmem:[#allocation3 + $0x13] ss:$2 sm:$0xff]  ;;  %v3390_v51 = vpack.i.bf16 %v1631_v47, %v1629_v45  ;;  %v3385_v53 = vpack.i.bf16 %v1625_v48, %v1623_v46  ;;  %v1633_v2 = vld [vmem:[#allocation3 + $0x22] ss:$2 sm:$0xf] }
 0x36b   :  { %v3395_v54 = vpack.i.bf16 %v1637_v49, %v1635_v29  ;;  %v1627_v16 = vld [vmem:[#allocation3 + $0x21] ss:$2 sm:$0xf]  ;;  %v1709_v37 = vld [vmem:[#allocation3 + $0x4d] ss:$2 sm:$0xf] }
 0x36c   :  { %3391 = vrot.lane.b32.xlu1 %v3390_v51, %s3477_s30  ;;  %3386 = vrot.lane.b32.xlu0 %v3385_v53, %s3474_s13  ;;  %v1699_v58 = vld [vmem:[#allocation3 + $0x2c] ss:$2 sm:$0xff]  ;;  %v1693_v50 = vld [vmem:[#allocation3 + $0x2b] ss:$2 sm:$0xff] }
 0x36d   :  { %3396 = vrot.lane.b32.xlu2 %v3395_v54, %s3478_s4  ;;  %v3405_v60 = vpack.i.bf16 %v1701_v57, %v1699_v58  ;;  %v3400_v63 = vpack.i.bf16 %v1695_v56, %v1693_v50  ;;  %v1705_v0 = vld [vmem:[#allocation3 + $0x2d] ss:$2 sm:$0xff]  ;;  %v1639_v4 = vld [vmem:[#allocation3 + $0x23] ss:$2 sm:$0xf] }
 0x36e   :  { %v3410_v1 = vpack.i.bf16 %v1707_v18, %v1705_v0  ;;  %v1619_v43 = vld [vmem:[#allocation3 + $0x10] ss:$2 sm:$0xff]  ;;  %v1621_v27 = vld [vmem:[#allocation3 + $0x20] ss:$2 sm:$0xf] }
 0x36f   :  { %v1687_v14 = vld [vmem:[#allocation3 + $0x2a] ss:$2 sm:$0xff]  ;;  %v1689_v15 = vld [vmem:[#allocation3 + $0x3a] ss:$2 sm:$0xff] }
 0x374   :  { %3406 = vrot.lane.b32.xlu1 %v3405_v60, %s3477_s30  ;;  %3401 = vrot.lane.b32.xlu0 %v3400_v63, %s3474_s13  ;;  %v1691_v60 = vld [vmem:[#allocation3 + $0x4a] ss:$2 sm:$0xf] }
 0x375   :  { %1647 = vrot.lane.b32.xlu2 %v1627_v16, %s3474_s13 }
 0x37c   :  { %1659 = vrot.lane.b32.xlu1 %v1633_v2, %s3477_s30  ;;  %3411 = vrot.lane.b32.xlu0 %v3410_v1, %s3478_s4 }
 0x37d   :  { %1671 = vrot.lane.b32.xlu2 %v1639_v4, %s3478_s4 }
 0x384   :  { %1729 = vrot.lane.b32.xlu1 %v1703_v17, %s3477_s30  ;;  %1717 = vrot.lane.b32.xlu0 %v1697_v20, %s3474_s13 }
 0x385   :  { %1741 = vrot.lane.b32.xlu2 %v1709_v37, %s3478_s4 }
 0x3c7   :  { %v3397_v6 = vpop.permute.xlu2 %3396 }
 0x3c8   :  { %v3399_v38 = vunpack.i.h.bf16 %v3397_v6  ;;  %v3398_v10 = vunpack.i.l.bf16 %v3397_v6 }
 0x3cf   :  { %v1648_v34 = vpop.permute.xlu2 %1647 }
 0x3d0   :  { %v1678_v40 = vsel %vm38_vm3, %v1621_v27, %v1648_v34 }
 0x3d7   :  { %v1672_v45 = vpop.permute.xlu2 %1671 }
 0x3de   :  { %v3392_v7 = vpop.permute.xlu1 %3391  ;;  %v3387_v19 = vpop.permute.xlu0 %3386 }
 0x3df   :  { %v3394_v8 = vunpack.i.h.bf16 %v3392_v7  ;;  %v3393_v59 = vunpack.i.l.bf16 %v3392_v7  ;;  %v3389_v3 = vunpack.i.h.bf16 %v3387_v19  ;;  %v3388_v9 = vunpack.i.l.bf16 %v3387_v19  ;;  %v1742_v18 = vpop.permute.xlu2 %1741 }
 0x3e1   :  { %v1677_v61 = vsel %vm38_vm3, %v1619_v43, %v3389_v3  ;;  %v1676_v30 = vsel %vm38_vm3, %v1617_v5, %v3388_v9 }
 0x3e2   :  { %v1679_v23 = vsel %vm51_vm5, %v1676_v30, %v3393_v59  ;;  %v1680_v31 = vsel %vm51_vm5, %v1677_v61, %v3394_v8 }
 0x3e3   :  { %v1683_v32 = vsel %vm1682_vm2, %v1679_v23, %v3398_v10  ;;  %v1684_v33 = vsel %vm1682_vm2, %v1680_v31, %v3399_v38 }
 0x3e4   :  { %v1776_v13 = vpack.c.bf16 %v1684_v33, %v1683_v32 }
 0x3e6   :  { %v3407_v62 = vpop.permute.xlu1 %3406  ;;  %v3402_v22 = vpop.permute.xlu0 %3401  ;;  %2746 = vmatmul.msk.bf16.vlgmr.msra.gmra.mxu2 %vm1803_vm6, %v1776_v13 }
 0x3e7   :  { %v3404_v11 = vunpack.i.h.bf16 %v3402_v22  ;;  %v3403_v12 = vunpack.i.l.bf16 %v3402_v22  ;;  %v3409_v24 = vunpack.i.h.bf16 %v3407_v62  ;;  %v3408_v21 = vunpack.i.l.bf16 %v3407_v62 }
 0x3e9   :  { %v1747_v25 = vsel %vm38_vm3, %v1689_v15, %v3404_v11  ;;  %v1746_v26 = vsel %vm38_vm3, %v1687_v14, %v3403_v12 }
 0x3ea   :  { %v1749_v29 = vsel %vm51_vm5, %v1746_v26, %v3408_v21  ;;  %v1750_v47 = vsel %vm51_vm5, %v1747_v25, %v3409_v24 }
 0x3ee   :  { %v1660_v28 = vpop.permute.xlu1 %1659  ;;  %v3412_v39 = vpop.permute.xlu0 %3411 }
 0x3ef   :  { %v3414_v41 = vunpack.i.h.bf16 %v3412_v39  ;;  %v3413_v42 = vunpack.i.l.bf16 %v3412_v39  ;;  %v1681_v46 = vsel %vm51_vm5, %v1678_v40, %v1660_v28 }
 0x3f0   :  { %v1685_v54 = vsel %vm1682_vm2, %v1681_v46, %v1672_v45 }
 0x3f1   :  { %v1752_v48 = vsel %vm1682_vm2, %v1749_v29, %v3413_v42  ;;  %v1753_v49 = vsel %vm1682_vm2, %v1750_v47, %v3414_v41 }
 0x3f2   :  { %v1759_v51 = vrot.slane %v1752_v48, 4  ;;  %v1760_v53 = vrot.slane %v1753_v49, 4 }
 0x3f4   :  { %v1761_v57 = vsel %vm1758_vm7, %v1759_v51, %v1760_v53  ;;  %v1767_v58 = vsel %vm1758_vm7, %v1685_v54, %v1759_v51 }
 0x3f5   :  { %v1777_v50 = vpack.c.bf16 %v1761_v57, %v1767_v58  ;;  %v1836_v58 = vld [vmem:[%s4892_s2 + $0x4] sm:$0x1] }
 0x3f6   :  { %v1730_v56 = vpop.permute.xlu1 %1729  ;;  %v1718_v63 = vpop.permute.xlu0 %1717 }
 0x3f7   :  { %v1748_v16 = vsel %vm38_vm3, %v1691_v60, %v1718_v63  ;;  %2747 = vmatmul.msk.bf16.gmra.mxu2 %vm1803_vm6, %v1777_v50  ;;  %v1837_v63 = vld [vmem:[%s4892_s2 + $0x5] sm:$0x1] }
 0x3f8   :  { %v1751_v0 = vsel %vm51_vm5, %v1748_v16, %v1730_v56 }
 0x3f9   :  { %v1754_v1 = vsel %vm1682_vm2, %v1751_v0, %v1742_v18  ;;  %vm2116_vm2 = vcmask 519168  }
 0x3fa   :  { %v1762_v2 = vrot.slane %v1754_v1, 4 }
 0x3fc   :  { %v1763_v4 = vsel %vm1758_vm7, %v1760_v53, %v1762_v2 }
 0x3fd   :  { %v1778_v17 = vpack.c.bf16 %v1763_v4, %v1763_v4 }
 0x407   :  { %2748 = vmatmul.msk.bf16.gmra.mxu2 %vm1803_vm6, %v1778_v17 }
 0x469   :  { %v4635_v20 = vpop.f32.mrf.mxu2 }
 0x46a   :  { %v1854_v52 = vmul.f32 %v4635_v20, %v4635_v20  ;;  %v1838_v7 = vsel %vm51_vm5, %v4635_v20, 0.0 }
 0x46c   :  { %v1859_v9 = vsel %vm51_vm5, %v1854_v52, 0.0 }
 0x471   :  { %v4637_v37 = vpop.f32.mrf.mxu2 }
 0x472   :  { %v1855_v36 = vmul.f32 %v4637_v37, %v4637_v37  ;;  %v1839_v6 = vsel %vm51_vm5, %v4637_v37, 0.0 }
 0x473   :  { %v1840_v3 = vadd.f32 %v1839_v6, %v1838_v7 }
 0x474   :  { %v1860_v19 = vsel %vm51_vm5, %v1855_v36, 0.0 }
 0x475   :  { %v1861_v38 = vadd.f32 %v1860_v19, %v1859_v9 }
 0x47a   :  { %v4639_v55 = vpop.f32.mrf.mxu2 }
 0x47b   :  { %v1856_v35 = vmul.f32 %v4639_v55, %v4639_v55  ;;  %v1841_v8 = vsel %vm51_vm5, %v4639_v55, 0.0 }
 0x47c   :  { %v1842_v10 = vadd.f32 %v1841_v8, %v1840_v3 }
 0x47d   :  { %v1862_v43 = vsel %vm51_vm5, %v1856_v35, 0.0 }
 0x47e   :  { %v1863_v30 = vadd.f32 %v1862_v43, %v1861_v38 }
 0x482   :  { %v4643_v44 = vpop.f32.mrf.mxu2 }
 0x483   :  { %v1857_v59 = vmul.f32 %v4643_v44, %v4643_v44  ;;  %v1843_v5 = vsel %vm51_vm5, %v4643_v44, 0.0 }
 0x484   :  { %v1844_v23 = vadd.f32 %v1843_v5, %v1842_v10 }
 0x485   :  { %v1864_v61 = vsel %vm51_vm5, %v1857_v59, 0.0 }
 0x486   :  { %v1865_v13 = vadd.f32 %v1864_v61, %v1863_v30 }
 0x48a   :  { %v1832_v31 = vpop.f32.mrf.mxu2 }
 0x48b   :  { %v1845_v32 = vsel %vm51_vm5, %v1832_v31, 0.0  ;;  %v1858_v33 = vmul.f32 %v1832_v31, %v1832_v31 }
 0x48c   :  { %v1846_v34 = vadd.f32 %v1845_v32, %v1844_v23 }
 0x48d   :  { %v1866_v62 = vsel %vm51_vm5, %v1858_v33, 0.0 }
 0x48e   :  { %v1847_v22 = vrot.slane %v1846_v34, 4  ;;  %v1867_v11 = vadd.f32 %v1866_v62, %v1865_v13 }
 0x490   :  { %v1848_v12 = vadd.f32 %v1847_v22, %v1846_v34  ;;  %v1868_v24 = vrot.slane %v1867_v11, 4 }
 0x492   :  { %v1849_v21 = vrot.slane %v1848_v12, 2  ;;  %v1869_v14 = vadd.f32 %v1868_v24, %v1867_v11  ;;  %v1834_v15 = vpop.f32.mrf.mxu2 }
 0x493   :  { %v2955_v15 = vld [vmem:[%s4891_s1 + $0x70] sm:$0xff] }
 0x494   :  { %v1850_v25 = vadd.f32 %v1849_v21, %v1848_v12  ;;  %v1870_v26 = vrot.slane %v1869_v14, 2 }
 0x496   :  { %v1851_v27 = vrot.slane %v1850_v25, 1  ;;  %v1871_v28 = vadd.f32 %v1870_v26, %v1869_v14  ;;  %v2956_v14 = vld [vmem:[%s4891_s1 + $0x78] sm:$0xff]  ;;  %v2953_v26 = vld [vmem:[%s4891_s1 + $0x60] sm:$0xff] }
 0x497   :  { %2093 = vmatpush.bf16.msra.mxu3 %v2956_v14 }
 0x498   :  { %v1852_v39 = vadd.f32 %v1851_v27, %v1850_v25  ;;  %v1872_v40 = vrot.slane %v1871_v28, 1  ;;  %v2954_v25 = vld [vmem:[%s4891_s1 + $0x68] sm:$0xff]  ;;  %v2952_v27 = vld [vmem:[%s4891_s1 + $0x58] sm:$0xff] }
 0x49a   :  { %v1853_v41 = vmul.f32 0.025, %v1852_v39  ;;  %v1873_v42 = vadd.f32 %v1872_v40, %v1871_v28  ;;  %v2951_v28 = vld [vmem:[%s4891_s1 + $0x50] sm:$0xff]  ;;  %v2950_v39 = vld [vmem:[%s4891_s1 + $0x48] sm:$0xff]  ;;  %v2949_v40 = vld [vmem:[%s4891_s1 + $0x40] sm:$0xff] }
 0x49b   :  { %2094 = vmatpush.bf16.msra.mxu3 %v2955_v15 }
 0x49c   :  { %v1874_v45 = vmul.f32 0.025, %v1873_v42  ;;  %v1875_v46 = vmul.f32 %v1853_v41, %v1853_v41 }
 0x49e   :  { %v1876_v29 = vsub.f32 %v1874_v45, %v1875_v46 }
 0x49f   :  { %2095 = vmatpush.bf16.msra.mxu3 %v2954_v25 }
 0x4a0   :  { %v1877_v47 = vmax.f32 %v1876_v29, 0.0 }
 0x4a2   :  { %v1878_v48 = vadd.f32 1e-05, %v1877_v47 }
 0x4a3   :  { %2096 = vmatpush.bf16.msra.mxu3 %v2953_v26 }
 0x4a4   :  { %3462 = vrsqrt.f32 %v1878_v48  ;;  %vm1885_vm9 = vweird.f32 %v1878_v48 }
 0x4a7   :  { %2097 = vmatpush.bf16.msra.mxu3 %v2952_v27 }
 0x4aa   :  { %v3463_v49 = vpop.eup %3462 }
 0x4ab   :  { %v1880_v51 = vmul.f32 %v3463_v49, %v1878_v48  ;;  %vm1886_vm3 = vweird.f32 %v3463_v49  ;;  %2098 = vmatpush.bf16.msra.mxu3 %v2951_v28 }
 0x4ac   :  { %vm1887_vm10 = vmor %vm1885_vm9, %vm1886_vm3 }
 0x4ad   :  { %v1881_v53 = vmul.f32 %v3463_v49, %v1880_v51 }
 0x4af   :  { %v1882_v54 = vmul.f32 0.5, %v1881_v53  ;;  %2099 = vmatpush.bf16.msra.mxu3 %v2950_v39 }
 0x4b1   :  { %v1883_v57 = vsub.f32 1.5, %v1882_v54 }
 0x4b3   :  { %v1884_v50 = vmul.f32 %v3463_v49, %v1883_v57  ;;  %2100 = vmatpush.bf16.msra.mxu3 %v2949_v40 }
 0x4b5   :  { %v1888_v56 = vsel %vm1887_vm10, %v3463_v49, %v1884_v50 }
 0x4b6   :  { %v1889_v60 = vmul.f32 %v1888_v56, %v1836_v58 }
 0x4b8   :  { %v1890_v16 = vmul.f32 %v1889_v60, %v1853_v41  ;;  %v1892_v0 = vperm.slane %v1889_v60, 0 }
 0x4ba   :  { %v1891_v18 = vsub.f32 %v1837_v63, %v1890_v16  ;;  %v1893_v1 = vmul.f32 %v1892_v0, %v4635_v20  ;;  %v1894_v2 = vmul.f32 %v1892_v0, %v4637_v37  ;;  %v1895_v4 = vmul.f32 %v1892_v0, %v4639_v55 }
 0x4bb   :  { %v1896_v17 = vmul.f32 %v1892_v0, %v4643_v44  ;;  %v1897_v52 = vmul.f32 %v1892_v0, %v1832_v31 }
 0x4bc   :  { %v1898_v36 = vperm.slane %v1891_v18, 0 }
 0x4be   :  { %v1899_v6 = vadd.f32 %v1898_v36, %v1893_v1  ;;  %v1900_v35 = vadd.f32 %v1898_v36, %v1894_v2  ;;  %v1901_v7 = vadd.f32 %v1898_v36, %v1895_v4  ;;  %v1902_v19 = vadd.f32 %v1898_v36, %v1896_v17 }
 0x4bf   :  { %v1903_v8 = vadd.f32 %v1898_v36, %v1897_v52 }
 0x4c0   :  { %vm1904_vm11 = vcmp.ge.f32.partialorder %v1899_v6, 0.0  ;;  %vm1906_vm12 = vcmp.ge.f32.partialorder %v1901_v7, 0.0  ;;  %vm1907_vm13 = vcmp.ge.f32.partialorder %v1902_v19, 0.0  ;;  %v1909_v59 = vmul.f32 0.01, %v1899_v6 }
 0x4c1   :  { %vm1908_vm14 = vcmp.ge.f32.partialorder %v1903_v8, 0.0  ;;  %v1910_v3 = vmul.f32 0.01, %v1900_v35  ;;  %v1911_v20 = vmul.f32 0.01, %v1901_v7  ;;  %vm1905_vm15 = vcmp.ge.f32.partialorder %v1900_v35, 0.0 }
 0x4c2   :  { %v1912_v9 = vmul.f32 0.01, %v1902_v19  ;;  %v1913_v37 = vmul.f32 0.01, %v1903_v8  ;;  %v1914_v55 = vsel %vm1904_vm11, %v1899_v6, %v1909_v59  ;;  %vm2176_vm11 = vcmask 517120  }
 0x4c3   :  { %v1916_v44 = vsel %vm1906_vm12, %v1901_v7, %v1911_v20  ;;  %1919 = vst.msk [vmem:[#allocation4 + $0x1] sm:$0xff] %vm51_vm5, %v1914_v55  ;;  %v1915_v38 = vsel %vm1905_vm15, %v1900_v35, %v1910_v3  ;;  %vm2178_vm12 = vcmask 523266  }
 0x4c4   :  { %v1917_v43 = vsel %vm1907_vm13, %v1902_v19, %v1912_v9  ;;  %v1918_v5 = vsel %vm1908_vm14, %v1903_v8, %v1913_v37  ;;  %1921 = vst.msk [vmem:[#allocation4 + $0x11] sm:$0xf] %vm57_vm8, %v1916_v44  ;;  %vm2266_vm13 = vcmask 1040384  }
 0x4c5   :  { %1923 = vst.msk [vmem:[#allocation4 + $0x13] sm:$0xf0] %vm1922_vm0, %v1916_v44  ;;  %vm2693_vm0 = vcmask 1024  }
 0x4c6   :  { %1924 = vst.msk [vmem:[#allocation4 + $0x1b] sm:$0xff] %vm51_vm5, %v1917_v43 }
 0x4c7   :  { %1925 = vst.msk [vmem:[#allocation4 + $0x23] sm:$0xff] %vm51_vm5, %v1918_v5 }
 0x4c8   :  { %1920 = vst.msk [vmem:[#allocation4 + $0x9] sm:$0xff] %vm51_vm5, %v1915_v38 }
 0x4cb   :  { %v1940_v10 = vld [vmem:[#allocation4 + $0x13] ss:$2 sm:$0x3]  ;;  %v1936_v61 = vld [vmem:[#allocation4 + $0x12] ss:$2 sm:$0x3] }
 0x4cc   :  { %v1932_v30 = vld [vmem:[#allocation4 + $0x11] ss:$2 sm:$0x3] }
 0x4ce   :  { %v1985_v23 = vld [vmem:[#allocation4 + $0x19] ss:$2 sm:$0xff]  ;;  %v1981_v31 = vld [vmem:[#allocation4 + $0x18] ss:$2 sm:$0xff] }
 0x4cf   :  { %v1977_v32 = vld [vmem:[#allocation4 + $0x17] ss:$2 sm:$0xff]  ;;  %v3425_v33 = vpack.i.bf16 %v1940_v10, %v1985_v23  ;;  %v3420_v13 = vpack.i.bf16 %v1936_v61, %v1981_v31  ;;  %v1934_v22 = vld [vmem:[#allocation4 + $0x2] ss:$2 sm:$0xff] }
 0x4d0   :  { %v3415_v34 = vpack.i.bf16 %v1932_v30, %v1977_v32  ;;  %v1938_v62 = vld [vmem:[#allocation4 + $0x3] ss:$2 sm:$0xff]  ;;  %v1983_v24 = vld [vmem:[#allocation4 + $0x28] ss:$2 sm:$0x3] }
 0x4d1   :  { %3426 = vrot.lane.b32.xlu2 %v3425_v33, %s3479_s16  ;;  %3421 = vrot.lane.b32.xlu1 %v3420_v13, %s3480_s17  ;;  %v1930_v11 = vld [vmem:[#allocation4 + $0x1] ss:$2 sm:$0xff]  ;;  %v1973_v48 = vld [vmem:[#allocation4 + $0x16] ss:$2 sm:$0xff] }
 0x4d2   :  { %3416 = vrot.lane.b32.xlu0 %v3415_v34, %s3477_s30  ;;  %v1987_v12 = vld [vmem:[#allocation4 + $0x29] ss:$2 sm:$0x3]  ;;  %v1928_v53 = vld [vmem:[#allocation4 + $0x10] ss:$2 sm:$0x3] }
 0x4d3   :  { %v1979_v21 = vld [vmem:[#allocation4 + $0x27] ss:$2 sm:$0x3]  ;;  %v1926_v1 = vld [vmem:[#allocation4] ss:$2 sm:$0xff] }
 0x4d4   :  { %v1975_v7 = vld [vmem:[#allocation4 + $0x26] ss:$2 sm:$0x3] }
 0x4d9   :  { %1959 = vrot.lane.b32.xlu2 %v1938_v62, %s3479_s16  ;;  %1951 = vrot.lane.b32.xlu1 %v1934_v22, %s3480_s17 }
 0x4da   :  { %1943 = vrot.lane.b32.xlu0 %v1930_v11, %s3477_s30 }
 0x4e1   :  { %2008 = vrot.lane.b32.xlu2 %v1987_v12, %s3479_s16  ;;  %2000 = vrot.lane.b32.xlu1 %v1983_v24, %s3480_s17 }
 0x4e2   :  { %1992 = vrot.lane.b32.xlu0 %v1979_v21, %s3477_s30 }
 0x52b   :  { %v3427_v41 = vpop.permute.xlu2 %3426 }
 0x52c   :  { %v3428_v49 = vunpack.i.l.bf16 %v3427_v41  ;;  %v3429_v16 = vunpack.i.h.bf16 %v3427_v41 }
 0x533   :  { %v1960_v0 = vpop.permute.xlu2 %1959 }
 0x53b   :  { %v2009_v59 = vpop.permute.xlu2 %2008 }
 0x543   :  { %v3422_v42 = vpop.permute.xlu1 %3421 }
 0x544   :  { %v3423_v45 = vunpack.i.l.bf16 %v3422_v42  ;;  %v3417_v46 = vpop.permute.xlu0 %3416  ;;  %v3424_v51 = vunpack.i.h.bf16 %v3422_v42 }
 0x545   :  { %v3419_v29 = vunpack.i.h.bf16 %v3417_v46  ;;  %v3418_v47 = vunpack.i.l.bf16 %v3417_v46 }
 0x547   :  { %v2012_v54 = vsel %vm51_vm5, %v1973_v48, %v3418_v47  ;;  %v1966_v57 = vsel %vm51_vm5, %v1928_v53, %v3419_v29 }
 0x548   :  { %v2014_v58 = vsel %vm1803_vm6, %v2012_v54, %v3423_v45  ;;  %v1968_v60 = vsel %vm1803_vm6, %v1966_v57, %v3424_v51 }
 0x549   :  { %v2016_v50 = vsel %vm1969_vm1, %v2014_v58, %v3428_v49  ;;  %v1971_v17 = vsel %vm1969_vm1, %v1968_v60, %v3429_v16  ;;  %v2112_v16 = vld [vmem:[%s4892_s2 + $0x7] sm:$0x1] }
 0x54a   :  { %v2021_v63 = vrot.slane %v2016_v50, 6  ;;  %v2111_v50 = vld [vmem:[%s4892_s2 + $0x6] sm:$0x1] }
 0x54b   :  { %v1952_v56 = vpop.permute.xlu1 %1951 }
 0x54c   :  { %v1944_v18 = vpop.permute.xlu0 %1943  ;;  %v2026_v52 = vsel %vm2020_vm4, %v1971_v17, %v2021_v63  ;;  %v2979_v17 = vld [vmem:[%s4891_s1 + $0x130] sm:$0xff] }
 0x54d   :  { %v1965_v2 = vsel %vm51_vm5, %v1926_v1, %v1944_v18  ;;  %v2964_v18 = vld [vmem:[%s4891_s1 + $0xb8] sm:$0xff] }
 0x54e   :  { %v1967_v4 = vsel %vm1803_vm6, %v1965_v2, %v1952_v56  ;;  %2599 = vmatpush.bf16.msrb.mxu2 %v2964_v18  ;;  %v2983_v18 = vld [vmem:[%s4891_s1 + $0x150] sm:$0xff] }
 0x54f   :  { %v1970_v36 = vsel %vm1969_vm1, %v1967_v4, %v1960_v0  ;;  %v2980_v0 = vld [vmem:[%s4891_s1 + $0x138] sm:$0xff] }
 0x550   :  { %v2043_v6 = vpack.c.bf16 %v2026_v52, %v1970_v36  ;;  %v2972_v4 = vld [vmem:[%s4891_s1 + $0xf8] sm:$0xff]  ;;  %2625 = vmatpush.bf16.msra.mxu1 %v2980_v0  ;;  %v2963_v36 = vld [vmem:[%s4891_s1 + $0xb0] sm:$0xff]  ;;  %v2973_v0 = vld [vmem:[%s4891_s1 + $0x100] sm:$0xff] }
 0x551   :  { %2612 = vmatpush.bf16.msrb.mxu3 %v2972_v4  ;;  %v2990_v4 = vld [vmem:[%s4891_s1 + $0x188] sm:$0xff] }
 0x552   :  { %2101 = vmatmul.bf16.vlgmr.msra.gmra.mxu3 %v2043_v6  ;;  %v2971_v6 = vld [vmem:[%s4891_s1 + $0xf0] sm:$0xff]  ;;  %2600 = vmatpush.bf16.msrb.mxu2 %v2963_v36  ;;  %v2989_v36 = vld [vmem:[%s4891_s1 + $0x180] sm:$0xff] }
 0x553   :  { %v2001_v35 = vpop.permute.xlu1 %2000 }
 0x554   :  { %v1993_v19 = vpop.permute.xlu0 %1992  ;;  %2626 = vmatpush.bf16.msra.mxu1 %v2979_v17  ;;  %v2981_v17 = vld [vmem:[%s4891_s1 + $0x140] sm:$0xff] }
 0x555   :  { %v2013_v8 = vsel %vm51_vm5, %v1975_v7, %v1993_v19  ;;  %2613 = vmatpush.bf16.msrb.mxu3 %v2971_v6 }
 0x556   :  { %v2015_v3 = vsel %vm1803_vm6, %v2013_v8, %v2001_v35 }
 0x557   :  { %v2017_v20 = vsel %vm1969_vm1, %v2015_v3, %v2009_v59  ;;  %v2978_v59 = vld [vmem:[%s4891_s1 + $0x128] sm:$0xff] }
 0x558   :  { %v2022_v9 = vrot.slane %v2017_v20, 6  ;;  %v2962_v3 = vld [vmem:[%s4891_s1 + $0xa8] sm:$0xff]  ;;  %2627 = vmatpush.bf16.msra.mxu1 %v2978_v59 }
 0x559   :  { %2601 = vmatpush.bf16.msrb.mxu2 %v2962_v3 }
 0x55a   :  { %v2023_v37 = vsel %vm2020_vm4, %v2021_v63, %v2022_v9 }
 0x55b   :  { %v2044_v55 = vpack.c.bf16 %v2023_v37, %v2023_v37 }
 0x562   :  { %2106 = vmatmul.bf16.gmra.mxu3 %v2044_v55  ;;  %v2970_v55 = vld [vmem:[%s4891_s1 + $0xe8] sm:$0xff] }
 0x563   :  { %2614 = vmatpush.bf16.msrb.mxu3 %v2970_v55 }
 0x5d5   :  { %v2102_v44 = vpop.f32.mrf.mxu3 }
 0x5d6   :  { %v2126_v38 = vmul.f32 %v2102_v44, %v2102_v44  ;;  %v2113_v61 = vsel %vm1803_vm6, %v2102_v44, 0.0 }
 0x5d8   :  { %v2129_v32 = vsel %vm1803_vm6, %v2126_v38, 0.0 }
 0x5dd   :  { %v2104_v43 = vpop.f32.mrf.mxu3 }
 0x5de   :  { %v2127_v5 = vmul.f32 %v2104_v43, %v2104_v43  ;;  %v2114_v10 = vsel %vm1803_vm6, %v2104_v43, 0.0 }
 0x5df   :  { %v2115_v23 = vadd.f32 %v2114_v10, %v2113_v61 }
 0x5e0   :  { %v2130_v30 = vsel %vm1803_vm6, %v2127_v5, 0.0 }
 0x5e1   :  { %v2131_v34 = vadd.f32 %v2130_v30, %v2129_v32 }
 0x5e5   :  { %v2107_v31 = vpop.f32.mrf.mxu3 }
 0x5e6   :  { %v2117_v33 = vsel %vm2116_vm2, %v2107_v31, 0.0  ;;  %v2128_v13 = vmul.f32 %v2107_v31, %v2107_v31 }
 0x5e7   :  { %v2118_v62 = vadd.f32 %v2117_v33, %v2115_v23 }
 0x5e8   :  { %v2132_v22 = vsel %vm2116_vm2, %v2128_v13, 0.0 }
 0x5e9   :  { %v2119_v11 = vrot.slane %v2118_v62, 4  ;;  %v2133_v12 = vadd.f32 %v2132_v22, %v2131_v34 }
 0x5eb   :  { %v2120_v24 = vadd.f32 %v2119_v11, %v2118_v62  ;;  %v2134_v21 = vrot.slane %v2133_v12, 4 }
 0x5ed   :  { %v2121_v14 = vrot.slane %v2120_v24, 2  ;;  %v2135_v15 = vadd.f32 %v2134_v21, %v2133_v12  ;;  %v2109_v25 = vpop.f32.mrf.mxu3 }
 0x5ee   :  { %v2961_v25 = vld [vmem:[%s4891_s1 + $0xa0] sm:$0xff] }
 0x5ef   :  { %v2122_v26 = vadd.f32 %v2121_v14, %v2120_v24  ;;  %v2136_v27 = vrot.slane %v2135_v15, 2  ;;  %2602 = vmatpush.bf16.msrb.mxu2 %v2961_v25 }
 0x5f1   :  { %v2123_v28 = vrot.slane %v2122_v26, 1  ;;  %v2137_v39 = vadd.f32 %v2136_v27, %v2135_v15  ;;  %v2977_v27 = vld [vmem:[%s4891_s1 + $0x120] sm:$0xff] }
 0x5f2   :  { %2628 = vmatpush.bf16.msra.mxu1 %v2977_v27 }
 0x5f3   :  { %v2124_v40 = vadd.f32 %v2123_v28, %v2122_v26  ;;  %v2138_v41 = vrot.slane %v2137_v39, 1  ;;  %v2969_v26 = vld [vmem:[%s4891_s1 + $0xe0] sm:$0xff]  ;;  %v2960_v28 = vld [vmem:[%s4891_s1 + $0x98] sm:$0xff] }
 0x5f4   :  { %2615 = vmatpush.bf16.msrb.mxu3 %v2969_v26  ;;  %2603 = vmatpush.bf16.msrb.mxu2 %v2960_v28 }
 0x5f5   :  { %v2125_v42 = vmul.f32 0.05, %v2124_v40  ;;  %v2139_v45 = vadd.f32 %v2138_v41, %v2137_v39  ;;  %v2968_v39 = vld [vmem:[%s4891_s1 + $0xd8] sm:$0xff]  ;;  %v2959_v41 = vld [vmem:[%s4891_s1 + $0x90] sm:$0xff] }
 0x5f6   :  { %v2976_v40 = vld [vmem:[%s4891_s1 + $0x118] sm:$0xff] }
 0x5f7   :  { %v2140_v46 = vmul.f32 0.05, %v2139_v45  ;;  %v2141_v29 = vmul.f32 %v2125_v42, %v2125_v42  ;;  %2629 = vmatpush.bf16.msra.mxu1 %v2976_v40  ;;  %v2975_v45 = vld [vmem:[%s4891_s1 + $0x110] sm:$0xff] }
 0x5f8   :  { %2616 = vmatpush.bf16.msrb.mxu3 %v2968_v39  ;;  %2604 = vmatpush.bf16.msrb.mxu2 %v2959_v41 }
 0x5f9   :  { %v2142_v47 = vsub.f32 %v2140_v46, %v2141_v29  ;;  %v2958_v46 = vld [vmem:[%s4891_s1 + $0x88] sm:$0xff] }
 0x5fa   :  { %v2966_v29 = vld [vmem:[%s4891_s1 + $0xc8] sm:$0xff] }
 0x5fb   :  { %v2143_v48 = vmax.f32 %v2142_v47, 0.0  ;;  %2630 = vmatpush.bf16.msra.mxu1 %v2975_v45  ;;  %v2957_v47 = vld [vmem:[%s4891_s1 + $0x80] sm:$0xff] }
 0x5fc   :  { %2605 = vmatpush.bf16.msrb.mxu2 %v2958_v46 }
 0x5fd   :  { %v2144_v49 = vadd.f32 1e-05, %v2143_v48  ;;  %v2965_v48 = vld [vmem:[%s4891_s1 + $0xc0] sm:$0xff] }
 0x5ff   :  { %3464 = vrsqrt.f32 %v2144_v49  ;;  %vm2151_vm7 = vweird.f32 %v2144_v49 }
 0x600   :  { %2606 = vmatpush.bf16.msrb.mxu2 %v2957_v47 }
 0x605   :  { %v3465_v51 = vpop.eup %3464 }
 0x606   :  { %v2146_v53 = vmul.f32 %v3465_v51, %v2144_v49  ;;  %vm2152_vm5 = vweird.f32 %v3465_v51  ;;  %v2988_v49 = vld [vmem:[%s4891_s1 + $0x178] sm:$0xff] }
 0x607   :  { %vm2153_vm8 = vmor %vm2151_vm7, %vm2152_vm5  ;;  %2638 = vmatpush.bf16.msra.mxu2 %v2988_v49 }
 0x608   :  { %v2147_v54 = vmul.f32 %v3465_v51, %v2146_v53  ;;  %v2987_v53 = vld [vmem:[%s4891_s1 + $0x170] sm:$0xff] }
 0x60a   :  { %v2148_v57 = vmul.f32 0.5, %v2147_v54  ;;  %v2995_v54 = vld [vmem:[%s4891_s1 + $0x1b0] sm:$0xff] }
 0x60b   :  { %2639 = vmatpush.bf16.msra.mxu2 %v2987_v53 }
 0x60c   :  { %v2149_v58 = vsub.f32 1.5, %v2148_v57  ;;  %v2986_v57 = vld [vmem:[%s4891_s1 + $0x168] sm:$0xff] }
 0x60e   :  { %v2150_v56 = vmul.f32 %v3465_v51, %v2149_v58  ;;  %v2994_v58 = vld [vmem:[%s4891_s1 + $0x1a8] sm:$0xff] }
 0x60f   :  { %2640 = vmatpush.bf16.msra.mxu2 %v2986_v57 }
 0x610   :  { %v2154_v60 = vsel %vm2153_vm8, %v3465_v51, %v2150_v56  ;;  %v2996_v51 = vld [vmem:[%s4891_s1 + $0x1b8] sm:$0xff]  ;;  %v2993_v56 = vld [vmem:[%s4891_s1 + $0x1a0] sm:$0xff] }
 0x611   :  { %v2155_v63 = vmul.f32 %v2154_v60, %v2111_v50  ;;  %v2985_v50 = vld [vmem:[%s4891_s1 + $0x160] sm:$0xff]  ;;  %v2974_v60 = vld [vmem:[%s4891_s1 + $0x108] sm:$0xff] }
 0x612   :  { %2631 = vmatpush.bf16.msra.mxu1 %v2974_v60 }
 0x613   :  { %v2156_v1 = vmul.f32 %v2155_v63, %v2125_v42  ;;  %v2158_v2 = vperm.slane %v2155_v63, 0  ;;  %v2967_v42 = vld [vmem:[%s4891_s1 + $0xd0] sm:$0xff]  ;;  %2641 = vmatpush.bf16.msra.mxu2 %v2985_v50  ;;  %v2984_v63 = vld [vmem:[%s4891_s1 + $0x158] sm:$0xff] }
 0x614   :  { %2617 = vmatpush.bf16.msrb.mxu3 %v2967_v42 }
 0x615   :  { %v2157_v52 = vsub.f32 %v2112_v16, %v2156_v1  ;;  %v2159_v35 = vmul.f32 %v2158_v2, %v2102_v44  ;;  %v2160_v7 = vmul.f32 %v2158_v2, %v2104_v43  ;;  %v2161_v19 = vmul.f32 %v2158_v2, %v2107_v31  ;;  %v2992_v16 = vld [vmem:[%s4891_s1 + $0x198] sm:$0xff]  ;;  %v2991_v1 = vld [vmem:[%s4891_s1 + $0x190] sm:$0xff]  ;;  %v2982_v2 = vld [vmem:[%s4891_s1 + $0x148] sm:$0xff] }
 0x616   :  { %2632 = vmatpush.bf16.msra.mxu1 %v2973_v0 }
 0x617   :  { %v2162_v8 = vperm.slane %v2157_v52, 0  ;;  %2642 = vmatpush.bf16.msra.mxu2 %v2984_v63 }
 0x618   :  { %2618 = vmatpush.bf16.msrb.mxu3 %v2966_v29 }
 0x619   :  { %v2163_v20 = vadd.f32 %v2162_v8, %v2159_v35  ;;  %v2164_v9 = vadd.f32 %v2162_v8, %v2160_v7  ;;  %v2165_v37 = vadd.f32 %v2162_v8, %v2161_v19 }
 0x61b   :  { %vm2166_vm3 = vcmp.ge.f32.partialorder %v2163_v20, 0.0  ;;  %vm2167_vm9 = vcmp.ge.f32.partialorder %v2164_v9, 0.0  ;;  %vm2168_vm10 = vcmp.ge.f32.partialorder %v2165_v37, 0.0  ;;  %v2169_v44 = vmul.f32 0.01, %v2163_v20  ;;  %2643 = vmatpush.bf16.msra.mxu2 %v2983_v18 }
 0x61c   :  { %v2170_v43 = vmul.f32 0.01, %v2164_v9  ;;  %v2171_v5 = vmul.f32 0.01, %v2165_v37  ;;  %2619 = vmatpush.bf16.msrb.mxu3 %v2965_v48 }
 0x61d   :  { %v2172_v38 = vsel %vm2166_vm3, %v2163_v20, %v2169_v44 }
 0x61e   :  { %v2173_v10 = vsel %vm2167_vm9, %v2164_v9, %v2170_v43  ;;  %v2174_v61 = vsel %vm2168_vm10, %v2165_v37, %v2171_v5  ;;  %2175 = vst.msk [vmem:[#allocation5] sm:$0xff] %vm1803_vm6, %v2172_v38 }
 0x61f   :  { %2177 = vst.msk [vmem:[#allocation5 + $0x8] sm:$0x3] %vm2176_vm11, %v2173_v10  ;;  %2644 = vmatpush.bf16.msra.mxu2 %v2982_v2 }
 0x620   :  { %2179 = vst.msk [vmem:[#allocation5 + $0x8] sm:$0xfc] %vm2178_vm12, %v2173_v10  ;;  %2651 = vmatpush.bf16.msra.mxu3 %v2996_v51 }
 0x621   :  { %2180 = vst.msk [vmem:[#allocation5 + $0x10] sm:$0xf] %vm2116_vm2, %v2174_v61 }
 0x623   :  { %2645 = vmatpush.bf16.msra.mxu2 %v2981_v17 }
 0x624   :  { %2652 = vmatpush.bf16.msra.mxu3 %v2995_v54 }
 0x625   :  { %v2184_v30 = vld [vmem:[#allocation5 + $0x3] sm:$0x1]  ;;  %v2182_v23 = vld [vmem:[#allocation5 + $0x1] sm:$0x1]  ;;  %v2188_v31 = vld [vmem:[#allocation5 + $0x7] sm:$0x1] }
 0x626   :  { %v2186_v11 = vld [vmem:[#allocation5 + $0x5] sm:$0x1]  ;;  %v2190_v24 = vld [vmem:[#allocation5 + $0x9] sm:$0x1]  ;;  %v2183_v37 = vld [vmem:[#allocation5 + $0x2] sm:$0x1] }
 0x627   :  { %v2219_v32 = vld [vmem:[#allocation5 + $0xd] sm:$0x1]  ;;  %v2217_v33 = vld [vmem:[#allocation5 + $0xb] sm:$0x1]  ;;  %v2221_v12 = vld [vmem:[#allocation5 + $0xf] sm:$0x1] }
 0x628   :  { %v2223_v13 = vld [vmem:[#allocation5 + $0x11] sm:$0x1]  ;;  %v3435_v34 = vpack.i.bf16 %v2184_v30, %v2219_v32  ;;  %v3430_v62 = vpack.i.bf16 %v2182_v23, %v2217_v33  ;;  %v2225_v21 = vld [vmem:[#allocation5 + $0x13] sm:$0x1]  ;;  %v3450_v14 = vpack.i.bf16 %v2186_v11, %v2221_v12  ;;  %2653 = vmatpush.bf16.msra.mxu3 %v2994_v58  ;;  %v2218_v59 = vld [vmem:[#allocation5 + $0xc] sm:$0x1] }
 0x629   :  { %v3440_v22 = vpack.i.bf16 %v2188_v31, %v2223_v13  ;;  %v3445_v15 = vpack.i.bf16 %v2190_v24, %v2225_v21  ;;  %v2216_v3 = vld [vmem:[#allocation5 + $0xa] sm:$0x1]  ;;  %v2181_v44 = vld [vmem:[#allocation5] sm:$0x1]  ;;  %v2220_v11 = vld [vmem:[#allocation5 + $0xe] sm:$0x1] }
 0x62a   :  { %3436 = vrot.lane.b32.xlu1 %v3435_v34, %s3480_s17  ;;  %3431 = vrot.lane.b32.xlu0 %v3430_v62, %s3480_s17  ;;  %v2222_v12 = vld [vmem:[#allocation5 + $0x10] sm:$0x1]  ;;  %v2185_v21 = vld [vmem:[#allocation5 + $0x4] sm:$0x1]  ;;  %v2187_v46 = vld [vmem:[#allocation5 + $0x6] sm:$0x1] }
 0x62b   :  { %3441 = vrot.lane.b32.xlu2 %v3440_v22, %s3480_s17  ;;  %v2189_v29 = vld [vmem:[#allocation5 + $0x8] sm:$0x1] }
 0x62c   :  { %2654 = vmatpush.bf16.msra.mxu3 %v2993_v56  ;;  %v3455_v56 = vld [vmem:[%s4892_s2 + $0x8] ss:$0 sm:$0xff] }
 0x630   :  { %2655 = vmatpush.bf16.msra.mxu3 %v2992_v16 }
 0x632   :  { %3451 = vrot.lane.b32.xlu1 %v3450_v14, %s3480_s17  ;;  %3446 = vrot.lane.b32.xlu0 %v3445_v15, %s3480_s17  ;;  %v2224_v15 = vld [vmem:[#allocation5 + $0x12] sm:$0x1] }
 0x634   :  { %2656 = vmatpush.bf16.msra.mxu3 %v2991_v1 }
 0x638   :  { %2657 = vmatpush.bf16.msra.mxu3 %v2990_v4 }
 0x63c   :  { %2658 = vmatpush.bf16.msra.mxu3 %v2989_v36  ;;  %v3456_v36 = vld [vmem:[%s4892_s2 + $0x9] ss:$0 sm:$0xff] }
 0x685   :  { %v3442_v10 = vpop.permute.xlu2 %3441 }
 0x686   :  { %v3443_v13 = vunpack.i.l.bf16 %v3442_v10  ;;  %v3444_v39 = vunpack.i.h.bf16 %v3442_v10 }
 0x688   :  { %v2249_v25 = vsel %vm1803_vm6, %v2222_v12, %v3443_v13  ;;  %v2214_v47 = vsel %vm1803_vm6, %v2187_v46, %v3444_v39 }
 0x689   :  { %v2259_v42 = vrot.slane %v2249_v25, 7 }
 0x68b   :  { %v2270_v51 = vsel %vm2266_vm13, %v2214_v47, %v2259_v42 }
 0x68c   :  { %v2355_v53 = vpack.c.bf16 %v2270_v51, %v2270_v51 }
 0x69c   :  { %v3437_v52 = vpop.permute.xlu1 %3436  ;;  %v3432_v6 = vpop.permute.xlu0 %3431 }
 0x69d   :  { %v3439_v35 = vunpack.i.h.bf16 %v3437_v52  ;;  %v3438_v7 = vunpack.i.l.bf16 %v3437_v52  ;;  %v3434_v19 = vunpack.i.h.bf16 %v3432_v6  ;;  %v3433_v8 = vunpack.i.l.bf16 %v3432_v6 }
 0x69f   :  { %v2247_v20 = vsel %vm1803_vm6, %v2218_v59, %v3438_v7  ;;  %v2246_v9 = vsel %vm1803_vm6, %v2216_v3, %v3433_v8  ;;  %v2212_v5 = vsel %vm1803_vm6, %v2183_v37, %v3439_v35  ;;  %v2211_v38 = vsel %vm1803_vm6, %v2181_v44, %v3434_v19  ;;  %v3457_v8 = vld [vmem:[%s4892_s2 + $0xa] ss:$0 sm:$0xff] }
 0x6a0   :  { %v2257_v55 = vrot.slane %v2247_v20, 7  ;;  %v2256_v43 = vrot.slane %v2246_v9, 7 }
 0x6a2   :  { %v2267_v61 = vsel %vm2266_vm13, %v2211_v38, %v2256_v43  ;;  %v2268_v30 = vsel %vm2266_vm13, %v2212_v5, %v2257_v55 }
 0x6a3   :  { %v2352_v23 = vpack.c.bf16 %v2267_v61, %v2267_v61  ;;  %v2353_v31 = vpack.c.bf16 %v2268_v30, %v2268_v30 }
 0x6a4   :  { %v3452_v32 = vpop.permute.xlu1 %3451  ;;  %v3447_v33 = vpop.permute.xlu0 %3446 }
 0x6a5   :  { %v3454_v34 = vunpack.i.h.bf16 %v3452_v32  ;;  %v3453_v62 = vunpack.i.l.bf16 %v3452_v32  ;;  %v3448_v22 = vunpack.i.l.bf16 %v3447_v33  ;;  %2607 = vmatmul.bf16.vlgmr.msrb.gmra.mxu2 %v2352_v23  ;;  %2620 = vmatmul.bf16.vlgmr.msrb.gmra.mxu3 %v2353_v31  ;;  %v3449_v40 = vunpack.i.h.bf16 %v3447_v33 }
 0x6a7   :  { %v2248_v24 = vsel %vm1803_vm6, %v2220_v11, %v3453_v62  ;;  %v2213_v26 = vsel %vm1803_vm6, %v2185_v21, %v3454_v34  ;;  %v2250_v27 = vsel %vm1803_vm6, %v2224_v15, %v3448_v22  ;;  %v2215_v48 = vsel %vm1803_vm6, %v2189_v29, %v3449_v40 }
 0x6a8   :  { %v2258_v14 = vrot.slane %v2248_v24, 7  ;;  %v2260_v45 = vrot.slane %v2250_v27, 7  ;;  %vm2668_vm6 = vcmask 123904  }
 0x6aa   :  { %v2269_v28 = vsel %vm2266_vm13, %v2213_v26, %v2258_v14  ;;  %v2271_v49 = vsel %vm2266_vm13, %v2215_v48, %v2260_v45 }
 0x6ab   :  { %v2354_v41 = vpack.c.bf16 %v2269_v28, %v2269_v28  ;;  %v2356_v54 = vpack.c.bf16 %v2271_v49, %v2271_v49 }
 0x6ad   :  { %2633 = vmatmul.bf16.vlgmr.msra.gmra.mxu1 %v2354_v41 }
 0x6b5   :  { %2646 = vmatmul.bf16.vlgmr.msra.gmra.mxu2 %v2355_v53  ;;  %2659 = vmatmul.bf16.vlgmr.msra.gmra.mxu3 %v2356_v54 }
 0x728   :  { %v2608_v57 = vpop.f32.mrf.mxu2  ;;  %v2621_v58 = vpop.f32.mrf.mxu3 }
 0x729   :  { %v2609_v60 = vadd.f32 %v3455_v56, %v2608_v57 }
 0x72a   :  { %v2634_v50 = vpop.f32.mrf.mxu1 }
 0x72b   :  { %v2622_v18 = vadd.f32 %v2621_v58, %v2609_v60 }
 0x72d   :  { %v2635_v1 = vadd.f32 %v2634_v50, %v2622_v18 }
 0x730   :  { %v2610_v63 = vpop.f32.mrf.mxu2  ;;  %v2623_v16 = vpop.f32.mrf.mxu3 }
 0x732   :  { %v2636_v0 = vpop.f32.mrf.mxu1 }
 0x738   :  { %v2647_v2 = vpop.f32.mrf.mxu2  ;;  %v2660_v4 = vpop.f32.mrf.mxu3 }
 0x739   :  { %v2648_v17 = vadd.f32 %v2647_v2, %v2635_v1 }
 0x73b   :  { %v2661_v52 = vadd.f32 %v2660_v4, %v2648_v17 }
 0x73d   :  { %v2667_v6 = vmul.f32 %v3456_v36, %v2661_v52 }
 0x73f   :  { %v2669_v35 = vsel %vm2668_vm6, %v2667_v6, 0.0 }
 0x740   :  { %v2649_v7 = vpop.f32.mrf.mxu2  ;;  %v2662_v19 = vpop.f32.mrf.mxu3  ;;  %2670 = vadd.xlane.f32.xlu2 %v2669_v35 }
 0x7b3   :  { %v2671_v59 = vpop.xlane.xlu2 %2670 }
 0x7b4   :  { %v2673_v3 = vadd.f32 %v3457_v8, %v2671_v59 }
 0x7b6   :  { %v2674_v20 = vsub.f32 0.0, %v2673_v3 }
 0x7b8   :  { %v2675_v9 = vmul.f32 1.442695, %v2674_v20 }
 0x7ba   :  { %3466 = vpow2.f32 %v2675_v9 }
 0x7c0   :  { %v3467_v37 = vpop.eup %3466 }
 0x7c1   :  { %v2677_v55 = vadd.f32 1.0, %v3467_v37 }
 0x7c3   :  { %3468 = vrcp.f32 %v2677_v55  ;;  %v2689_v38 = vand.u32 2147483648, %v2677_v55  ;;  %v2687_v61 = vand.u32 2147483647, %v2677_v55  ;;  %vm2683_vm15 = vweird.f32 %v2677_v55 }
 0x7c5   :  { %v2690_v23 = vor.u32 1.1754944e-38, %v2689_v38  ;;  %vm2688_vm4 = vcmp.eq.f32.partialorder %v2687_v61, 8.507059e+37 }
 0x7c9   :  { %v3469_v44 = vpop.eup %3468 }
 0x7ca   :  { %v2679_v43 = vmul.f32 %v3469_v44, %v2677_v55  ;;  %vm2684_vm14 = vweird.f32 %v3469_v44 }
 0x7cb   :  { %vm2685_vm1 = vmor %vm2683_vm15, %vm2684_vm14 }
 0x7cc   :  { %v2680_v5 = vsub.f32 1.0, %v2679_v43 }
 0x7ce   :  { %v2681_v10 = vmul.f32 %v3469_v44, %v2680_v5 }
 0x7d0   :  { %v2682_v30 = vadd.f32 %v3469_v44, %v2681_v10 }
 0x7d2   :  { %v2686_v31 = vsel %vm2685_vm1, %v3469_v44, %v2682_v30 }
 0x7d3   :  { %v2691_v32 = vsel %vm2688_vm4, %v2690_v23, %v2686_v31 }
 0x7d4   :  { %2694 = vst.msk [vmem:[%s4893_s3] sm:$0x3] %vm2693_vm0, %v2691_v32 }

</bundles_post_ra>
